<compile_context>
chip_gen: v7x
topology: tpu7x:2x2x1
jax: 0.10.0
libtpu: 0.0.40
codegen_flags: <defaults>
</compile_context>

<pallas_src>
import functools

import jax
import jax.numpy as jnp
from jax.experimental import pallas as pl
from jax.experimental.pallas import tpu as pltpu

F32 = jnp.float32
LN_EPS = 1e-12  # HF BigBird layer_norm_eps default


# ------------------------------ Pallas kernel -------------------------------

def _layernorm(h, g, b):
    mu = jnp.mean(h, axis=-1, keepdims=True)
    var = jnp.mean((h - mu) ** 2, axis=-1, keepdims=True)
    return (h - mu) * jax.lax.rsqrt(var + LN_EPS) * g + b


def _bigbird_fused_kernel(x_ref, enc_w_ref, enc_b_ref, pre_w_ref, pre_b_ref,
                          wqkv_ref, bqkv_ref, wo_ref, bo_ref,
                          ln1_g_ref, ln1_b_ref,
                          w_ff1_ref, b_ff1_ref, w_ff2_ref, b_ff2_ref,
                          ln2_g_ref, ln2_b_ref,
                          head_w_ref, head_b_ref,
                          o_ref, ctx_ref, *, n_layers, n_heads):
    # FeatureEncoder: linear node encoder
    h = jnp.dot(x_ref[...], enc_w_ref[...], preferred_element_type=F32) + enc_b_ref[...]
    # GNNPreMP (edge-less): linear + ReLU
    h = jnp.maximum(
        jnp.dot(h, pre_w_ref[...], preferred_element_type=F32) + pre_b_ref[...], 0.0)

    n, d = h.shape
    dh = d // n_heads

    for l in range(n_layers):                         # static unroll over layers
        # ---- multi-head self-attention (dense / full-attention fallback) ----
        # fused QKV projection: one [N, D] x [D, 3D] matmul.
        # 1/sqrt(dh) is already folded into the q columns of wqkv/bqkv (host-side,
        # one-time), so no per-layer scale multiply here.
        qkv = jnp.dot(h, wqkv_ref[l], preferred_element_type=F32) + bqkv_ref[l]
        q = qkv[:, :d]
        k = qkv[:, d:2 * d]
        v = qkv[:, 2 * d:]

        for hd in range(n_heads):                     # static unroll over heads
            lo, hi = hd * dh, (hd + 1) * dh
            qh, kh, vh = q[:, lo:hi], k[:, lo:hi], v[:, lo:hi]
            # q . k^T without an explicit transpose (contract last dims)
            s = jax.lax.dot_general(qh, kh, (((1,), (1,)), ((), ())),
                                    preferred_element_type=F32)        # [N, N]
            m = jnp.max(s, axis=-1, keepdims=True)
            p = jnp.exp(s - m)                                          # EUP
            inv = pl.reciprocal(jnp.sum(p, axis=-1, keepdims=True), approx=True)
            # normalize AFTER PV: [N, dh] VPU multiply instead of [N, N]
            ctx_ref[:, lo:hi] = jnp.dot(p, vh, preferred_element_type=F32) * inv

        # single full-width output projection (K = D contraction, one MXU sequence)
        attn = jnp.dot(ctx_ref[...], wo_ref[l], preferred_element_type=F32) + bo_ref[l]

        # residual + LayerNorm (fused epilogue)
        h = _layernorm(attn + h, ln1_g_ref[l], ln1_b_ref[l])

        # ---- feed-forward ----
        inter = jax.nn.gelu(
            jnp.dot(h, w_ff1_ref[l], preferred_element_type=F32) + b_ff1_ref[l],
            approximate=True)
        ff = jnp.dot(inter, w_ff2_ref[l], preferred_element_type=F32) + b_ff2_ref[l]
        h = _layernorm(ff + h, ln2_g_ref[l], ln2_b_ref[l])

    # Post-MP GNN head: linear dim_hidden -> dim_out
    # (lane width 8 -> masked stores; negligible at this size, see TODO above)
    o_ref[...] = (jnp.dot(h, head_w_ref[...], preferred_element_type=F32)
                  + head_b_ref[...])


# ------------------------------ pallas_call wrapper --------------------------

def _full_spec(shape):
    nd = len(shape)
    return pl.BlockSpec(shape, lambda i, _nd=nd: (0,) * _nd)


def bigbird_forward(x, p, n_heads):
    n, _ = x.shape
    n_layers, d, _ = p["wqkv"].shape
    dim_out = p["head_w"].shape[1]
    ff = p["w_ff1"].shape[2]

    inputs = [
        x,
        p["enc_w"], p["enc_b"].reshape(1, -1),
        p["pre_w"], p["pre_b"].reshape(1, -1),
        p["wqkv"], p["bqkv"].reshape(n_layers, 1, 3 * d),
        p["wo"], p["bo"].reshape(n_layers, 1, d),
        p["ln1_g"].reshape(n_layers, 1, d), p["ln1_b"].reshape(n_layers, 1, d),
        p["w_ff1"], p["b_ff1"].reshape(n_layers, 1, ff),
        p["w_ff2"], p["b_ff2"].reshape(n_layers, 1, d),
        p["ln2_g"].reshape(n_layers, 1, d), p["ln2_b"].reshape(n_layers, 1, d),
        p["head_w"], p["head_b"].reshape(1, -1),
    ]
    return pl.pallas_call(
        functools.partial(_bigbird_fused_kernel, n_layers=n_layers, n_heads=n_heads),
        grid=(1,),
        out_shape=jax.ShapeDtypeStruct((n, dim_out), F32),
        in_specs=[_full_spec(a.shape) for a in inputs],
        out_specs=_full_spec((n, dim_out)),
        scratch_shapes=[pltpu.VMEM((n, d), F32)],      # per-layer merged-head ctx
        compiler_params=pltpu.CompilerParams(dimension_semantics=("arbitrary",)),
    )(*inputs)


# ------------------------------ pure-JAX reference ---------------------------

def bigbird_reference(x, p, n_heads):
    """Reference uses the RAW (unscaled) params and the explicit 1/sqrt(dh)."""
    def ln(h, g, b):
        mu = h.mean(-1, keepdims=True)
        var = ((h - mu) ** 2).mean(-1, keepdims=True)
        return (h - mu) / jnp.sqrt(var + LN_EPS) * g + b

    h = x @ p["enc_w"] + p["enc_b"]
    h = jnp.maximum(h @ p["pre_w"] + p["pre_b"], 0.0)
    n, d = h.shape
    dh = d // n_heads
    for l in range(p["wqkv"].shape[0]):
        qkv = h @ p["wqkv"][l] + p["bqkv"][l]
        q, k, v = qkv[:, :d] / (dh ** 0.5), qkv[:, d:2 * d], qkv[:, 2 * d:]
        qh = q.reshape(n, n_heads, dh).transpose(1, 0, 2)
        kh = k.reshape(n, n_heads, dh).transpose(1, 0, 2)
        vh = v.reshape(n, n_heads, dh).transpose(1, 0, 2)
        s = jnp.einsum("hnd,hmd->hnm", qh, kh)
        pr = jax.nn.softmax(s, axis=-1)
        ctx = jnp.einsum("hnm,hmd->hnd", pr, vh).transpose(1, 0, 2).reshape(n, d)
        h = ln(ctx @ p["wo"][l] + p["bo"][l] + h, p["ln1_g"][l], p["ln1_b"][l])
        inter = jax.nn.gelu(h @ p["w_ff1"][l] + p["b_ff1"][l], approximate=True)
        h = ln(inter @ p["w_ff2"][l] + p["b_ff2"][l] + h, p["ln2_g"][l], p["ln2_b"][l])
    return h @ p["head_w"] + p["head_b"]


# ------------------------------ parameter init -------------------------------

def init_params(key, dim_in, dim_hidden, ff_dim, n_layers, dim_out):
    def dense(k, *shape):
        return 0.02 * jax.random.normal(k, shape, dtype=F32)

    ks = jax.random.split(key, 9)
    p = {
        "enc_w": dense(ks[0], dim_in, dim_hidden),
        "enc_b": jnp.zeros((dim_hidden,), F32),
        "pre_w": dense(ks[1], dim_hidden, dim_hidden),
        "pre_b": jnp.zeros((dim_hidden,), F32),
        "wqkv": dense(ks[2], n_layers, dim_hidden, 3 * dim_hidden),
        "bqkv": jnp.zeros((n_layers, 3 * dim_hidden), F32),
        "wo": dense(ks[3], n_layers, dim_hidden, dim_hidden),
        "bo": jnp.zeros((n_layers, dim_hidden), F32),
        "ln1_g": jnp.ones((n_layers, dim_hidden), F32),
        "ln1_b": jnp.zeros((n_layers, dim_hidden), F32),
        "w_ff1": dense(ks[4], n_layers, dim_hidden, ff_dim),
        "b_ff1": jnp.zeros((n_layers, ff_dim), F32),
        "w_ff2": dense(ks[5], n_layers, ff_dim, dim_hidden),
        "b_ff2": jnp.zeros((n_layers, dim_hidden), F32),
        "ln2_g": jnp.ones((n_layers, dim_hidden), F32),
        "ln2_b": jnp.zeros((n_layers, dim_hidden), F32),
        "head_w": dense(ks[6], dim_hidden, dim_out),
        "head_b": jnp.zeros((dim_out,), F32),
    }
    return p


def fold_attention_scale(p, n_heads):
    """One-time constant fold of 1/sqrt(dh) into the q columns of wqkv / bqkv.

    Done at parameter-prep time (NOT inside the per-call wrapper) so it never becomes
    a per-call, un-hidden XLA op.  Mathematically identical to scaling q in-kernel.
    """
    d = p["wqkv"].shape[1]
    dh = d // n_heads
    scale = 1.0 / (dh ** 0.5)
    out = dict(p)
    out["wqkv"] = jnp.concatenate(
        [p["wqkv"][:, :, :d] * scale, p["wqkv"][:, :, d:]], axis=-1)
    out["bqkv"] = jnp.concatenate(
        [p["bqkv"][:, :d] * scale, p["bqkv"][:, d:]], axis=-1)
    return out


# ----------------------------------- main ------------------------------------

if __name__ == "__main__":
    N_NODES = 64        # graph nodes ("sequence" length)
    DIM_IN = 16         # raw node feature dim
    DIM_HIDDEN = 32     # cfg.gt.dim_hidden == cfg.gnn.dim_inner
    N_HEADS = 4         # cfg.gt.n_heads
    N_LAYERS = 2        # cfg.gt.layers
    FF_DIM = 2 * DIM_HIDDEN
    DIM_OUT = 8

    key = jax.random.PRNGKey(0)
    k_x, k_p = jax.random.split(key)
    x = jax.random.normal(k_x, (N_NODES, DIM_IN), dtype=F32)
    raw_params = init_params(k_p, DIM_IN, DIM_HIDDEN, FF_DIM, N_LAYERS, DIM_OUT)
    kernel_params = fold_attention_scale(raw_params, N_HEADS)

    out = bigbird_forward(x, kernel_params, N_HEADS)
    out = jax.block_until_ready(out)

    ref = bigbird_reference(x, raw_params, N_HEADS)

    assert out.shape == (N_NODES, DIM_OUT)
    assert bool(jnp.all(jnp.isfinite(out)))
    # f32 everywhere; only approximation is pl.reciprocal(approx=True) in the softmax
    # denominator (relative error ~1e-4), so a much tighter tolerance than before.
    max_err = float(jnp.max(jnp.abs(out - ref)))
    assert max_err < 5e-3, f"max abs error vs reference: {max_err}"
    print("KERNEL_OK")
</pallas_src>

<mosaic_0001>
module attributes {stable_mosaic.version = 11 : i64} {
  func.func @_bigbird_fused_kernel(%arg0: i32, %arg1: memref<64x16xf32, #tpu.memory_space<vmem>>, %arg2: memref<16x32xf32, #tpu.memory_space<vmem>>, %arg3: memref<1x32xf32, #tpu.memory_space<vmem>>, %arg4: memref<32x32xf32, #tpu.memory_space<vmem>>, %arg5: memref<1x32xf32, #tpu.memory_space<vmem>>, %arg6: memref<2x32x96xf32, #tpu.memory_space<vmem>>, %arg7: memref<2x1x96xf32, #tpu.memory_space<vmem>>, %arg8: memref<2x32x32xf32, #tpu.memory_space<vmem>>, %arg9: memref<2x1x32xf32, #tpu.memory_space<vmem>>, %arg10: memref<2x1x32xf32, #tpu.memory_space<vmem>>, %arg11: memref<2x1x32xf32, #tpu.memory_space<vmem>>, %arg12: memref<2x32x64xf32, #tpu.memory_space<vmem>>, %arg13: memref<2x1x64xf32, #tpu.memory_space<vmem>>, %arg14: memref<2x64x32xf32, #tpu.memory_space<vmem>>, %arg15: memref<2x1x32xf32, #tpu.memory_space<vmem>>, %arg16: memref<2x1x32xf32, #tpu.memory_space<vmem>>, %arg17: memref<2x1x32xf32, #tpu.memory_space<vmem>>, %arg18: memref<32x8xf32, #tpu.memory_space<vmem>>, %arg19: memref<1x8xf32, #tpu.memory_space<vmem>>, %arg20: memref<64x8xf32, #tpu.memory_space<vmem>>, %arg21: memref<64x32xf32, #tpu.memory_space<vmem>>) attributes {dimension_semantics = [#tpu.dimension_semantics<arbitrary>], iteration_bounds = array<i64: 1>, scalar_prefetch = 0 : i64, scratch_operands = 1 : i64, tpu.core_type = #tpu.core_type<tc>, window_params = [{pipeline_mode = #tpu.pipeline_mode<synchronous>, transform_indices = @transform_0, window_bounds = array<i64: 64, 16>}, {pipeline_mode = #tpu.pipeline_mode<synchronous>, transform_indices = @transform_1, window_bounds = array<i64: 16, 32>}, {pipeline_mode = #tpu.pipeline_mode<synchronous>, transform_indices = @transform_2, window_bounds = array<i64: 1, 32>}, {pipeline_mode = #tpu.pipeline_mode<synchronous>, transform_indices = @transform_3, window_bounds = array<i64: 32, 32>}, {pipeline_mode = #tpu.pipeline_mode<synchronous>, transform_indices = @transform_4, window_bounds = array<i64: 1, 32>}, {pipeline_mode = #tpu.pipeline_mode<synchronous>, transform_indices = @transform_5, window_bounds = array<i64: 2, 32, 96>}, {pipeline_mode = #tpu.pipeline_mode<synchronous>, transform_indices = @transform_6, window_bounds = array<i64: 2, 1, 96>}, {pipeline_mode = #tpu.pipeline_mode<synchronous>, transform_indices = @transform_7, window_bounds = array<i64: 2, 32, 32>}, {pipeline_mode = #tpu.pipeline_mode<synchronous>, transform_indices = @transform_8, window_bounds = array<i64: 2, 1, 32>}, {pipeline_mode = #tpu.pipeline_mode<synchronous>, transform_indices = @transform_9, window_bounds = array<i64: 2, 1, 32>}, {pipeline_mode = #tpu.pipeline_mode<synchronous>, transform_indices = @transform_10, window_bounds = array<i64: 2, 1, 32>}, {pipeline_mode = #tpu.pipeline_mode<synchronous>, transform_indices = @transform_11, window_bounds = array<i64: 2, 32, 64>}, {pipeline_mode = #tpu.pipeline_mode<synchronous>, transform_indices = @transform_12, window_bounds = array<i64: 2, 1, 64>}, {pipeline_mode = #tpu.pipeline_mode<synchronous>, transform_indices = @transform_13, window_bounds = array<i64: 2, 64, 32>}, {pipeline_mode = #tpu.pipeline_mode<synchronous>, transform_indices = @transform_14, window_bounds = array<i64: 2, 1, 32>}, {pipeline_mode = #tpu.pipeline_mode<synchronous>, transform_indices = @transform_15, window_bounds = array<i64: 2, 1, 32>}, {pipeline_mode = #tpu.pipeline_mode<synchronous>, transform_indices = @transform_16, window_bounds = array<i64: 2, 1, 32>}, {pipeline_mode = #tpu.pipeline_mode<synchronous>, transform_indices = @transform_17, window_bounds = array<i64: 32, 8>}, {pipeline_mode = #tpu.pipeline_mode<synchronous>, transform_indices = @transform_18, window_bounds = array<i64: 1, 8>}, {pipeline_mode = #tpu.pipeline_mode<synchronous>, transform_indices = @transform_19, window_bounds = array<i64: 64, 8>}]} {
    %c0 = arith.constant 0 : index
    %c0_0 = arith.constant 0 : index
    %0 = vector.load %arg1[%c0, %c0_0] : memref<64x16xf32, #tpu.memory_space<vmem>>, vector<64x16xf32>
    %c0_1 = arith.constant 0 : index
    %c0_2 = arith.constant 0 : index
    %1 = vector.load %arg2[%c0_1, %c0_2] : memref<16x32xf32, #tpu.memory_space<vmem>>, vector<16x32xf32>
    %cst = arith.constant dense<0.000000e+00> : vector<64x32xf32>
    %2 = tpu.matmul %0, %1, %cst {dimension_numbers = #tpu.dot_dimension_numbers<[1], [0], [0], [1], [0, 0, 1, 1], [], []>} : vector<64x16xf32>, vector<16x32xf32>, vector<64x32xf32> -> vector<64x32xf32>
    %c0_3 = arith.constant 0 : index
    %c0_4 = arith.constant 0 : index
    %3 = vector.load %arg3[%c0_3, %c0_4] : memref<1x32xf32, #tpu.memory_space<vmem>>, vector<1x32xf32>
    %4 = vector.broadcast %3 : vector<1x32xf32> to vector<64x32xf32>
    %5 = arith.addf %2, %4 : vector<64x32xf32>
    %c0_5 = arith.constant 0 : index
    %c0_6 = arith.constant 0 : index
    %6 = vector.load %arg4[%c0_5, %c0_6] : memref<32x32xf32, #tpu.memory_space<vmem>>, vector<32x32xf32>
    %cst_7 = arith.constant dense<0.000000e+00> : vector<64x32xf32>
    %7 = tpu.matmul %5, %6, %cst_7 {dimension_numbers = #tpu.dot_dimension_numbers<[1], [0], [0], [1], [0, 0, 1, 1], [], []>} : vector<64x32xf32>, vector<32x32xf32>, vector<64x32xf32> -> vector<64x32xf32>
    %c0_8 = arith.constant 0 : index
    %c0_9 = arith.constant 0 : index
    %8 = vector.load %arg5[%c0_8, %c0_9] : memref<1x32xf32, #tpu.memory_space<vmem>>, vector<1x32xf32>
    %9 = vector.broadcast %8 : vector<1x32xf32> to vector<64x32xf32>
    %10 = arith.addf %7, %9 : vector<64x32xf32>
    %cst_10 = arith.constant 0.000000e+00 : f32
    %11 = vector.broadcast %cst_10 : f32 to vector<64x32xf32>
    %12 = arith.maximumf %10, %11 : vector<64x32xf32>
    %c0_11 = arith.constant 0 : index
    %c0_12 = arith.constant 0 : index
    %c0_13 = arith.constant 0 : index
    %13 = vector.load %arg6[%c0_11, %c0_12, %c0_13] : memref<2x32x96xf32, #tpu.memory_space<vmem>>, vector<1x32x96xf32>
    %14 = vector.shape_cast %13 : vector<1x32x96xf32> to vector<32x96xf32>
    %cst_14 = arith.constant dense<0.000000e+00> : vector<64x96xf32>
    %15 = tpu.matmul %12, %14, %cst_14 {dimension_numbers = #tpu.dot_dimension_numbers<[1], [0], [0], [1], [0, 0, 1, 1], [], []>} : vector<64x32xf32>, vector<32x96xf32>, vector<64x96xf32> -> vector<64x96xf32>
    %c0_15 = arith.constant 0 : index
    %c0_16 = arith.constant 0 : index
    %c0_17 = arith.constant 0 : index
    %16 = vector.load %arg7[%c0_15, %c0_16, %c0_17] : memref<2x1x96xf32, #tpu.memory_space<vmem>>, vector<1x1x96xf32>
    %17 = vector.shape_cast %16 : vector<1x1x96xf32> to vector<1x96xf32>
    %18 = vector.broadcast %17 : vector<1x96xf32> to vector<64x96xf32>
    %19 = arith.addf %15, %18 : vector<64x96xf32>
    %20 = vector.extract_strided_slice %19 {offsets = [0, 0], sizes = [64, 32], strides = [1, 1]} : vector<64x96xf32> to vector<64x32xf32>
    %21 = vector.extract_strided_slice %19 {offsets = [0, 32], sizes = [64, 32], strides = [1, 1]} : vector<64x96xf32> to vector<64x32xf32>
    %22 = vector.extract_strided_slice %19 {offsets = [0, 64], sizes = [64, 32], strides = [1, 1]} : vector<64x96xf32> to vector<64x32xf32>
    %23 = vector.extract_strided_slice %20 {offsets = [0, 0], sizes = [64, 8], strides = [1, 1]} : vector<64x32xf32> to vector<64x8xf32>
    %24 = vector.extract_strided_slice %21 {offsets = [0, 0], sizes = [64, 8], strides = [1, 1]} : vector<64x32xf32> to vector<64x8xf32>
    %25 = vector.extract_strided_slice %22 {offsets = [0, 0], sizes = [64, 8], strides = [1, 1]} : vector<64x32xf32> to vector<64x8xf32>
    %cst_18 = arith.constant dense<0.000000e+00> : vector<64x64xf32>
    %26 = tpu.matmul %23, %24, %cst_18 {dimension_numbers = #tpu.dot_dimension_numbers<[1], [1], [0], [0], [0, 0, 1, 0], [], []>} : vector<64x8xf32>, vector<64x8xf32>, vector<64x64xf32> -> vector<64x64xf32>
    %cst_19 = arith.constant dense<0xFF800000> : vector<64xf32>
    %27 = vector.multi_reduction <maximumf>, %26, %cst_19 [1] : vector<64x64xf32> to vector<64xf32>
    %28 = vector.shape_cast %27 : vector<64xf32> to vector<64x1xf32>
    %29 = vector.broadcast %28 : vector<64x1xf32> to vector<64x64xf32>
    %30 = arith.subf %26, %29 : vector<64x64xf32>
    %31 = math.exp %30 : vector<64x64xf32>
    %cst_20 = arith.constant dense<0.000000e+00> : vector<64xf32>
    %32 = vector.multi_reduction <add>, %31, %cst_20 [1] : vector<64x64xf32> to vector<64xf32>
    %33 = vector.shape_cast %32 : vector<64xf32> to vector<64x1xf32>
    %34 = tpu.reciprocal %33 {approx = true} : vector<64x1xf32> -> vector<64x1xf32>
    %cst_21 = arith.constant dense<0.000000e+00> : vector<64x8xf32>
    %35 = tpu.matmul %31, %25, %cst_21 {dimension_numbers = #tpu.dot_dimension_numbers<[1], [0], [0], [1], [0, 0, 1, 1], [], []>} : vector<64x64xf32>, vector<64x8xf32>, vector<64x8xf32> -> vector<64x8xf32>
    %36 = vector.broadcast %34 : vector<64x1xf32> to vector<64x8xf32>
    %37 = arith.mulf %35, %36 : vector<64x8xf32>
    %c0_22 = arith.constant 0 : index
    %c0_23 = arith.constant 0 : index
    %38 = vector.load %arg21[%c0_22, %c0_23] : memref<64x32xf32, #tpu.memory_space<vmem>>, vector<64x8xf32>
    tpu.vector_store %arg21[%c0_22, %c0_23], %37 {strides = array<i32>} : memref<64x32xf32, #tpu.memory_space<vmem>>, vector<64x8xf32>,
    %39 = vector.extract_strided_slice %20 {offsets = [0, 8], sizes = [64, 8], strides = [1, 1]} : vector<64x32xf32> to vector<64x8xf32>
    %40 = vector.extract_strided_slice %21 {offsets = [0, 8], sizes = [64, 8], strides = [1, 1]} : vector<64x32xf32> to vector<64x8xf32>
    %41 = vector.extract_strided_slice %22 {offsets = [0, 8], sizes = [64, 8], strides = [1, 1]} : vector<64x32xf32> to vector<64x8xf32>
    %cst_24 = arith.constant dense<0.000000e+00> : vector<64x64xf32>
    %42 = tpu.matmul %39, %40, %cst_24 {dimension_numbers = #tpu.dot_dimension_numbers<[1], [1], [0], [0], [0, 0, 1, 0], [], []>} : vector<64x8xf32>, vector<64x8xf32>, vector<64x64xf32> -> vector<64x64xf32>
    %cst_25 = arith.constant dense<0xFF800000> : vector<64xf32>
    %43 = vector.multi_reduction <maximumf>, %42, %cst_25 [1] : vector<64x64xf32> to vector<64xf32>
    %44 = vector.shape_cast %43 : vector<64xf32> to vector<64x1xf32>
    %45 = vector.broadcast %44 : vector<64x1xf32> to vector<64x64xf32>
    %46 = arith.subf %42, %45 : vector<64x64xf32>
    %47 = math.exp %46 : vector<64x64xf32>
    %cst_26 = arith.constant dense<0.000000e+00> : vector<64xf32>
    %48 = vector.multi_reduction <add>, %47, %cst_26 [1] : vector<64x64xf32> to vector<64xf32>
    %49 = vector.shape_cast %48 : vector<64xf32> to vector<64x1xf32>
    %50 = tpu.reciprocal %49 {approx = true} : vector<64x1xf32> -> vector<64x1xf32>
    %cst_27 = arith.constant dense<0.000000e+00> : vector<64x8xf32>
    %51 = tpu.matmul %47, %41, %cst_27 {dimension_numbers = #tpu.dot_dimension_numbers<[1], [0], [0], [1], [0, 0, 1, 1], [], []>} : vector<64x64xf32>, vector<64x8xf32>, vector<64x8xf32> -> vector<64x8xf32>
    %52 = vector.broadcast %50 : vector<64x1xf32> to vector<64x8xf32>
    %53 = arith.mulf %51, %52 : vector<64x8xf32>
    %c0_28 = arith.constant 0 : index
    %c8 = arith.constant 8 : index
    %54 = vector.load %arg21[%c0_28, %c8] : memref<64x32xf32, #tpu.memory_space<vmem>>, vector<64x8xf32>
    tpu.vector_store %arg21[%c0_28, %c8], %53 {strides = array<i32>} : memref<64x32xf32, #tpu.memory_space<vmem>>, vector<64x8xf32>,
    %55 = vector.extract_strided_slice %20 {offsets = [0, 16], sizes = [64, 8], strides = [1, 1]} : vector<64x32xf32> to vector<64x8xf32>
    %56 = vector.extract_strided_slice %21 {offsets = [0, 16], sizes = [64, 8], strides = [1, 1]} : vector<64x32xf32> to vector<64x8xf32>
    %57 = vector.extract_strided_slice %22 {offsets = [0, 16], sizes = [64, 8], strides = [1, 1]} : vector<64x32xf32> to vector<64x8xf32>
    %cst_29 = arith.constant dense<0.000000e+00> : vector<64x64xf32>
    %58 = tpu.matmul %55, %56, %cst_29 {dimension_numbers = #tpu.dot_dimension_numbers<[1], [1], [0], [0], [0, 0, 1, 0], [], []>} : vector<64x8xf32>, vector<64x8xf32>, vector<64x64xf32> -> vector<64x64xf32>
    %cst_30 = arith.constant dense<0xFF800000> : vector<64xf32>
    %59 = vector.multi_reduction <maximumf>, %58, %cst_30 [1] : vector<64x64xf32> to vector<64xf32>
    %60 = vector.shape_cast %59 : vector<64xf32> to vector<64x1xf32>
    %61 = vector.broadcast %60 : vector<64x1xf32> to vector<64x64xf32>
    %62 = arith.subf %58, %61 : vector<64x64xf32>
    %63 = math.exp %62 : vector<64x64xf32>
    %cst_31 = arith.constant dense<0.000000e+00> : vector<64xf32>
    %64 = vector.multi_reduction <add>, %63, %cst_31 [1] : vector<64x64xf32> to vector<64xf32>
    %65 = vector.shape_cast %64 : vector<64xf32> to vector<64x1xf32>
    %66 = tpu.reciprocal %65 {approx = true} : vector<64x1xf32> -> vector<64x1xf32>
    %cst_32 = arith.constant dense<0.000000e+00> : vector<64x8xf32>
    %67 = tpu.matmul %63, %57, %cst_32 {dimension_numbers = #tpu.dot_dimension_numbers<[1], [0], [0], [1], [0, 0, 1, 1], [], []>} : vector<64x64xf32>, vector<64x8xf32>, vector<64x8xf32> -> vector<64x8xf32>
    %68 = vector.broadcast %66 : vector<64x1xf32> to vector<64x8xf32>
    %69 = arith.mulf %67, %68 : vector<64x8xf32>
    %c0_33 = arith.constant 0 : index
    %c16 = arith.constant 16 : index
    %70 = vector.load %arg21[%c0_33, %c16] : memref<64x32xf32, #tpu.memory_space<vmem>>, vector<64x8xf32>
    tpu.vector_store %arg21[%c0_33, %c16], %69 {strides = array<i32>} : memref<64x32xf32, #tpu.memory_space<vmem>>, vector<64x8xf32>,
    %71 = vector.extract_strided_slice %20 {offsets = [0, 24], sizes = [64, 8], strides = [1, 1]} : vector<64x32xf32> to vector<64x8xf32>
    %72 = vector.extract_strided_slice %21 {offsets = [0, 24], sizes = [64, 8], strides = [1, 1]} : vector<64x32xf32> to vector<64x8xf32>
    %73 = vector.extract_strided_slice %22 {offsets = [0, 24], sizes = [64, 8], strides = [1, 1]} : vector<64x32xf32> to vector<64x8xf32>
    %cst_34 = arith.constant dense<0.000000e+00> : vector<64x64xf32>
    %74 = tpu.matmul %71, %72, %cst_34 {dimension_numbers = #tpu.dot_dimension_numbers<[1], [1], [0], [0], [0, 0, 1, 0], [], []>} : vector<64x8xf32>, vector<64x8xf32>, vector<64x64xf32> -> vector<64x64xf32>
    %cst_35 = arith.constant dense<0xFF800000> : vector<64xf32>
    %75 = vector.multi_reduction <maximumf>, %74, %cst_35 [1] : vector<64x64xf32> to vector<64xf32>
    %76 = vector.shape_cast %75 : vector<64xf32> to vector<64x1xf32>
    %77 = vector.broadcast %76 : vector<64x1xf32> to vector<64x64xf32>
    %78 = arith.subf %74, %77 : vector<64x64xf32>
    %79 = math.exp %78 : vector<64x64xf32>
    %cst_36 = arith.constant dense<0.000000e+00> : vector<64xf32>
    %80 = vector.multi_reduction <add>, %79, %cst_36 [1] : vector<64x64xf32> to vector<64xf32>
    %81 = vector.shape_cast %80 : vector<64xf32> to vector<64x1xf32>
    %82 = tpu.reciprocal %81 {approx = true} : vector<64x1xf32> -> vector<64x1xf32>
    %cst_37 = arith.constant dense<0.000000e+00> : vector<64x8xf32>
    %83 = tpu.matmul %79, %73, %cst_37 {dimension_numbers = #tpu.dot_dimension_numbers<[1], [0], [0], [1], [0, 0, 1, 1], [], []>} : vector<64x64xf32>, vector<64x8xf32>, vector<64x8xf32> -> vector<64x8xf32>
    %84 = vector.broadcast %82 : vector<64x1xf32> to vector<64x8xf32>
    %85 = arith.mulf %83, %84 : vector<64x8xf32>
    %c0_38 = arith.constant 0 : index
    %c24 = arith.constant 24 : index
    %86 = vector.load %arg21[%c0_38, %c24] : memref<64x32xf32, #tpu.memory_space<vmem>>, vector<64x8xf32>
    tpu.vector_store %arg21[%c0_38, %c24], %85 {strides = array<i32>} : memref<64x32xf32, #tpu.memory_space<vmem>>, vector<64x8xf32>,
    %c0_39 = arith.constant 0 : index
    %c0_40 = arith.constant 0 : index
    %87 = vector.load %arg21[%c0_39, %c0_40] : memref<64x32xf32, #tpu.memory_space<vmem>>, vector<64x32xf32>
    %c0_41 = arith.constant 0 : index
    %c0_42 = arith.constant 0 : index
    %c0_43 = arith.constant 0 : index
    %88 = vector.load %arg8[%c0_41, %c0_42, %c0_43] : memref<2x32x32xf32, #tpu.memory_space<vmem>>, vector<1x32x32xf32>
    %89 = vector.shape_cast %88 : vector<1x32x32xf32> to vector<32x32xf32>
    %cst_44 = arith.constant dense<0.000000e+00> : vector<64x32xf32>
    %90 = tpu.matmul %87, %89, %cst_44 {dimension_numbers = #tpu.dot_dimension_numbers<[1], [0], [0], [1], [0, 0, 1, 1], [], []>} : vector<64x32xf32>, vector<32x32xf32>, vector<64x32xf32> -> vector<64x32xf32>
    %c0_45 = arith.constant 0 : index
    %c0_46 = arith.constant 0 : index
    %c0_47 = arith.constant 0 : index
    %91 = vector.load %arg9[%c0_45, %c0_46, %c0_47] : memref<2x1x32xf32, #tpu.memory_space<vmem>>, vector<1x1x32xf32>
    %92 = vector.shape_cast %91 : vector<1x1x32xf32> to vector<1x32xf32>
    %93 = vector.broadcast %92 : vector<1x32xf32> to vector<64x32xf32>
    %94 = arith.addf %90, %93 : vector<64x32xf32>
    %95 = arith.addf %94, %12 : vector<64x32xf32>
    %c0_48 = arith.constant 0 : index
    %c0_49 = arith.constant 0 : index
    %c0_50 = arith.constant 0 : index
    %96 = vector.load %arg10[%c0_48, %c0_49, %c0_50] : memref<2x1x32xf32, #tpu.memory_space<vmem>>, vector<1x1x32xf32>
    %97 = vector.shape_cast %96 : vector<1x1x32xf32> to vector<1x32xf32>
    %c0_51 = arith.constant 0 : index
    %c0_52 = arith.constant 0 : index
    %c0_53 = arith.constant 0 : index
    %98 = vector.load %arg11[%c0_51, %c0_52, %c0_53] : memref<2x1x32xf32, #tpu.memory_space<vmem>>, vector<1x1x32xf32>
    %99 = vector.shape_cast %98 : vector<1x1x32xf32> to vector<1x32xf32>
    %cst_54 = arith.constant dense<0.000000e+00> : vector<64xf32>
    %100 = vector.multi_reduction <add>, %95, %cst_54 [1] : vector<64x32xf32> to vector<64xf32>
    %101 = vector.shape_cast %100 : vector<64xf32> to vector<64x1xf32>
    %cst_55 = arith.constant 3.200000e+01 : f32
    %102 = vector.broadcast %cst_55 : f32 to vector<64x1xf32>
    %103 = arith.divf %101, %102 : vector<64x1xf32>
    %104 = vector.broadcast %103 : vector<64x1xf32> to vector<64x32xf32>
    %105 = arith.subf %95, %104 : vector<64x32xf32>
    %106 = arith.mulf %105, %105 : vector<64x32xf32>
    %cst_56 = arith.constant dense<0.000000e+00> : vector<64xf32>
    %107 = vector.multi_reduction <add>, %106, %cst_56 [1] : vector<64x32xf32> to vector<64xf32>
    %108 = vector.shape_cast %107 : vector<64xf32> to vector<64x1xf32>
    %cst_57 = arith.constant 3.200000e+01 : f32
    %109 = vector.broadcast %cst_57 : f32 to vector<64x1xf32>
    %110 = arith.divf %108, %109 : vector<64x1xf32>
    %111 = vector.broadcast %103 : vector<64x1xf32> to vector<64x32xf32>
    %112 = arith.subf %95, %111 : vector<64x32xf32>
    %cst_58 = arith.constant 9.99999996E-13 : f32
    %113 = vector.broadcast %cst_58 : f32 to vector<64x1xf32>
    %114 = arith.addf %110, %113 : vector<64x1xf32>
    %115 = math.rsqrt %114 : vector<64x1xf32>
    %116 = vector.broadcast %115 : vector<64x1xf32> to vector<64x32xf32>
    %117 = arith.mulf %112, %116 : vector<64x32xf32>
    %118 = vector.broadcast %97 : vector<1x32xf32> to vector<64x32xf32>
    %119 = arith.mulf %117, %118 : vector<64x32xf32>
    %120 = vector.broadcast %99 : vector<1x32xf32> to vector<64x32xf32>
    %121 = arith.addf %119, %120 : vector<64x32xf32>
    %c0_59 = arith.constant 0 : index
    %c0_60 = arith.constant 0 : index
    %c0_61 = arith.constant 0 : index
    %122 = vector.load %arg12[%c0_59, %c0_60, %c0_61] : memref<2x32x64xf32, #tpu.memory_space<vmem>>, vector<1x32x64xf32>
    %123 = vector.shape_cast %122 : vector<1x32x64xf32> to vector<32x64xf32>
    %cst_62 = arith.constant dense<0.000000e+00> : vector<64x64xf32>
    %124 = tpu.matmul %121, %123, %cst_62 {dimension_numbers = #tpu.dot_dimension_numbers<[1], [0], [0], [1], [0, 0, 1, 1], [], []>} : vector<64x32xf32>, vector<32x64xf32>, vector<64x64xf32> -> vector<64x64xf32>
    %c0_63 = arith.constant 0 : index
    %c0_64 = arith.constant 0 : index
    %c0_65 = arith.constant 0 : index
    %125 = vector.load %arg13[%c0_63, %c0_64, %c0_65] : memref<2x1x64xf32, #tpu.memory_space<vmem>>, vector<1x1x64xf32>
    %126 = vector.shape_cast %125 : vector<1x1x64xf32> to vector<1x64xf32>
    %127 = vector.broadcast %126 : vector<1x64xf32> to vector<64x64xf32>
    %128 = arith.addf %124, %127 : vector<64x64xf32>
    %129 = arith.mulf %128, %128 : vector<64x64xf32>
    %130 = arith.mulf %128, %129 : vector<64x64xf32>
    %cst_66 = arith.constant 4.471500e-02 : f32
    %131 = vector.broadcast %cst_66 : f32 to vector<64x64xf32>
    %132 = arith.mulf %131, %130 : vector<64x64xf32>
    %133 = arith.addf %128, %132 : vector<64x64xf32>
    %cst_67 = arith.constant 0.797884583 : f32
    %134 = vector.broadcast %cst_67 : f32 to vector<64x64xf32>
    %135 = arith.mulf %134, %133 : vector<64x64xf32>
    %136 = math.tanh %135 : vector<64x64xf32>
    %cst_68 = arith.constant 1.000000e+00 : f32
    %137 = vector.broadcast %cst_68 : f32 to vector<64x64xf32>
    %138 = arith.addf %137, %136 : vector<64x64xf32>
    %cst_69 = arith.constant 5.000000e-01 : f32
    %139 = vector.broadcast %cst_69 : f32 to vector<64x64xf32>
    %140 = arith.mulf %139, %138 : vector<64x64xf32>
    %141 = arith.mulf %128, %140 : vector<64x64xf32>
    %c0_70 = arith.constant 0 : index
    %c0_71 = arith.constant 0 : index
    %c0_72 = arith.constant 0 : index
    %142 = vector.load %arg14[%c0_70, %c0_71, %c0_72] : memref<2x64x32xf32, #tpu.memory_space<vmem>>, vector<1x64x32xf32>
    %143 = vector.shape_cast %142 : vector<1x64x32xf32> to vector<64x32xf32>
    %cst_73 = arith.constant dense<0.000000e+00> : vector<64x32xf32>
    %144 = tpu.matmul %141, %143, %cst_73 {dimension_numbers = #tpu.dot_dimension_numbers<[1], [0], [0], [1], [0, 0, 1, 1], [], []>} : vector<64x64xf32>, vector<64x32xf32>, vector<64x32xf32> -> vector<64x32xf32>
    %c0_74 = arith.constant 0 : index
    %c0_75 = arith.constant 0 : index
    %c0_76 = arith.constant 0 : index
    %145 = vector.load %arg15[%c0_74, %c0_75, %c0_76] : memref<2x1x32xf32, #tpu.memory_space<vmem>>, vector<1x1x32xf32>
    %146 = vector.shape_cast %145 : vector<1x1x32xf32> to vector<1x32xf32>
    %147 = vector.broadcast %146 : vector<1x32xf32> to vector<64x32xf32>
    %148 = arith.addf %144, %147 : vector<64x32xf32>
    %149 = arith.addf %148, %121 : vector<64x32xf32>
    %c0_77 = arith.constant 0 : index
    %c0_78 = arith.constant 0 : index
    %c0_79 = arith.constant 0 : index
    %150 = vector.load %arg16[%c0_77, %c0_78, %c0_79] : memref<2x1x32xf32, #tpu.memory_space<vmem>>, vector<1x1x32xf32>
    %151 = vector.shape_cast %150 : vector<1x1x32xf32> to vector<1x32xf32>
    %c0_80 = arith.constant 0 : index
    %c0_81 = arith.constant 0 : index
    %c0_82 = arith.constant 0 : index
    %152 = vector.load %arg17[%c0_80, %c0_81, %c0_82] : memref<2x1x32xf32, #tpu.memory_space<vmem>>, vector<1x1x32xf32>
    %153 = vector.shape_cast %152 : vector<1x1x32xf32> to vector<1x32xf32>
    %cst_83 = arith.constant dense<0.000000e+00> : vector<64xf32>
    %154 = vector.multi_reduction <add>, %149, %cst_83 [1] : vector<64x32xf32> to vector<64xf32>
    %155 = vector.shape_cast %154 : vector<64xf32> to vector<64x1xf32>
    %cst_84 = arith.constant 3.200000e+01 : f32
    %156 = vector.broadcast %cst_84 : f32 to vector<64x1xf32>
    %157 = arith.divf %155, %156 : vector<64x1xf32>
    %158 = vector.broadcast %157 : vector<64x1xf32> to vector<64x32xf32>
    %159 = arith.subf %149, %158 : vector<64x32xf32>
    %160 = arith.mulf %159, %159 : vector<64x32xf32>
    %cst_85 = arith.constant dense<0.000000e+00> : vector<64xf32>
    %161 = vector.multi_reduction <add>, %160, %cst_85 [1] : vector<64x32xf32> to vector<64xf32>
    %162 = vector.shape_cast %161 : vector<64xf32> to vector<64x1xf32>
    %cst_86 = arith.constant 3.200000e+01 : f32
    %163 = vector.broadcast %cst_86 : f32 to vector<64x1xf32>
    %164 = arith.divf %162, %163 : vector<64x1xf32>
    %165 = vector.broadcast %157 : vector<64x1xf32> to vector<64x32xf32>
    %166 = arith.subf %149, %165 : vector<64x32xf32>
    %cst_87 = arith.constant 9.99999996E-13 : f32
    %167 = vector.broadcast %cst_87 : f32 to vector<64x1xf32>
    %168 = arith.addf %164, %167 : vector<64x1xf32>
    %169 = math.rsqrt %168 : vector<64x1xf32>
    %170 = vector.broadcast %169 : vector<64x1xf32> to vector<64x32xf32>
    %171 = arith.mulf %166, %170 : vector<64x32xf32>
    %172 = vector.broadcast %151 : vector<1x32xf32> to vector<64x32xf32>
    %173 = arith.mulf %171, %172 : vector<64x32xf32>
    %174 = vector.broadcast %153 : vector<1x32xf32> to vector<64x32xf32>
    %175 = arith.addf %173, %174 : vector<64x32xf32>
    %c1 = arith.constant 1 : index
    %c0_88 = arith.constant 0 : index
    %c0_89 = arith.constant 0 : index
    %176 = vector.load %arg6[%c1, %c0_88, %c0_89] : memref<2x32x96xf32, #tpu.memory_space<vmem>>, vector<1x32x96xf32>
    %177 = vector.shape_cast %176 : vector<1x32x96xf32> to vector<32x96xf32>
    %cst_90 = arith.constant dense<0.000000e+00> : vector<64x96xf32>
    %178 = tpu.matmul %175, %177, %cst_90 {dimension_numbers = #tpu.dot_dimension_numbers<[1], [0], [0], [1], [0, 0, 1, 1], [], []>} : vector<64x32xf32>, vector<32x96xf32>, vector<64x96xf32> -> vector<64x96xf32>
    %c1_91 = arith.constant 1 : index
    %c0_92 = arith.constant 0 : index
    %c0_93 = arith.constant 0 : index
    %179 = vector.load %arg7[%c1_91, %c0_92, %c0_93] : memref<2x1x96xf32, #tpu.memory_space<vmem>>, vector<1x1x96xf32>
    %180 = vector.shape_cast %179 : vector<1x1x96xf32> to vector<1x96xf32>
    %181 = vector.broadcast %180 : vector<1x96xf32> to vector<64x96xf32>
    %182 = arith.addf %178, %181 : vector<64x96xf32>
    %183 = vector.extract_strided_slice %182 {offsets = [0, 0], sizes = [64, 32], strides = [1, 1]} : vector<64x96xf32> to vector<64x32xf32>
    %184 = vector.extract_strided_slice %182 {offsets = [0, 32], sizes = [64, 32], strides = [1, 1]} : vector<64x96xf32> to vector<64x32xf32>
    %185 = vector.extract_strided_slice %182 {offsets = [0, 64], sizes = [64, 32], strides = [1, 1]} : vector<64x96xf32> to vector<64x32xf32>
    %186 = vector.extract_strided_slice %183 {offsets = [0, 0], sizes = [64, 8], strides = [1, 1]} : vector<64x32xf32> to vector<64x8xf32>
    %187 = vector.extract_strided_slice %184 {offsets = [0, 0], sizes = [64, 8], strides = [1, 1]} : vector<64x32xf32> to vector<64x8xf32>
    %188 = vector.extract_strided_slice %185 {offsets = [0, 0], sizes = [64, 8], strides = [1, 1]} : vector<64x32xf32> to vector<64x8xf32>
    %cst_94 = arith.constant dense<0.000000e+00> : vector<64x64xf32>
    %189 = tpu.matmul %186, %187, %cst_94 {dimension_numbers = #tpu.dot_dimension_numbers<[1], [1], [0], [0], [0, 0, 1, 0], [], []>} : vector<64x8xf32>, vector<64x8xf32>, vector<64x64xf32> -> vector<64x64xf32>
    %cst_95 = arith.constant dense<0xFF800000> : vector<64xf32>
    %190 = vector.multi_reduction <maximumf>, %189, %cst_95 [1] : vector<64x64xf32> to vector<64xf32>
    %191 = vector.shape_cast %190 : vector<64xf32> to vector<64x1xf32>
    %192 = vector.broadcast %191 : vector<64x1xf32> to vector<64x64xf32>
    %193 = arith.subf %189, %192 : vector<64x64xf32>
    %194 = math.exp %193 : vector<64x64xf32>
    %cst_96 = arith.constant dense<0.000000e+00> : vector<64xf32>
    %195 = vector.multi_reduction <add>, %194, %cst_96 [1] : vector<64x64xf32> to vector<64xf32>
    %196 = vector.shape_cast %195 : vector<64xf32> to vector<64x1xf32>
    %197 = tpu.reciprocal %196 {approx = true} : vector<64x1xf32> -> vector<64x1xf32>
    %cst_97 = arith.constant dense<0.000000e+00> : vector<64x8xf32>
    %198 = tpu.matmul %194, %188, %cst_97 {dimension_numbers = #tpu.dot_dimension_numbers<[1], [0], [0], [1], [0, 0, 1, 1], [], []>} : vector<64x64xf32>, vector<64x8xf32>, vector<64x8xf32> -> vector<64x8xf32>
    %199 = vector.broadcast %197 : vector<64x1xf32> to vector<64x8xf32>
    %200 = arith.mulf %198, %199 : vector<64x8xf32>
    %c0_98 = arith.constant 0 : index
    %c0_99 = arith.constant 0 : index
    %201 = vector.load %arg21[%c0_98, %c0_99] : memref<64x32xf32, #tpu.memory_space<vmem>>, vector<64x8xf32>
    tpu.vector_store %arg21[%c0_98, %c0_99], %200 {strides = array<i32>} : memref<64x32xf32, #tpu.memory_space<vmem>>, vector<64x8xf32>,
    %202 = vector.extract_strided_slice %183 {offsets = [0, 8], sizes = [64, 8], strides = [1, 1]} : vector<64x32xf32> to vector<64x8xf32>
    %203 = vector.extract_strided_slice %184 {offsets = [0, 8], sizes = [64, 8], strides = [1, 1]} : vector<64x32xf32> to vector<64x8xf32>
    %204 = vector.extract_strided_slice %185 {offsets = [0, 8], sizes = [64, 8], strides = [1, 1]} : vector<64x32xf32> to vector<64x8xf32>
    %cst_100 = arith.constant dense<0.000000e+00> : vector<64x64xf32>
    %205 = tpu.matmul %202, %203, %cst_100 {dimension_numbers = #tpu.dot_dimension_numbers<[1], [1], [0], [0], [0, 0, 1, 0], [], []>} : vector<64x8xf32>, vector<64x8xf32>, vector<64x64xf32> -> vector<64x64xf32>
    %cst_101 = arith.constant dense<0xFF800000> : vector<64xf32>
    %206 = vector.multi_reduction <maximumf>, %205, %cst_101 [1] : vector<64x64xf32> to vector<64xf32>
    %207 = vector.shape_cast %206 : vector<64xf32> to vector<64x1xf32>
    %208 = vector.broadcast %207 : vector<64x1xf32> to vector<64x64xf32>
    %209 = arith.subf %205, %208 : vector<64x64xf32>
    %210 = math.exp %209 : vector<64x64xf32>
    %cst_102 = arith.constant dense<0.000000e+00> : vector<64xf32>
    %211 = vector.multi_reduction <add>, %210, %cst_102 [1] : vector<64x64xf32> to vector<64xf32>
    %212 = vector.shape_cast %211 : vector<64xf32> to vector<64x1xf32>
    %213 = tpu.reciprocal %212 {approx = true} : vector<64x1xf32> -> vector<64x1xf32>
    %cst_103 = arith.constant dense<0.000000e+00> : vector<64x8xf32>
    %214 = tpu.matmul %210, %204, %cst_103 {dimension_numbers = #tpu.dot_dimension_numbers<[1], [0], [0], [1], [0, 0, 1, 1], [], []>} : vector<64x64xf32>, vector<64x8xf32>, vector<64x8xf32> -> vector<64x8xf32>
    %215 = vector.broadcast %213 : vector<64x1xf32> to vector<64x8xf32>
    %216 = arith.mulf %214, %215 : vector<64x8xf32>
    %c0_104 = arith.constant 0 : index
    %c8_105 = arith.constant 8 : index
    %217 = vector.load %arg21[%c0_104, %c8_105] : memref<64x32xf32, #tpu.memory_space<vmem>>, vector<64x8xf32>
    tpu.vector_store %arg21[%c0_104, %c8_105], %216 {strides = array<i32>} : memref<64x32xf32, #tpu.memory_space<vmem>>, vector<64x8xf32>,
    %218 = vector.extract_strided_slice %183 {offsets = [0, 16], sizes = [64, 8], strides = [1, 1]} : vector<64x32xf32> to vector<64x8xf32>
    %219 = vector.extract_strided_slice %184 {offsets = [0, 16], sizes = [64, 8], strides = [1, 1]} : vector<64x32xf32> to vector<64x8xf32>
    %220 = vector.extract_strided_slice %185 {offsets = [0, 16], sizes = [64, 8], strides = [1, 1]} : vector<64x32xf32> to vector<64x8xf32>
    %cst_106 = arith.constant dense<0.000000e+00> : vector<64x64xf32>
    %221 = tpu.matmul %218, %219, %cst_106 {dimension_numbers = #tpu.dot_dimension_numbers<[1], [1], [0], [0], [0, 0, 1, 0], [], []>} : vector<64x8xf32>, vector<64x8xf32>, vector<64x64xf32> -> vector<64x64xf32>
    %cst_107 = arith.constant dense<0xFF800000> : vector<64xf32>
    %222 = vector.multi_reduction <maximumf>, %221, %cst_107 [1] : vector<64x64xf32> to vector<64xf32>
    %223 = vector.shape_cast %222 : vector<64xf32> to vector<64x1xf32>
    %224 = vector.broadcast %223 : vector<64x1xf32> to vector<64x64xf32>
    %225 = arith.subf %221, %224 : vector<64x64xf32>
    %226 = math.exp %225 : vector<64x64xf32>
    %cst_108 = arith.constant dense<0.000000e+00> : vector<64xf32>
    %227 = vector.multi_reduction <add>, %226, %cst_108 [1] : vector<64x64xf32> to vector<64xf32>
    %228 = vector.shape_cast %227 : vector<64xf32> to vector<64x1xf32>
    %229 = tpu.reciprocal %228 {approx = true} : vector<64x1xf32> -> vector<64x1xf32>
    %cst_109 = arith.constant dense<0.000000e+00> : vector<64x8xf32>
    %230 = tpu.matmul %226, %220, %cst_109 {dimension_numbers = #tpu.dot_dimension_numbers<[1], [0], [0], [1], [0, 0, 1, 1], [], []>} : vector<64x64xf32>, vector<64x8xf32>, vector<64x8xf32> -> vector<64x8xf32>
    %231 = vector.broadcast %229 : vector<64x1xf32> to vector<64x8xf32>
    %232 = arith.mulf %230, %231 : vector<64x8xf32>
    %c0_110 = arith.constant 0 : index
    %c16_111 = arith.constant 16 : index
    %233 = vector.load %arg21[%c0_110, %c16_111] : memref<64x32xf32, #tpu.memory_space<vmem>>, vector<64x8xf32>
    tpu.vector_store %arg21[%c0_110, %c16_111], %232 {strides = array<i32>} : memref<64x32xf32, #tpu.memory_space<vmem>>, vector<64x8xf32>,
    %234 = vector.extract_strided_slice %183 {offsets = [0, 24], sizes = [64, 8], strides = [1, 1]} : vector<64x32xf32> to vector<64x8xf32>
    %235 = vector.extract_strided_slice %184 {offsets = [0, 24], sizes = [64, 8], strides = [1, 1]} : vector<64x32xf32> to vector<64x8xf32>
    %236 = vector.extract_strided_slice %185 {offsets = [0, 24], sizes = [64, 8], strides = [1, 1]} : vector<64x32xf32> to vector<64x8xf32>
    %cst_112 = arith.constant dense<0.000000e+00> : vector<64x64xf32>
    %237 = tpu.matmul %234, %235, %cst_112 {dimension_numbers = #tpu.dot_dimension_numbers<[1], [1], [0], [0], [0, 0, 1, 0], [], []>} : vector<64x8xf32>, vector<64x8xf32>, vector<64x64xf32> -> vector<64x64xf32>
    %cst_113 = arith.constant dense<0xFF800000> : vector<64xf32>
    %238 = vector.multi_reduction <maximumf>, %237, %cst_113 [1] : vector<64x64xf32> to vector<64xf32>
    %239 = vector.shape_cast %238 : vector<64xf32> to vector<64x1xf32>
    %240 = vector.broadcast %239 : vector<64x1xf32> to vector<64x64xf32>
    %241 = arith.subf %237, %240 : vector<64x64xf32>
    %242 = math.exp %241 : vector<64x64xf32>
    %cst_114 = arith.constant dense<0.000000e+00> : vector<64xf32>
    %243 = vector.multi_reduction <add>, %242, %cst_114 [1] : vector<64x64xf32> to vector<64xf32>
    %244 = vector.shape_cast %243 : vector<64xf32> to vector<64x1xf32>
    %245 = tpu.reciprocal %244 {approx = true} : vector<64x1xf32> -> vector<64x1xf32>
    %cst_115 = arith.constant dense<0.000000e+00> : vector<64x8xf32>
    %246 = tpu.matmul %242, %236, %cst_115 {dimension_numbers = #tpu.dot_dimension_numbers<[1], [0], [0], [1], [0, 0, 1, 1], [], []>} : vector<64x64xf32>, vector<64x8xf32>, vector<64x8xf32> -> vector<64x8xf32>
    %247 = vector.broadcast %245 : vector<64x1xf32> to vector<64x8xf32>
    %248 = arith.mulf %246, %247 : vector<64x8xf32>
    %c0_116 = arith.constant 0 : index
    %c24_117 = arith.constant 24 : index
    %249 = vector.load %arg21[%c0_116, %c24_117] : memref<64x32xf32, #tpu.memory_space<vmem>>, vector<64x8xf32>
    tpu.vector_store %arg21[%c0_116, %c24_117], %248 {strides = array<i32>} : memref<64x32xf32, #tpu.memory_space<vmem>>, vector<64x8xf32>,
    %c0_118 = arith.constant 0 : index
    %c0_119 = arith.constant 0 : index
    %250 = vector.load %arg21[%c0_118, %c0_119] : memref<64x32xf32, #tpu.memory_space<vmem>>, vector<64x32xf32>
    %c1_120 = arith.constant 1 : index
    %c0_121 = arith.constant 0 : index
    %c0_122 = arith.constant 0 : index
    %251 = vector.load %arg8[%c1_120, %c0_121, %c0_122] : memref<2x32x32xf32, #tpu.memory_space<vmem>>, vector<1x32x32xf32>
    %252 = vector.shape_cast %251 : vector<1x32x32xf32> to vector<32x32xf32>
    %cst_123 = arith.constant dense<0.000000e+00> : vector<64x32xf32>
    %253 = tpu.matmul %250, %252, %cst_123 {dimension_numbers = #tpu.dot_dimension_numbers<[1], [0], [0], [1], [0, 0, 1, 1], [], []>} : vector<64x32xf32>, vector<32x32xf32>, vector<64x32xf32> -> vector<64x32xf32>
    %c1_124 = arith.constant 1 : index
    %c0_125 = arith.constant 0 : index
    %c0_126 = arith.constant 0 : index
    %254 = vector.load %arg9[%c1_124, %c0_125, %c0_126] : memref<2x1x32xf32, #tpu.memory_space<vmem>>, vector<1x1x32xf32>
    %255 = vector.shape_cast %254 : vector<1x1x32xf32> to vector<1x32xf32>
    %256 = vector.broadcast %255 : vector<1x32xf32> to vector<64x32xf32>
    %257 = arith.addf %253, %256 : vector<64x32xf32>
    %258 = arith.addf %257, %175 : vector<64x32xf32>
    %c1_127 = arith.constant 1 : index
    %c0_128 = arith.constant 0 : index
    %c0_129 = arith.constant 0 : index
    %259 = vector.load %arg10[%c1_127, %c0_128, %c0_129] : memref<2x1x32xf32, #tpu.memory_space<vmem>>, vector<1x1x32xf32>
    %260 = vector.shape_cast %259 : vector<1x1x32xf32> to vector<1x32xf32>
    %c1_130 = arith.constant 1 : index
    %c0_131 = arith.constant 0 : index
    %c0_132 = arith.constant 0 : index
    %261 = vector.load %arg11[%c1_130, %c0_131, %c0_132] : memref<2x1x32xf32, #tpu.memory_space<vmem>>, vector<1x1x32xf32>
    %262 = vector.shape_cast %261 : vector<1x1x32xf32> to vector<1x32xf32>
    %cst_133 = arith.constant dense<0.000000e+00> : vector<64xf32>
    %263 = vector.multi_reduction <add>, %258, %cst_133 [1] : vector<64x32xf32> to vector<64xf32>
    %264 = vector.shape_cast %263 : vector<64xf32> to vector<64x1xf32>
    %cst_134 = arith.constant 3.200000e+01 : f32
    %265 = vector.broadcast %cst_134 : f32 to vector<64x1xf32>
    %266 = arith.divf %264, %265 : vector<64x1xf32>
    %267 = vector.broadcast %266 : vector<64x1xf32> to vector<64x32xf32>
    %268 = arith.subf %258, %267 : vector<64x32xf32>
    %269 = arith.mulf %268, %268 : vector<64x32xf32>
    %cst_135 = arith.constant dense<0.000000e+00> : vector<64xf32>
    %270 = vector.multi_reduction <add>, %269, %cst_135 [1] : vector<64x32xf32> to vector<64xf32>
    %271 = vector.shape_cast %270 : vector<64xf32> to vector<64x1xf32>
    %cst_136 = arith.constant 3.200000e+01 : f32
    %272 = vector.broadcast %cst_136 : f32 to vector<64x1xf32>
    %273 = arith.divf %271, %272 : vector<64x1xf32>
    %274 = vector.broadcast %266 : vector<64x1xf32> to vector<64x32xf32>
    %275 = arith.subf %258, %274 : vector<64x32xf32>
    %cst_137 = arith.constant 9.99999996E-13 : f32
    %276 = vector.broadcast %cst_137 : f32 to vector<64x1xf32>
    %277 = arith.addf %273, %276 : vector<64x1xf32>
    %278 = math.rsqrt %277 : vector<64x1xf32>
    %279 = vector.broadcast %278 : vector<64x1xf32> to vector<64x32xf32>
    %280 = arith.mulf %275, %279 : vector<64x32xf32>
    %281 = vector.broadcast %260 : vector<1x32xf32> to vector<64x32xf32>
    %282 = arith.mulf %280, %281 : vector<64x32xf32>
    %283 = vector.broadcast %262 : vector<1x32xf32> to vector<64x32xf32>
    %284 = arith.addf %282, %283 : vector<64x32xf32>
    %c1_138 = arith.constant 1 : index
    %c0_139 = arith.constant 0 : index
    %c0_140 = arith.constant 0 : index
    %285 = vector.load %arg12[%c1_138, %c0_139, %c0_140] : memref<2x32x64xf32, #tpu.memory_space<vmem>>, vector<1x32x64xf32>
    %286 = vector.shape_cast %285 : vector<1x32x64xf32> to vector<32x64xf32>
    %cst_141 = arith.constant dense<0.000000e+00> : vector<64x64xf32>
    %287 = tpu.matmul %284, %286, %cst_141 {dimension_numbers = #tpu.dot_dimension_numbers<[1], [0], [0], [1], [0, 0, 1, 1], [], []>} : vector<64x32xf32>, vector<32x64xf32>, vector<64x64xf32> -> vector<64x64xf32>
    %c1_142 = arith.constant 1 : index
    %c0_143 = arith.constant 0 : index
    %c0_144 = arith.constant 0 : index
    %288 = vector.load %arg13[%c1_142, %c0_143, %c0_144] : memref<2x1x64xf32, #tpu.memory_space<vmem>>, vector<1x1x64xf32>
    %289 = vector.shape_cast %288 : vector<1x1x64xf32> to vector<1x64xf32>
    %290 = vector.broadcast %289 : vector<1x64xf32> to vector<64x64xf32>
    %291 = arith.addf %287, %290 : vector<64x64xf32>
    %292 = arith.mulf %291, %291 : vector<64x64xf32>
    %293 = arith.mulf %291, %292 : vector<64x64xf32>
    %cst_145 = arith.constant 4.471500e-02 : f32
    %294 = vector.broadcast %cst_145 : f32 to vector<64x64xf32>
    %295 = arith.mulf %294, %293 : vector<64x64xf32>
    %296 = arith.addf %291, %295 : vector<64x64xf32>
    %cst_146 = arith.constant 0.797884583 : f32
    %297 = vector.broadcast %cst_146 : f32 to vector<64x64xf32>
    %298 = arith.mulf %297, %296 : vector<64x64xf32>
    %299 = math.tanh %298 : vector<64x64xf32>
    %cst_147 = arith.constant 1.000000e+00 : f32
    %300 = vector.broadcast %cst_147 : f32 to vector<64x64xf32>
    %301 = arith.addf %300, %299 : vector<64x64xf32>
    %cst_148 = arith.constant 5.000000e-01 : f32
    %302 = vector.broadcast %cst_148 : f32 to vector<64x64xf32>
    %303 = arith.mulf %302, %301 : vector<64x64xf32>
    %304 = arith.mulf %291, %303 : vector<64x64xf32>
    %c1_149 = arith.constant 1 : index
    %c0_150 = arith.constant 0 : index
    %c0_151 = arith.constant 0 : index
    %305 = vector.load %arg14[%c1_149, %c0_150, %c0_151] : memref<2x64x32xf32, #tpu.memory_space<vmem>>, vector<1x64x32xf32>
    %306 = vector.shape_cast %305 : vector<1x64x32xf32> to vector<64x32xf32>
    %cst_152 = arith.constant dense<0.000000e+00> : vector<64x32xf32>
    %307 = tpu.matmul %304, %306, %cst_152 {dimension_numbers = #tpu.dot_dimension_numbers<[1], [0], [0], [1], [0, 0, 1, 1], [], []>} : vector<64x64xf32>, vector<64x32xf32>, vector<64x32xf32> -> vector<64x32xf32>
    %c1_153 = arith.constant 1 : index
    %c0_154 = arith.constant 0 : index
    %c0_155 = arith.constant 0 : index
    %308 = vector.load %arg15[%c1_153, %c0_154, %c0_155] : memref<2x1x32xf32, #tpu.memory_space<vmem>>, vector<1x1x32xf32>
    %309 = vector.shape_cast %308 : vector<1x1x32xf32> to vector<1x32xf32>
    %310 = vector.broadcast %309 : vector<1x32xf32> to vector<64x32xf32>
    %311 = arith.addf %307, %310 : vector<64x32xf32>
    %312 = arith.addf %311, %284 : vector<64x32xf32>
    %c1_156 = arith.constant 1 : index
    %c0_157 = arith.constant 0 : index
    %c0_158 = arith.constant 0 : index
    %313 = vector.load %arg16[%c1_156, %c0_157, %c0_158] : memref<2x1x32xf32, #tpu.memory_space<vmem>>, vector<1x1x32xf32>
    %314 = vector.shape_cast %313 : vector<1x1x32xf32> to vector<1x32xf32>
    %c1_159 = arith.constant 1 : index
    %c0_160 = arith.constant 0 : index
    %c0_161 = arith.constant 0 : index
    %315 = vector.load %arg17[%c1_159, %c0_160, %c0_161] : memref<2x1x32xf32, #tpu.memory_space<vmem>>, vector<1x1x32xf32>
    %316 = vector.shape_cast %315 : vector<1x1x32xf32> to vector<1x32xf32>
    %cst_162 = arith.constant dense<0.000000e+00> : vector<64xf32>
    %317 = vector.multi_reduction <add>, %312, %cst_162 [1] : vector<64x32xf32> to vector<64xf32>
    %318 = vector.shape_cast %317 : vector<64xf32> to vector<64x1xf32>
    %cst_163 = arith.constant 3.200000e+01 : f32
    %319 = vector.broadcast %cst_163 : f32 to vector<64x1xf32>
    %320 = arith.divf %318, %319 : vector<64x1xf32>
    %321 = vector.broadcast %320 : vector<64x1xf32> to vector<64x32xf32>
    %322 = arith.subf %312, %321 : vector<64x32xf32>
    %323 = arith.mulf %322, %322 : vector<64x32xf32>
    %cst_164 = arith.constant dense<0.000000e+00> : vector<64xf32>
    %324 = vector.multi_reduction <add>, %323, %cst_164 [1] : vector<64x32xf32> to vector<64xf32>
    %325 = vector.shape_cast %324 : vector<64xf32> to vector<64x1xf32>
    %cst_165 = arith.constant 3.200000e+01 : f32
    %326 = vector.broadcast %cst_165 : f32 to vector<64x1xf32>
    %327 = arith.divf %325, %326 : vector<64x1xf32>
    %328 = vector.broadcast %320 : vector<64x1xf32> to vector<64x32xf32>
    %329 = arith.subf %312, %328 : vector<64x32xf32>
    %cst_166 = arith.constant 9.99999996E-13 : f32
    %330 = vector.broadcast %cst_166 : f32 to vector<64x1xf32>
    %331 = arith.addf %327, %330 : vector<64x1xf32>
    %332 = math.rsqrt %331 : vector<64x1xf32>
    %333 = vector.broadcast %332 : vector<64x1xf32> to vector<64x32xf32>
    %334 = arith.mulf %329, %333 : vector<64x32xf32>
    %335 = vector.broadcast %314 : vector<1x32xf32> to vector<64x32xf32>
    %336 = arith.mulf %334, %335 : vector<64x32xf32>
    %337 = vector.broadcast %316 : vector<1x32xf32> to vector<64x32xf32>
    %338 = arith.addf %336, %337 : vector<64x32xf32>
    %c0_167 = arith.constant 0 : index
    %c0_168 = arith.constant 0 : index
    %339 = vector.load %arg18[%c0_167, %c0_168] : memref<32x8xf32, #tpu.memory_space<vmem>>, vector<32x8xf32>
    %cst_169 = arith.constant dense<0.000000e+00> : vector<64x8xf32>
    %340 = tpu.matmul %338, %339, %cst_169 {dimension_numbers = #tpu.dot_dimension_numbers<[1], [0], [0], [1], [0, 0, 1, 1], [], []>} : vector<64x32xf32>, vector<32x8xf32>, vector<64x8xf32> -> vector<64x8xf32>
    %c0_170 = arith.constant 0 : index
    %c0_171 = arith.constant 0 : index
    %341 = vector.load %arg19[%c0_170, %c0_171] : memref<1x8xf32, #tpu.memory_space<vmem>>, vector<1x8xf32>
    %342 = vector.broadcast %341 : vector<1x8xf32> to vector<64x8xf32>
    %343 = arith.addf %340, %342 : vector<64x8xf32>
    %c0_172 = arith.constant 0 : index
    %c0_173 = arith.constant 0 : index
    %344 = vector.load %arg20[%c0_172, %c0_173] : memref<64x8xf32, #tpu.memory_space<vmem>>, vector<64x8xf32>
    tpu.vector_store %arg20[%c0_172, %c0_173], %343 {strides = array<i32>} : memref<64x8xf32, #tpu.memory_space<vmem>>, vector<64x8xf32>,
    return
  }
  func.func @transform_0(%arg0: i32) -> (i32, i32) {
    %c0_i32 = arith.constant 0 : i32
    %c0_i32_0 = arith.constant 0 : i32
    %c0_i32_1 = arith.constant 0 : i32
    return %c0_i32, %c0_i32_0 : i32, i32
  }
  func.func @transform_1(%arg0: i32) -> (i32, i32) {
    %c0_i32 = arith.constant 0 : i32
    %c0_i32_0 = arith.constant 0 : i32
    %c0_i32_1 = arith.constant 0 : i32
    return %c0_i32, %c0_i32_0 : i32, i32
  }
  func.func @transform_2(%arg0: i32) -> (i32, i32) {
    %c0_i32 = arith.constant 0 : i32
    %c0_i32_0 = arith.constant 0 : i32
    %c0_i32_1 = arith.constant 0 : i32
    return %c0_i32, %c0_i32_0 : i32, i32
  }
  func.func @transform_3(%arg0: i32) -> (i32, i32) {
    %c0_i32 = arith.constant 0 : i32
    %c0_i32_0 = arith.constant 0 : i32
    %c0_i32_1 = arith.constant 0 : i32
    return %c0_i32, %c0_i32_0 : i32, i32
  }
  func.func @transform_4(%arg0: i32) -> (i32, i32) {
    %c0_i32 = arith.constant 0 : i32
    %c0_i32_0 = arith.constant 0 : i32
    %c0_i32_1 = arith.constant 0 : i32
    return %c0_i32, %c0_i32_0 : i32, i32
  }
  func.func @transform_5(%arg0: i32) -> (i32, i32, i32) {
    %c0_i32 = arith.constant 0 : i32
    %c0_i32_0 = arith.constant 0 : i32
    %c0_i32_1 = arith.constant 0 : i32
    %c0_i32_2 = arith.constant 0 : i32
    return %c0_i32, %c0_i32_0, %c0_i32_1 : i32, i32, i32
  }
  func.func @transform_6(%arg0: i32) -> (i32, i32, i32) {
    %c0_i32 = arith.constant 0 : i32
    %c0_i32_0 = arith.constant 0 : i32
    %c0_i32_1 = arith.constant 0 : i32
    %c0_i32_2 = arith.constant 0 : i32
    return %c0_i32, %c0_i32_0, %c0_i32_1 : i32, i32, i32
  }
  func.func @transform_7(%arg0: i32) -> (i32, i32, i32) {
    %c0_i32 = arith.constant 0 : i32
    %c0_i32_0 = arith.constant 0 : i32
    %c0_i32_1 = arith.constant 0 : i32
    %c0_i32_2 = arith.constant 0 : i32
    return %c0_i32, %c0_i32_0, %c0_i32_1 : i32, i32, i32
  }
  func.func @transform_8(%arg0: i32) -> (i32, i32, i32) {
    %c0_i32 = arith.constant 0 : i32
    %c0_i32_0 = arith.constant 0 : i32
    %c0_i32_1 = arith.constant 0 : i32
    %c0_i32_2 = arith.constant 0 : i32
    return %c0_i32, %c0_i32_0, %c0_i32_1 : i32, i32, i32
  }
  func.func @transform_9(%arg0: i32) -> (i32, i32, i32) {
    %c0_i32 = arith.constant 0 : i32
    %c0_i32_0 = arith.constant 0 : i32
    %c0_i32_1 = arith.constant 0 : i32
    %c0_i32_2 = arith.constant 0 : i32
    return %c0_i32, %c0_i32_0, %c0_i32_1 : i32, i32, i32
  }
  func.func @transform_10(%arg0: i32) -> (i32, i32, i32) {
    %c0_i32 = arith.constant 0 : i32
    %c0_i32_0 = arith.constant 0 : i32
    %c0_i32_1 = arith.constant 0 : i32
    %c0_i32_2 = arith.constant 0 : i32
    return %c0_i32, %c0_i32_0, %c0_i32_1 : i32, i32, i32
  }
  func.func @transform_11(%arg0: i32) -> (i32, i32, i32) {
    %c0_i32 = arith.constant 0 : i32
    %c0_i32_0 = arith.constant 0 : i32
    %c0_i32_1 = arith.constant 0 : i32
    %c0_i32_2 = arith.constant 0 : i32
    return %c0_i32, %c0_i32_0, %c0_i32_1 : i32, i32, i32
  }
  func.func @transform_12(%arg0: i32) -> (i32, i32, i32) {
    %c0_i32 = arith.constant 0 : i32
    %c0_i32_0 = arith.constant 0 : i32
    %c0_i32_1 = arith.constant 0 : i32
    %c0_i32_2 = arith.constant 0 : i32
    return %c0_i32, %c0_i32_0, %c0_i32_1 : i32, i32, i32
  }
  func.func @transform_13(%arg0: i32) -> (i32, i32, i32) {
    %c0_i32 = arith.constant 0 : i32
    %c0_i32_0 = arith.constant 0 : i32
    %c0_i32_1 = arith.constant 0 : i32
    %c0_i32_2 = arith.constant 0 : i32
    return %c0_i32, %c0_i32_0, %c0_i32_1 : i32, i32, i32
  }
  func.func @transform_14(%arg0: i32) -> (i32, i32, i32) {
    %c0_i32 = arith.constant 0 : i32
    %c0_i32_0 = arith.constant 0 : i32
    %c0_i32_1 = arith.constant 0 : i32
    %c0_i32_2 = arith.constant 0 : i32
    return %c0_i32, %c0_i32_0, %c0_i32_1 : i32, i32, i32
  }
  func.func @transform_15(%arg0: i32) -> (i32, i32, i32) {
    %c0_i32 = arith.constant 0 : i32
    %c0_i32_0 = arith.constant 0 : i32
    %c0_i32_1 = arith.constant 0 : i32
    %c0_i32_2 = arith.constant 0 : i32
    return %c0_i32, %c0_i32_0, %c0_i32_1 : i32, i32, i32
  }
  func.func @transform_16(%arg0: i32) -> (i32, i32, i32) {
    %c0_i32 = arith.constant 0 : i32
    %c0_i32_0 = arith.constant 0 : i32
    %c0_i32_1 = arith.constant 0 : i32
    %c0_i32_2 = arith.constant 0 : i32
    return %c0_i32, %c0_i32_0, %c0_i32_1 : i32, i32, i32
  }
  func.func @transform_17(%arg0: i32) -> (i32, i32) {
    %c0_i32 = arith.constant 0 : i32
    %c0_i32_0 = arith.constant 0 : i32
    %c0_i32_1 = arith.constant 0 : i32
    return %c0_i32, %c0_i32_0 : i32, i32
  }
  func.func @transform_18(%arg0: i32) -> (i32, i32) {
    %c0_i32 = arith.constant 0 : i32
    %c0_i32_0 = arith.constant 0 : i32
    %c0_i32_1 = arith.constant 0 : i32
    return %c0_i32, %c0_i32_0 : i32, i32
  }
  func.func @transform_19(%arg0: i32) -> (i32, i32) {
    %c0_i32 = arith.constant 0 : i32
    %c0_i32_0 = arith.constant 0 : i32
    %c0_i32_1 = arith.constant 0 : i32
    return %c0_i32, %c0_i32_0 : i32, i32
  }
}

</mosaic_0001>

<bundles_post_ra>
// kernel: tpu_custom_call.1
= control target key start
LH: loop header
LB: loop body
LE: loop exit
PB: predicated region body
PF: predicated region fallthrough
CT: control target
= control target key end

     0   :  { %s10641_s0 = inlined_call_operand.vmem [shape: f32[64,16], index: 0, kind: input, shape index: {}]   ;;  %s10642_s1 = inlined_call_operand.vmem [shape: f32[16,32], index: 1, kind: input, shape index: {}]   ;;  %s10643_s2 = inlined_call_operand.vmem [shape: f32[1,32], index: 2, kind: input, shape index: {}]   ;;  %s10644_s3 = inlined_call_operand.vmem [shape: f32[32,32], index: 3, kind: input, shape index: {}]   ;;  %s10645_s4 = inlined_call_operand.hbm [shape: f32[1,32], index: 4, kind: input, shape index: {}]   ;;  %s10646_s5 = inlined_call_operand.vmem [shape: f32[2,32,96], index: 5, kind: input, shape index: {}]   ;;  %s10647_s6 = inlined_call_operand.vmem [shape: f32[2,1,96], index: 6, kind: input, shape index: {}]   ;;  %s10648_s7 = inlined_call_operand.vmem [shape: f32[2,32,32], index: 7, kind: input, shape index: {}]   ;;  %s10649_s8 = inlined_call_operand.vmem [shape: f32[2,1,32], index: 8, kind: input, shape index: {}]   ;;  %s10650_s9 = inlined_call_operand.vmem [shape: f32[2,1,32], index: 9, kind: input, shape index: {}]   ;;  %s10651_s10 = inlined_call_operand.vmem [shape: f32[2,1,32], index: 10, kind: input, shape index: {}]   ;;  %s10652_s11 = inlined_call_operand.vmem [shape: f32[2,32,64], index: 11, kind: input, shape index: {}]   ;;  %s10653_s12 = inlined_call_operand.vmem [shape: f32[2,1,64], index: 12, kind: input, shape index: {}]   ;;  %s10654_s13 = inlined_call_operand.vmem [shape: f32[2,64,32], index: 13, kind: input, shape index: {}]   ;;  %s10655_s14 = inlined_call_operand.vmem [shape: f32[2,1,32], index: 14, kind: input, shape index: {}]   ;;  %s10656_s15 = inlined_call_operand.vmem [shape: f32[2,1,32], index: 15, kind: input, shape index: {}]   ;;  %s10657_s16 = inlined_call_operand.vmem [shape: f32[2,1,32], index: 16, kind: input, shape index: {}]   ;;  %s10658_s17 = inlined_call_operand.vmem [shape: f32[32,8], index: 17, kind: input, shape index: {}]   ;;  %s10659_s18 = inlined_call_operand.vmem [shape: f32[1,8], index: 18, kind: input, shape index: {}]   ;;  %s10660_s19 = inlined_call_operand.vmem [shape: f32[64,8], index: 19, kind: output, shape index: {}]  }
   0x1   :  { %10699 = sst [smem:[#allocation14_spill]] %s10641_s0 }
   0x2   :  { %10700 = sst [smem:[#allocation15_spill]] %s10642_s1 }
   0x3   :  { %10701 = sst [smem:[#allocation16_spill]] %s10643_s2 }
   0x4   :  { %10702 = sst [smem:[#allocation17_spill]] %s10644_s3 }
   0x5   :  { %24 = vsyncpa [#allocation4], 0  ;;  %s8451_s0 = smov [#allocation3]   ;;  %s8427_s1 = scalar_lea.hbm %s10645_s4, 16 }
   0x6   :  { %s39_s30 = sshll.u32 %s8451_s0, 4  ;;  %p8428_p0 = scmp.ne.s32.totalorder %s10645_s4, %s8427_s1  ;;  %s40_s30 = int_to_ptr.vmem [resolvable:$true] %s39_s30 }
   0x7   :  { %p8431_p1 = scmp.lt.u32.totalorder %s8427_s1, %s10645_s4 }
   0x9   :  { %p8433_p2 = pnand %p8431_p1, %p8428_p0 }
   0xb   :  { %8436 = shalt.err (!%p8433_p2)
}
   0xc   :  { %s8437_s25 = scalar_lea.vmem %s40_s30, 16  ;;  %s8441_s3 = scalar_lea.vmem %s40_s30, 32 }
   0xd   :  { %p8438_p3 = scmp.ne.s32.totalorder %s40_s30, %s8437_s25  ;;  %p8442_p4 = scmp.lt.s32.totalorder %s40_s30, %s40_s30 }
   0xe   :  { %p8443_p5 = scmp.lt.s32.totalorder %s8441_s3, %s8437_s25 }
  0x10   :  { %p8444_p6 = por %p8443_p5, %p8442_p4 }
  0x12   :  { %p8445_p7 = pnand %p8444_p6, %p8438_p3 }
  0x14   :  { %8448 = shalt.err (!%p8445_p7)
}
  0x15   :  { %42 = dma.hbm_to_vmem [thread:$0]  %s10645_s4, 16, %s40_s30, [#allocation4]  }
  0x16   :  { %8449 = dma.done.wait [#allocation4], 16  }
  0x17   :  { %8450 = vsyncadd [#allocation4], 4294967280  ;;  %vm91_vm0 = vcmask 130048   ;;  %s10703_s0 = sld [smem:[#allocation15_spill]]  ;;  %s10704_s2 = sld [smem:[#allocation14_spill]]  ;;  %v370_v17 = vld [vmem:[%s10646_s5] sm:$0xff] }
  0x18   :  { %s10705_s25 = sld [smem:[#allocation17_spill]]  ;;  %v371_v18 = vld [vmem:[%s10646_s5 + $0x8] sm:$0xff]  ;;  %s10706_s22 = sld [smem:[#allocation16_spill]]  ;;  %vm232_vm1 = vcmask 261120   ;;  %v372_v37 = vld [vmem:[%s10646_s5 + $0x10] sm:$0xff]  ;;  %v373_v38 = vld [vmem:[%s10646_s5 + $0x18] sm:$0xff] }
  0x19   :  { %v7330_v19 = vpack.c.bf16 %v371_v18, %v370_v17  ;;  %v7334_v39 = vpack.c.bf16 %v373_v38, %v372_v37  ;;  %v5926_v40 = vld [vmem:[#allocation3] ss:$0 sm:$0xff]  ;;  %vm534_vm2 = vcmask 64512   ;;  %s8452_s26 = smov 96   ;;  %s8453_s27 = smov 64   ;;  %vm672_vm4 = vcmask 523264  }
  0x1a   :  { %s8454_s28 = smov 88   ;;  %vm8758_vm3 = vmpackc.low %vm534_vm2, %vm534_vm2  ;;  %s8455_s29 = smov 120   ;;  %vm1364_vm5 = vcmask 130112   ;;  %vm1815_vm6 = vcmask 195712   ;;  %vm2266_vm7 = vcmask 261312  }
  0x1b   :  { %s10688_s20 = smov 112   ;;  %s10686_s21 = smov 48  }
  0x1c   :  { %s10684_s1 = smov 72   ;;  %s8463_s23 = smov 8  }
  0x1d   :  { %v82_v0 = vld [vmem:[%s10703_s0] sm:$0xff]  ;;  %v83_v1 = vld [vmem:[%s10703_s0 + $0x8] sm:$0xff]  ;;  %v76_v10 = vld [vmem:[%s10704_s2 + $0x10] sm:$0xff]  ;;  %s8456_s0 = smov 56   ;;  %s8464_s4 = smov 16  }
  0x1e   :  { %v74_v2 = vld [vmem:[%s10704_s2] sm:$0xff]  ;;  %v7318_v3 = vpack.c.bf16 %v83_v1, %v82_v0  ;;  %v222_v6 = vld [vmem:[%s10705_s25 + $0x8] sm:$0xff]  ;;  %v80_v11 = vld [vmem:[%s10704_s2 + $0x30] sm:$0xff] }
  0x1f   :  { %6642 = vmatprep.mubr.msk.f32.mxu0 %vm91_vm0, %v74_v2  ;;  %v78_v4 = vld [vmem:[%s10704_s2 + $0x20] sm:$0xff]  ;;  %v75_v7 = vld [vmem:[%s10704_s2 + $0x8] sm:$0xff]  ;;  %v77_v12 = vld [vmem:[%s10704_s2 + $0x18] sm:$0xff] }
  0x20   :  { %7319 = vmatprep.subr.bf16.mxu0 %v7318_v3  ;;  %7738 = vmatprep.subr.bf16.mxu1 %v7318_v3  ;;  %v221_v5 = vld [vmem:[%s10705_s25] sm:$0xff]  ;;  %v79_v8 = vld [vmem:[%s10704_s2 + $0x28] sm:$0xff]  ;;  %v81_v13 = vld [vmem:[%s10704_s2 + $0x38] sm:$0xff]  ;;  %s8457_s2 = smov 80  }
  0x21   :  { %7321 = vmatpush3.bf16.msra.mxu0 %v7318_v3  ;;  %7739 = vmatpush3.bf16.msra.mxu1 %v7318_v3  ;;  %v7322_v9 = vpack.c.bf16 %v222_v6, %v221_v5  ;;  %v223_v14 = vld [vmem:[%s10705_s25 + $0x10] sm:$0xff]  ;;  %v224_v15 = vld [vmem:[%s10705_s25 + $0x18] sm:$0xff]  ;;  %v5917_v20 = vld [vmem:[%s10706_s22] ss:$0 sm:$0xff]  ;;  %s10682_s22 = smov 104   ;;  %s10680_s25 = smov 40  }
  0x22   :  { %6648 = vmatprep.mubr.msk.f32.mxu1 %vm91_vm0, %v78_v4  ;;  %v7326_v16 = vpack.c.bf16 %v224_v15, %v223_v14  ;;  %7331 = vmatprep.subr.bf16.mxu0 %v7330_v19  ;;  %v5935_v1 = vld [vmem:[%s10647_s6] ss:$0 sm:$0xff] }
  0x23   :  { %7323 = vmatprep.subr.bf16.mxu1 %v7322_v9 }
  0x24   :  { %6643 = vmatmul.mubr.msk.f32.vlgmr.msra.gmra.mrb[0].mxu0 %vm91_vm0, %v75_v7  ;;  %6649 = vmatmul.mubr.msk.f32.vlgmr.msra.gmra.mrb[0].mxu1 %vm91_vm0, %v79_v8 }
  0x25   :  { %6645 = vmatprep.mubr.msk.f32.mxu0 %vm91_vm0, %v76_v10  ;;  %6651 = vmatprep.mubr.msk.f32.mxu1 %vm91_vm0, %v80_v11 }
  0x26   :  { %7325 = vmatpush3.bf16.msra.mxu1 %v7322_v9  ;;  %7333 = vmatpush3.bf16.msra.mxu0 %v7330_v19 }
  0x27   :  { %7327 = vmatprep.subr.bf16.mxu1 %v7326_v16  ;;  %7335 = vmatprep.subr.bf16.mxu0 %v7334_v39 }
  0x28   :  { %6646 = vmatmul.mubr.msk.f32.gmra.mrb[2].mxu0 %vm91_vm0, %v77_v12  ;;  %6652 = vmatmul.mubr.msk.f32.gmra.mrb[2].mxu1 %vm91_vm0, %v81_v13 }
  0x2a   :  { %7329 = vmatpush3.bf16.msra.mxu1 %v7326_v16  ;;  %7337 = vmatpush3.bf16.msra.mxu0 %v7334_v39 }
  0xf7   :  { %v6644_v21 = vpop.f32.mrb[0].mxu0  ;;  %v6650_v22 = vpop.f32.mrb[0].mxu1 }
  0xf8   :  { %v182_v23 = vpop.f32.mrb[1].mxu0  ;;  %v202_v24 = vpop.f32.mrb[1].mxu1  ;;  %v188_v26 = vadd.f32 %v6644_v21, %v5917_v20  ;;  %v208_v34 = vadd.f32 %v6650_v22, %v5917_v20 }
  0xf9   :  { %v183_v25 = vadd.f32 %v5917_v20, %v182_v23  ;;  %v203_v33 = vadd.f32 %v5917_v20, %v202_v24 }
  0xfb   :  { %v6647_v27 = vpop.f32.mrb[2].mxu0  ;;  %6662 = vmatprep.mubr.msk.f32.mxu1 %vm232_vm1, %v183_v25  ;;  %v6653_v28 = vpop.f32.mrb[2].mxu1  ;;  %v10713_v25 = vmov 0 }
  0xfc   :  { %v198_v29 = vadd.f32 %v6647_v27, %v5917_v20  ;;  %v192_v30 = vpop.f32.mrb[3].mxu0  ;;  %6663 = vmatmul.mubr.msk.f32.vlgmr.msra.gmra.mrb[4].mxu1 %vm232_vm1, %v188_v26  ;;  %v212_v31 = vpop.f32.mrb[3].mxu1  ;;  %v218_v36 = vadd.f32 %v6653_v28, %v5917_v20  ;;  %v10714_v25 = vsel %vm8758_vm3, 4294967295, %v10713_v25 }
  0xfd   :  { %v193_v32 = vadd.f32 %v5917_v20, %v192_v30  ;;  %v213_v35 = vadd.f32 %v5917_v20, %v212_v31  ;;  %10715 = vst [vmem:[#allocation12_spill] sm:$0xff] %v10714_v25 }
  0xff   :  { %6665 = vmatprep.mubr.msk.f32.mxu1 %vm232_vm1, %v193_v32 }
 0x100   :  { %6666 = vmatmul.mubr.msk.f32.gmra.mrb[6].mxu1 %vm232_vm1, %v198_v29 }
 0x101   :  { %6668 = vmatprep.mubr.msk.f32.mxu1 %vm232_vm1, %v203_v33 }
 0x104   :  { %6669 = vmatmul.mubr.msk.f32.gmra.mrb[8].mxu1 %vm232_vm1, %v208_v34 }
 0x105   :  { %6671 = vmatprep.mubr.msk.f32.mxu1 %vm232_vm1, %v213_v35 }
 0x108   :  { %6672 = vmatmul.mubr.msk.f32.gmra.mrb[10].mxu1 %vm232_vm1, %v218_v36 }
 0x1cf   :  { %v6664_v41 = vpop.f32.mrb[4].mxu1 }
 0x1d0   :  { %v8651_v42 = vadd.f32 %v6664_v41, %v5926_v40  ;;  %v323_v43 = vpop.f32.mrb[5].mxu1 }
 0x1d1   :  { %v8653_v44 = vadd.f32 %v5926_v40, %v323_v43 }
 0x1d2   :  { %v10671_v47 = vmax.f32 %v8651_v42, 0.0 }
 0x1d3   :  { %v10670_v45 = vmax.f32 %v8653_v44, 0.0  ;;  %v6667_v46 = vpop.f32.mrb[6].mxu1 }
 0x1d4   :  { %v8657_v48 = vadd.f32 %v6667_v46, %v5926_v40  ;;  %v333_v49 = vpop.f32.mrb[7].mxu1 }
 0x1d5   :  { %v8659_v50 = vadd.f32 %v5926_v40, %v333_v49  ;;  %6682 = vmatprep.mubr.msk.f32.mxu0 %vm232_vm1, %v10670_v45 }
 0x1d6   :  { %10707 = vst [vmem:[#allocation6_spill] sm:$0xff] %v8657_v48  ;;  %v10669_v51 = vmax.f32 %v8657_v48, 0.0  ;;  %6683 = vmatmul.mubr.msk.f32.vlgmr.msra.gmra.mrb[4].mxu0 %vm232_vm1, %v10671_v47 }
 0x1d7   :  { %10708 = vst [vmem:[#allocation7_spill] sm:$0xff] %v8659_v50  ;;  %v10668_v52 = vmax.f32 %v8659_v50, 0.0  ;;  %v6670_v53 = vpop.f32.mrb[8].mxu1 }
 0x1d8   :  { %v8669_v54 = vadd.f32 %v6670_v53, %v5926_v40  ;;  %v343_v55 = vpop.f32.mrb[9].mxu1 }
 0x1d9   :  { %v8671_v56 = vadd.f32 %v5926_v40, %v343_v55  ;;  %6685 = vmatprep.mubr.msk.f32.mxu0 %vm232_vm1, %v10668_v52 }
 0x1da   :  { %10709 = vst [vmem:[#allocation8_spill] sm:$0xff] %v8669_v54  ;;  %v10667_v57 = vmax.f32 %v8669_v54, 0.0  ;;  %6686 = vmatmul.mubr.msk.f32.gmra.mrb[6].mxu0 %vm232_vm1, %v10669_v51 }
 0x1db   :  { %10710 = vst [vmem:[#allocation9_spill] sm:$0xff] %v8671_v56  ;;  %v10666_v58 = vmax.f32 %v8671_v56, 0.0  ;;  %v6673_v59 = vpop.f32.mrb[10].mxu1 }
 0x1dc   :  { %v8681_v60 = vadd.f32 %v6673_v59, %v5926_v40  ;;  %v353_v61 = vpop.f32.mrb[11].mxu1 }
 0x1dd   :  { %v8683_v62 = vadd.f32 %v5926_v40, %v353_v61  ;;  %6688 = vmatprep.mubr.msk.f32.mxu0 %vm232_vm1, %v10666_v58 }
 0x1de   :  { %10711 = vst [vmem:[#allocation10_spill] sm:$0xff] %v8681_v60  ;;  %v10665_v63 = vmax.f32 %v8681_v60, 0.0  ;;  %6689 = vmatmul.mubr.msk.f32.gmra.mrb[8].mxu0 %vm232_vm1, %v10667_v57 }
 0x1df   :  { %10712 = vst [vmem:[#allocation11_spill] sm:$0xff] %v8683_v62  ;;  %v10664_v0 = vmax.f32 %v8683_v62, 0.0 }
 0x1e1   :  { %6691 = vmatprep.mubr.msk.f32.mxu0 %vm232_vm1, %v10664_v0 }
 0x1e2   :  { %6692 = vmatmul.mubr.msk.f32.gmra.mrb[10].mxu0 %vm232_vm1, %v10665_v63 }
 0x2a9   :  { %v6684_v2 = vpop.f32.mrb[4].mxu0 }
 0x2aa   :  { %v8702_v3 = vadd.f32 %v6684_v2, %v5935_v1  ;;  %v471_v4 = vpop.f32.mrb[5].mxu0 }
 0x2ab   :  { %v8704_v5 = vadd.f32 %v5935_v1, %v471_v4 }
 0x2ad   :  { %v6687_v6 = vpop.f32.mrb[6].mxu0  ;;  %6710 = vmatprep.mubr.msk.f32.mxu1 %vm534_vm2, %v8704_v5  ;;  %v8710_v7 = vpack.i.bf16 %v8702_v3, %v8704_v5 }
 0x2ae   :  { %v8712_v8 = vadd.f32 %v6687_v6, %v5935_v1  ;;  %v481_v9 = vpop.f32.mrb[7].mxu0 }
 0x2af   :  { %v8714_v10 = vadd.f32 %v5935_v1, %v481_v9  ;;  %7756 = vrot.lane.b32.xlu0 %v8710_v7, %s8452_s26 }
 0x2b1   :  { %v6690_v11 = vpop.f32.mrb[8].mxu0  ;;  %v8720_v12 = vpack.i.bf16 %v8712_v8, %v8714_v10 }
 0x2b2   :  { %v8722_v13 = vadd.f32 %v6690_v11, %v5935_v1  ;;  %v491_v14 = vpop.f32.mrb[9].mxu0 }
 0x2b3   :  { %v8724_v15 = vadd.f32 %v5935_v1, %v491_v14  ;;  %7761 = vrot.lane.b32.xlu0 %v8720_v12, %s8452_s26 }
 0x2b5   :  { %v6693_v16 = vpop.f32.mrb[10].mxu0  ;;  %v8730_v17 = vpack.i.bf16 %v8722_v13, %v8724_v15 }
 0x2b6   :  { %v8732_v18 = vadd.f32 %v6693_v16, %v5935_v1  ;;  %v501_v19 = vpop.f32.mrb[11].mxu0 }
 0x2b7   :  { %v8734_v20 = vadd.f32 %v5935_v1, %v501_v19  ;;  %7766 = vrot.lane.b32.xlu1 %v8730_v17, %s8452_s26  ;;  %7776 = vrot.lane.b32.xlu0 %v8710_v7, %s8453_s27 }
 0x2b9   :  { %v8742_v21 = vpack.i.bf16 %v8732_v18, %v8734_v20 }
 0x2bb   :  { %7771 = vrot.lane.b32.xlu1 %v8742_v21, %s8452_s26  ;;  %7786 = vrot.lane.b32.xlu0 %v8730_v17, %s8453_s27 }
 0x2bf   :  { %7781 = vrot.lane.b32.xlu1 %v8720_v12, %s8453_s27  ;;  %7791 = vrot.lane.b32.xlu0 %v8710_v7, %s8454_s28 }
 0x2c3   :  { %7796 = vrot.lane.b32.xlu1 %v8720_v12, %s8454_s28 }
 0x2c7   :  { %7801 = vrot.lane.b32.xlu1 %v8742_v21, %s8453_s27 }
 0x321   :  { %v7757_v22 = vpop.permute.xlu0 %7756 }
 0x322   :  { %v7759_v23 = vunpack.i.h.bf16 %v7757_v22  ;;  %v7758_v24 = vunpack.i.l.bf16 %v7757_v22 }
 0x324   :  { %v7338_v26 = vpack.c.bf16 %v7759_v23, %v7758_v24 }
 0x325   :  { %v7762_v27 = vpop.permute.xlu0 %7761 }
 0x326   :  { %v7764_v28 = vunpack.i.h.bf16 %v7762_v27  ;;  %v7763_v29 = vunpack.i.l.bf16 %v7762_v27  ;;  %7340 = vmatprep.subr.msk.bf16.mxu1 %vm8758_vm3, %v7338_v26 }
 0x327   :  { %7343 = vmatpush3.bf16.xpose.msk.msra.mxu1 %vm8758_vm3, %v7338_v26 }
 0x328   :  { %v7344_v30 = vpack.c.bf16 %v7764_v28, %v7763_v29 }
 0x329   :  { %v7767_v31 = vpop.permute.xlu1 %7766  ;;  %v7777_v32 = vpop.permute.xlu0 %7776 }
 0x32a   :  { %v7769_v33 = vunpack.i.h.bf16 %v7767_v31  ;;  %v7768_v34 = vunpack.i.l.bf16 %v7767_v31  ;;  %v7779_v35 = vunpack.i.h.bf16 %v7777_v32  ;;  %v7778_v36 = vunpack.i.l.bf16 %v7777_v32  ;;  %7346 = vmatprep.subr.msk.bf16.mxu1 %vm8758_vm3, %v7344_v30 }
 0x32c   :  { %v7350_v37 = vpack.c.bf16 %v7769_v33, %v7768_v34  ;;  %v7362_v38 = vpack.c.bf16 %v7779_v35, %v7778_v36 }
 0x32d   :  { %v7772_v39 = vpop.permute.xlu1 %7771  ;;  %v7787_v40 = vpop.permute.xlu0 %7786 }
 0x32e   :  { %7363 = vmatprep.subr.bf16.mxu0 %v7362_v38  ;;  %v7774_v41 = vunpack.i.h.bf16 %v7772_v39  ;;  %v7773_v43 = vunpack.i.l.bf16 %v7772_v39  ;;  %v7789_v49 = vunpack.i.h.bf16 %v7787_v40  ;;  %v7788_v53 = vunpack.i.l.bf16 %v7787_v40 }
 0x32f   :  { %7349 = vmatpush3.bf16.xpose.msk.msra.mxu1 %vm8758_vm3, %v7344_v30  ;;  %7365 = vmatpush3.bf16.msra.mxu0 %v7362_v38 }
 0x330   :  { %7352 = vmatprep.subr.msk.bf16.mxu1 %vm8758_vm3, %v7350_v37  ;;  %v7356_v61 = vpack.c.bf16 %v7774_v41, %v7773_v43  ;;  %v7370_v4 = vpack.c.bf16 %v7789_v49, %v7788_v53 }
 0x331   :  { %v7782_v46 = vpop.permute.xlu1 %7781  ;;  %v7792_v6 = vpop.permute.xlu0 %7791 }
 0x332   :  { %v7784_v55 = vunpack.i.h.bf16 %v7782_v46  ;;  %v7783_v59 = vunpack.i.l.bf16 %v7782_v46  ;;  %v7794_v11 = vunpack.i.h.bf16 %v7792_v6  ;;  %v7793_v14 = vunpack.i.l.bf16 %v7792_v6 }
 0x334   :  { %v7366_v1 = vpack.c.bf16 %v7784_v55, %v7783_v59  ;;  %v8778_v23 = vpack.c.bf16 %v7794_v11, %v7793_v14 }
 0x335   :  { %v8772_v2 = vpop.permute.xlu1 %7796 }
 0x336   :  { %7367 = vmatprep.subr.bf16.mxu0 %v7366_v1 }
 0x337   :  { %7355 = vmatpush3.bf16.xpose.msk.msra.mxu1 %vm8758_vm3, %v7350_v37  ;;  %7369 = vmatpush3.bf16.msra.mxu0 %v7366_v1 }
 0x338   :  { %7371 = vmatprep.subr.bf16.mxu0 %v7370_v4  ;;  %7358 = vmatprep.subr.msk.bf16.mxu1 %vm8758_vm3, %v7356_v61 }
 0x339   :  { %v7802_v9 = vpop.permute.xlu1 %7801 }
 0x33a   :  { %v7804_v16 = vunpack.i.h.bf16 %v7802_v9  ;;  %v7803_v19 = vunpack.i.l.bf16 %v7802_v9 }
 0x33b   :  { %7373 = vmatpush3.bf16.msra.mxu0 %v7370_v4 }
 0x33c   :  { %v7374_v22 = vpack.c.bf16 %v7804_v16, %v7803_v19  ;;  %v7799_v19 = vunpack.i.h.bf16 %v8772_v2 }
 0x33e   :  { %7375 = vmatprep.subr.bf16.mxu0 %v7374_v22 }
 0x33f   :  { %7361 = vmatpush3.bf16.xpose.msk.msra.mxu1 %vm8758_vm3, %v7356_v61  ;;  %7377 = vmatpush3.bf16.msra.mxu0 %v7374_v22  ;;  %v7798_v22 = vunpack.i.l.bf16 %v8772_v2 }
 0x340   :  { %7380 = vmatprep.subr.msk.bf16.mxu0 %vm8758_vm3, %v8778_v23 }
 0x346   :  { %6711 = vmatmul.mubr.msk.f32.vlgmr.msra.gmra.mrb[12].mxu1 %vm534_vm2, %v8702_v3 }
 0x347   :  { %6713 = vmatprep.mubr.msk.f32.mxu1 %vm534_vm2, %v8714_v10 }
 0x34a   :  { %6714 = vmatmul.mubr.msk.f32.gmra.mrb[14].mxu1 %vm534_vm2, %v8712_v8 }
 0x34b   :  { %6716 = vmatprep.mubr.msk.f32.mxu1 %vm534_vm2, %v8724_v15 }
 0x34e   :  { %6717 = vmatmul.mubr.msk.f32.gmra.mrb[16].mxu1 %vm534_vm2, %v8722_v13 }
 0x34f   :  { %6719 = vmatprep.mubr.msk.f32.mxu1 %vm534_vm2, %v8734_v20 }
 0x352   :  { %6720 = vmatmul.mubr.msk.f32.gmra.mrb[18].mxu1 %vm534_vm2, %v8732_v18 }
 0x419   :  { %v6712_v24 = vpop.f32.mrb[12].mxu1 }
 0x41a   :  { %v633_v26 = vpop.f32.mrb[13].mxu1  ;;  %v676_v27 = vsel %vm672_vm4, %v6712_v24, -inf }
 0x41b   :  { %677 = vmax.xlane.f32.xlu1 %v676_v27  ;;  %v673_v28 = vsel %vm672_vm4, %v633_v26, -inf }
 0x41c   :  { %674 = vmax.xlane.f32.xlu0 %v673_v28 }
 0x41d   :  { %v6715_v29 = vpop.f32.mrb[14].mxu1 }
 0x41e   :  { %v643_v30 = vpop.f32.mrb[15].mxu1  ;;  %v682_v31 = vsel %vm672_vm4, %v6715_v29, -inf }
 0x41f   :  { %683 = vmax.xlane.f32.xlu1 %v682_v31  ;;  %v679_v32 = vsel %vm672_vm4, %v643_v30, -inf  ;;  %v7384_v31 = vpack.c.bf16 %v7799_v19, %v7798_v22 }
 0x420   :  { %680 = vmax.xlane.f32.xlu0 %v679_v32 }
 0x421   :  { %v6718_v33 = vpop.f32.mrb[16].mxu1 }
 0x422   :  { %v653_v34 = vpop.f32.mrb[17].mxu1  ;;  %v688_v35 = vsel %vm672_vm4, %v6718_v33, -inf }
 0x423   :  { %v685_v38 = vsel %vm672_vm4, %v653_v34, -inf }
 0x424   :  { %689 = vmax.xlane.f32.xlu0 %v688_v35 }
 0x425   :  { %v8804_v36 = vpop.f32.mrb[18].mxu1 }
 0x426   :  { %v8806_v37 = vpop.f32.mrb[19].mxu1  ;;  %v694_v39 = vsel %vm672_vm4, %v8804_v36, -inf }
 0x427   :  { %v691_v40 = vsel %vm672_vm4, %v8806_v37, -inf }
 0x428   :  { %686 = vmax.xlane.f32.xlu0 %v685_v38 }
 0x430   :  { %7811 = vrot.lane.b32.xlu1 %v8742_v21, %s8454_s28 }
 0x43e   :  { %7806 = vrot.lane.b32.xlu0 %v8730_v17, %s8454_s28 }
 0x442   :  { %922 = vrot.lane.b32.xlu0 %v8704_v5, %s8455_s29 }
 0x446   :  { %926 = vrot.lane.b32.xlu0 %v8714_v10, %s8455_s29 }
 0x44a   :  { %930 = vrot.lane.b32.xlu0 %v8724_v15, %s8455_s29 }
 0x44e   :  { %934 = vrot.lane.b32.xlu0 %v8734_v20, %s8455_s29 }
 0x452   :  { %7816 = vrot.lane.b32.xlu0 %v8710_v7, %s8456_s0 }
 0x454   :  { %695 = vmax.xlane.f32.xlu1 %v694_v39 }
 0x456   :  { %7826 = vrot.lane.b32.xlu0 %v8730_v17, %s8456_s0 }
 0x458   :  { %692 = vmax.xlane.f32.xlu1 %v691_v40 }
 0x45a   :  { %7836 = vrot.lane.b32.xlu0 %v8710_v7, %s8457_s2 }
 0x469   :  { %924 = vrot.lane.b32.xlu1 %v8702_v3, %s8455_s29 }
 0x46d   :  { %928 = vrot.lane.b32.xlu1 %v8712_v8, %s8455_s29 }
 0x471   :  { %932 = vrot.lane.b32.xlu1 %v8722_v13, %s8455_s29 }
 0x475   :  { %936 = vrot.lane.b32.xlu1 %v8732_v18, %s8455_s29 }
 0x479   :  { %7821 = vrot.lane.b32.xlu1 %v8720_v12, %s8456_s0 }
 0x47d   :  { %7831 = vrot.lane.b32.xlu1 %v8742_v21, %s8456_s0 }
 0x481   :  { %7841 = vrot.lane.b32.xlu1 %v8720_v12, %s8457_s2 }
 0x4a8   :  { %v678_v41 = vpop.xlane.xlu1 %677 }
 0x4a9   :  { %v698_v43 = vsub.f32 %v6712_v24, %v678_v41  ;;  %v675_v46 = vpop.xlane.xlu0 %674 }
 0x4aa   :  { %v697_v49 = vsub.f32 %v633_v26, %v675_v46 }
 0x4ab   :  { %v707_v53 = vmul.f32 1.442695, %v698_v43 }
 0x4ac   :  { %v705_v55 = vmul.f32 1.442695, %v697_v49  ;;  %v684_v59 = vpop.xlane.xlu1 %683 }
 0x4ad   :  { %v700_v61 = vsub.f32 %v6715_v29, %v684_v59  ;;  %v681_v1 = vpop.xlane.xlu0 %680 }
 0x4ae   :  { %8075 = vpow2.f32 %v705_v55  ;;  %v699_v4 = vsub.f32 %v643_v30, %v681_v1 }
 0x4af   :  { %8077 = vpow2.f32 %v707_v53  ;;  %v711_v6 = vmul.f32 1.442695, %v700_v61 }
 0x4b0   :  { %v709_v9 = vmul.f32 1.442695, %v699_v4  ;;  %v7812_v40 = vpop.permute.xlu1 %7811 }
 0x4b1   :  { %v690_v11 = vpop.xlane.xlu0 %689  ;;  %v7814_v46 = vunpack.i.h.bf16 %v7812_v40  ;;  %v7813_v49 = vunpack.i.l.bf16 %v7812_v40 }
 0x4b2   :  { %8079 = vpow2.f32 %v709_v9  ;;  %v702_v14 = vsub.f32 %v6718_v33, %v690_v11 }
 0x4b3   :  { %8081 = vpow2.f32 %v711_v6  ;;  %v7396_v55 = vpack.c.bf16 %v7814_v46, %v7813_v49 }
 0x4b4   :  { %v715_v26 = vmul.f32 1.442695, %v702_v14 }
 0x4b5   :  { %v687_v16 = vpop.xlane.xlu0 %686 }
 0x4b6   :  { %v701_v24 = vsub.f32 %v653_v34, %v687_v16 }
 0x4b8   :  { %v8847_v27 = vpop.eup %8075  ;;  %v713_v28 = vmul.f32 1.442695, %v701_v24 }
 0x4b9   :  { %v8849_v29 = vpop.eup %8077  ;;  %6738 = vmatprep.mubr.msk.f32.mxu0 %vm672_vm4, %v8847_v27  ;;  %v7807_v30 = vpop.permute.xlu0 %7806 }
 0x4ba   :  { %8083 = vpow2.f32 %v713_v28  ;;  %6739 = vmatmul.mubr.msk.f32.vlgmr.msra.gmra.mrb[12].mxu0 %vm672_vm4, %v8849_v29  ;;  %v7809_v34 = vunpack.i.h.bf16 %v7807_v30  ;;  %v7808_v35 = vunpack.i.l.bf16 %v7807_v30 }
 0x4bb   :  { %8085 = vpow2.f32 %v715_v26  ;;  %7383 = vmatpush3.bf16.xpose.msk.msra.mxu0 %vm8758_vm3, %v8778_v23 }
 0x4bc   :  { %v8858_v2 = vpop.eup %8079  ;;  %7386 = vmatprep.subr.msk.bf16.mxu0 %vm8758_vm3, %v7384_v31  ;;  %v7390_v39 = vpack.c.bf16 %v7809_v34, %v7808_v35 }
 0x4bd   :  { %v8862_v32 = vpop.eup %8081  ;;  %6741 = vmatprep.mubr.msk.f32.mxu0 %vm672_vm4, %v8858_v2  ;;  %v923_v33 = vpop.permute.xlu0 %922 }
 0x4be   :  { %6742 = vmatmul.mubr.msk.f32.gmra.mrb[14].mxu0 %vm672_vm4, %v8862_v32 }
 0x4c1   :  { %v927_v38 = vpop.permute.xlu0 %926 }
 0x4c3   :  { %7389 = vmatpush3.bf16.xpose.msk.msra.mxu0 %vm8758_vm3, %v7384_v31 }
 0x4c4   :  { %v8870_v23 = vpop.eup %8083  ;;  %7392 = vmatprep.subr.msk.bf16.mxu0 %vm8758_vm3, %v7390_v39 }
 0x4c5   :  { %v8874_v41 = vpop.eup %8085  ;;  %6744 = vmatprep.mubr.msk.f32.mxu0 %vm672_vm4, %v8870_v23  ;;  %v931_v43 = vpop.permute.xlu0 %930 }
 0x4c6   :  { %6745 = vmatmul.mubr.msk.f32.gmra.mrb[16].mxu0 %vm672_vm4, %v8874_v41 }
 0x4c9   :  { %v935_v53 = vpop.permute.xlu0 %934 }
 0x4cb   :  { %7395 = vmatpush3.bf16.xpose.msk.msra.mxu0 %vm8758_vm3, %v7390_v39 }
 0x4cc   :  { %7398 = vmatprep.subr.msk.bf16.mxu0 %vm8758_vm3, %v7396_v55 }
 0x4cd   :  { %v7817_v59 = vpop.permute.xlu0 %7816 }
 0x4ce   :  { %v7819_v61 = vunpack.i.h.bf16 %v7817_v59  ;;  %v7818_v1 = vunpack.i.l.bf16 %v7817_v59 }
 0x4d0   :  { %v7402_v4 = vpack.c.bf16 %v7819_v61, %v7818_v1 }
 0x4d2   :  { %7403 = vmatprep.subr.bf16.mxu1 %v7402_v4 }
 0x4d3   :  { %7401 = vmatpush3.bf16.xpose.msk.msra.mxu0 %vm8758_vm3, %v7396_v55  ;;  %7405 = vmatpush3.bf16.msra.mxu1 %v7402_v4 }
 0x4e1   :  { %v696_v6 = vpop.xlane.xlu1 %695 }
 0x4e2   :  { %v704_v9 = vsub.f32 %v8804_v36, %v696_v6  ;;  %v7827_v36 = vpop.permute.xlu0 %7826 }
 0x4e3   :  { %v7829_v34 = vunpack.i.h.bf16 %v7827_v36  ;;  %v7828_v35 = vunpack.i.l.bf16 %v7827_v36 }
 0x4e4   :  { %v719_v16 = vmul.f32 1.442695, %v704_v9 }
 0x4e5   :  { %v693_v11 = vpop.xlane.xlu1 %692  ;;  %v7410_v61 = vpack.c.bf16 %v7829_v34, %v7828_v35 }
 0x4e6   :  { %v703_v14 = vsub.f32 %v8806_v37, %v693_v11  ;;  %v7837_v1 = vpop.permute.xlu0 %7836 }
 0x4e7   :  { %v7838_v4 = vunpack.i.l.bf16 %v7837_v1 }
 0x4e8   :  { %v717_v19 = vmul.f32 1.442695, %v703_v14 }
 0x4e9   :  { %v925_v22 = vpop.permute.xlu1 %924 }
 0x4ea   :  { %8087 = vpow2.f32 %v717_v19 }
 0x4eb   :  { %8089 = vpow2.f32 %v719_v16 }
 0x4ed   :  { %v929_v24 = vpop.permute.xlu1 %928 }
 0x4f1   :  { %v933_v26 = vpop.permute.xlu1 %932 }
 0x4f4   :  { %v8888_v28 = vpop.eup %8087 }
 0x4f5   :  { %v8890_v30 = vpop.eup %8089  ;;  %6747 = vmatprep.mubr.msk.f32.mxu0 %vm672_vm4, %v8888_v28  ;;  %v937_v31 = vpop.permute.xlu1 %936 }
 0x4f6   :  { %6748 = vmatmul.mubr.msk.f32.gmra.mrb[18].mxu0 %vm672_vm4, %v8890_v30 }
 0x4f7   :  { %6766 = vmatprep.mubr.msk.f32.mxu0 %vm534_vm2, %v923_v33  ;;  %v7839_v33 = vunpack.i.h.bf16 %v7837_v1 }
 0x4f9   :  { %v7822_v37 = vpop.permute.xlu1 %7821 }
 0x4fa   :  { %v7824_v39 = vunpack.i.h.bf16 %v7822_v37  ;;  %v7823_v40 = vunpack.i.l.bf16 %v7822_v37  ;;  %6767 = vmatmul.mubr.msk.f32.vlgmr.msra.gmra.mrb[20].mxu0 %vm534_vm2, %v925_v22 }
 0x4fb   :  { %6769 = vmatprep.mubr.msk.f32.mxu0 %vm534_vm2, %v927_v38  ;;  %v8903_v38 = vpack.c.bf16 %v7839_v33, %v7838_v4 }
 0x4fc   :  { %v7406_v46 = vpack.c.bf16 %v7824_v39, %v7823_v40 }
 0x4fd   :  { %v7832_v49 = vpop.permute.xlu1 %7831 }
 0x4fe   :  { %v7834_v55 = vunpack.i.h.bf16 %v7832_v49  ;;  %v7833_v59 = vunpack.i.l.bf16 %v7832_v49  ;;  %6770 = vmatmul.mubr.msk.f32.gmra.mrb[22].mxu0 %vm534_vm2, %v929_v24  ;;  %7407 = vmatprep.subr.bf16.mxu1 %v7406_v46 }
 0x4ff   :  { %6772 = vmatprep.mubr.msk.f32.mxu0 %vm534_vm2, %v931_v43  ;;  %7409 = vmatpush3.bf16.msra.mxu1 %v7406_v46 }
 0x500   :  { %7411 = vmatprep.subr.bf16.mxu1 %v7410_v61  ;;  %v7414_v6 = vpack.c.bf16 %v7834_v55, %v7833_v59 }
 0x501   :  { %v7842_v4 = vpop.permute.xlu1 %7841 }
 0x502   :  { %6773 = vmatmul.mubr.msk.f32.gmra.mrb[24].mxu0 %vm534_vm2, %v933_v26  ;;  %v7844_v45 = vunpack.i.h.bf16 %v7842_v4  ;;  %v7843_v47 = vunpack.i.l.bf16 %v7842_v4 }
 0x503   :  { %6775 = vmatprep.mubr.msk.f32.mxu0 %vm534_vm2, %v935_v53  ;;  %7413 = vmatpush3.bf16.msra.mxu1 %v7410_v61 }
 0x504   :  { %7415 = vmatprep.subr.bf16.mxu1 %v7414_v6 }
 0x506   :  { %6776 = vmatmul.mubr.msk.f32.gmra.mrb[26].mxu0 %vm534_vm2, %v937_v31 }
 0x507   :  { %7417 = vmatpush3.bf16.msra.mxu1 %v7414_v6 }
 0x508   :  { %7420 = vmatprep.subr.msk.bf16.mxu1 %vm8758_vm3, %v8903_v38 }
 0x58d   :  { %v8909_v43 = vpop.f32.mrb[12].mxu0 }
 0x58e   :  { %v8911_v9 = vpop.f32.mrb[13].mxu0 }
 0x591   :  { %v8913_v11 = vpop.f32.mrb[14].mxu0 }
 0x592   :  { %v8915_v14 = vpop.f32.mrb[15].mxu0 }
 0x599   :  { %v8917_v53 = vpop.f32.mrb[16].mxu0 }
 0x59a   :  { %v8919_v16 = vpop.f32.mrb[17].mxu0 }
 0x5c9   :  { %v8921_v19 = vpop.f32.mrb[18].mxu0 }
 0x5ca   :  { %v8923_v22 = vpop.f32.mrb[19].mxu0 }
 0x5cd   :  { %v6768_v24 = vpop.f32.mrb[20].mxu0 }
 0x5ce   :  { %v1052_v26 = vpop.f32.mrb[21].mxu0  ;;  %v1094_v31 = vsel %vm672_vm4, %v6768_v24, -inf }
 0x5cf   :  { %1095 = vmax.xlane.f32.xlu1 %v1094_v31  ;;  %v1091_v36 = vsel %vm672_vm4, %v1052_v26, -inf }
 0x5d0   :  { %1092 = vmax.xlane.f32.xlu0 %v1091_v36 }
 0x5d1   :  { %v6771_v37 = vpop.f32.mrb[22].mxu0 }
 0x5d2   :  { %v1062_v34 = vpop.f32.mrb[23].mxu0  ;;  %v1100_v35 = vsel %vm672_vm4, %v6771_v37, -inf }
 0x5d3   :  { %1101 = vmax.xlane.f32.xlu1 %v1100_v35  ;;  %v1097_v39 = vsel %vm672_vm4, %v1062_v34, -inf }
 0x5d4   :  { %1098 = vmax.xlane.f32.xlu0 %v1097_v39 }
 0x5d5   :  { %v6774_v40 = vpop.f32.mrb[24].mxu0 }
 0x5d6   :  { %v1072_v46 = vpop.f32.mrb[25].mxu0  ;;  %v1106_v49 = vsel %vm672_vm4, %v6774_v40, -inf }
 0x5d7   :  { %v1103_v61 = vsel %vm672_vm4, %v1072_v46, -inf }
 0x5d8   :  { %1107 = vmax.xlane.f32.xlu0 %v1106_v49 }
 0x5d9   :  { %v8930_v55 = vpop.f32.mrb[26].mxu0 }
 0x5da   :  { %v8932_v59 = vpop.f32.mrb[27].mxu0  ;;  %v1112_v1 = vsel %vm672_vm4, %v8930_v55, -inf }
 0x5db   :  { %v1109_v33 = vsel %vm672_vm4, %v8932_v59, -inf }
 0x5dc   :  { %1104 = vmax.xlane.f32.xlu0 %v1103_v61 }
 0x5e4   :  { %7851 = vrot.lane.b32.xlu1 %v8742_v21, %s8457_s2 }
 0x5f2   :  { %7846 = vrot.lane.b32.xlu0 %v8730_v17, %s8457_s2 }
 0x5f6   :  { %1373 = vrot.lane.b32.xlu0 %v8704_v5, %s10688_s20 }
 0x5fa   :  { %1377 = vrot.lane.b32.xlu0 %v8714_v10, %s10688_s20 }
 0x5fe   :  { %1381 = vrot.lane.b32.xlu0 %v8724_v15, %s10688_s20 }
 0x602   :  { %1385 = vrot.lane.b32.xlu0 %v8734_v20, %s10688_s20 }
 0x606   :  { %7856 = vrot.lane.b32.xlu0 %v8710_v7, %s10686_s21 }
 0x608   :  { %1113 = vmax.xlane.f32.xlu1 %v1112_v1 }
 0x60a   :  { %7866 = vrot.lane.b32.xlu0 %v8730_v17, %s10686_s21 }
 0x60c   :  { %1110 = vmax.xlane.f32.xlu1 %v1109_v33 }
 0x60e   :  { %7876 = vrot.lane.b32.xlu0 %v8710_v7, %s10684_s1 }
 0x61d   :  { %1375 = vrot.lane.b32.xlu1 %v8702_v3, %s10688_s20 }
 0x621   :  { %1379 = vrot.lane.b32.xlu1 %v8712_v8, %s10688_s20 }
 0x625   :  { %1383 = vrot.lane.b32.xlu1 %v8722_v13, %s10688_s20 }
 0x629   :  { %1387 = vrot.lane.b32.xlu1 %v8732_v18, %s10688_s20  ;;  %s10690_s20 = smov 24  }
 0x62d   :  { %7861 = vrot.lane.b32.xlu1 %v8720_v12, %s10686_s21 }
 0x631   :  { %7871 = vrot.lane.b32.xlu1 %v8742_v21, %s10686_s21 }
 0x635   :  { %7881 = vrot.lane.b32.xlu1 %v8720_v12, %s10684_s1 }
 0x65c   :  { %v1096_v6 = vpop.xlane.xlu1 %1095 }
 0x65d   :  { %v1116_v31 = vsub.f32 %v6768_v24, %v1096_v6  ;;  %v1093_v36 = vpop.xlane.xlu0 %1092 }
 0x65e   :  { %v1115_v35 = vsub.f32 %v1052_v26, %v1093_v36 }
 0x65f   :  { %v1125_v39 = vmul.f32 1.442695, %v1116_v31 }
 0x660   :  { %v1123_v49 = vmul.f32 1.442695, %v1115_v35  ;;  %v1102_v61 = vpop.xlane.xlu1 %1101 }
 0x661   :  { %v1118_v1 = vsub.f32 %v6771_v37, %v1102_v61  ;;  %v1099_v33 = vpop.xlane.xlu0 %1098 }
 0x662   :  { %8091 = vpow2.f32 %v1123_v49  ;;  %v1117_v0 = vsub.f32 %v1062_v34, %v1099_v33  ;;  %v7424_v34 = vpack.c.bf16 %v7844_v45, %v7843_v47 }
 0x663   :  { %8093 = vpow2.f32 %v1125_v39  ;;  %v1129_v63 = vmul.f32 1.442695, %v1118_v1 }
 0x664   :  { %v1127_v58 = vmul.f32 1.442695, %v1117_v0  ;;  %v7852_v0 = vpop.permute.xlu1 %7851 }
 0x665   :  { %v1108_v57 = vpop.xlane.xlu0 %1107  ;;  %v7854_v4 = vunpack.i.h.bf16 %v7852_v0  ;;  %v7853_v35 = vunpack.i.l.bf16 %v7852_v0 }
 0x666   :  { %8095 = vpow2.f32 %v1127_v58  ;;  %v1120_v52 = vsub.f32 %v6774_v40, %v1108_v57 }
 0x667   :  { %8097 = vpow2.f32 %v1129_v63  ;;  %v7436_v49 = vpack.c.bf16 %v7854_v4, %v7853_v35 }
 0x668   :  { %v1133_v6 = vmul.f32 1.442695, %v1120_v52 }
 0x669   :  { %v1105_v51 = vpop.xlane.xlu0 %1104 }
 0x66a   :  { %v1119_v24 = vsub.f32 %v1072_v46, %v1105_v51 }
 0x66c   :  { %v8971_v26 = vpop.eup %8091  ;;  %v1131_v31 = vmul.f32 1.442695, %v1119_v24 }
 0x66d   :  { %v8973_v36 = vpop.eup %8093  ;;  %6794 = vmatprep.mubr.msk.f32.mxu1 %vm672_vm4, %v8971_v26  ;;  %v7847_v37 = vpop.permute.xlu0 %7846 }
 0x66e   :  { %8099 = vpow2.f32 %v1131_v31  ;;  %6795 = vmatmul.mubr.msk.f32.vlgmr.msra.gmra.mrb[20].mxu1 %vm672_vm4, %v8973_v36  ;;  %v7849_v45 = vunpack.i.h.bf16 %v7847_v37  ;;  %v7848_v47 = vunpack.i.l.bf16 %v7847_v37 }
 0x66f   :  { %8101 = vpow2.f32 %v1133_v6  ;;  %7423 = vmatpush3.bf16.xpose.msk.msra.mxu1 %vm8758_vm3, %v8903_v38 }
 0x670   :  { %v8982_v51 = vpop.eup %8095  ;;  %7426 = vmatprep.subr.msk.bf16.mxu1 %vm8758_vm3, %v7424_v34  ;;  %v7430_v63 = vpack.c.bf16 %v7849_v45, %v7848_v47 }
 0x671   :  { %v8986_v52 = vpop.eup %8097  ;;  %v1374_v57 = vpop.permute.xlu0 %1373  ;;  %6797 = vmatprep.mubr.msk.f32.mxu1 %vm672_vm4, %v8982_v51 }
 0x672   :  { %6798 = vmatmul.mubr.msk.f32.gmra.mrb[22].mxu1 %vm672_vm4, %v8986_v52 }
 0x675   :  { %v1378_v58 = vpop.permute.xlu0 %1377 }
 0x677   :  { %7429 = vmatpush3.bf16.xpose.msk.msra.mxu1 %vm8758_vm3, %v7424_v34 }
 0x678   :  { %v8994_v38 = vpop.eup %8099  ;;  %7432 = vmatprep.subr.msk.bf16.mxu1 %vm8758_vm3, %v7430_v63 }
 0x679   :  { %v8998_v40 = vpop.eup %8101  ;;  %v1382_v46 = vpop.permute.xlu0 %1381  ;;  %6800 = vmatprep.mubr.msk.f32.mxu1 %vm672_vm4, %v8994_v38 }
 0x67a   :  { %6801 = vmatmul.mubr.msk.f32.gmra.mrb[24].mxu1 %vm672_vm4, %v8998_v40 }
 0x67d   :  { %v1386_v39 = vpop.permute.xlu0 %1385 }
 0x67f   :  { %7435 = vmatpush3.bf16.xpose.msk.msra.mxu1 %vm8758_vm3, %v7430_v63 }
 0x680   :  { %7438 = vmatprep.subr.msk.bf16.mxu1 %vm8758_vm3, %v7436_v49 }
 0x681   :  { %v7857_v61 = vpop.permute.xlu0 %7856 }
 0x682   :  { %v7859_v1 = vunpack.i.h.bf16 %v7857_v61  ;;  %v7858_v33 = vunpack.i.l.bf16 %v7857_v61 }
 0x684   :  { %v7442_v24 = vpack.c.bf16 %v7859_v1, %v7858_v33 }
 0x686   :  { %7443 = vmatprep.subr.bf16.mxu0 %v7442_v24 }
 0x687   :  { %7441 = vmatpush3.bf16.xpose.msk.msra.mxu1 %vm8758_vm3, %v7436_v49  ;;  %7445 = vmatpush3.bf16.msra.mxu0 %v7442_v24 }
 0x695   :  { %v1114_v6 = vpop.xlane.xlu1 %1113 }
 0x696   :  { %v1122_v31 = vsub.f32 %v8930_v55, %v1114_v6  ;;  %v7867_v55 = vpop.permute.xlu0 %7866 }
 0x697   :  { %v7869_v49 = vunpack.i.h.bf16 %v7867_v55  ;;  %v7868_v33 = vunpack.i.l.bf16 %v7867_v55 }
 0x698   :  { %v1137_v45 = vmul.f32 1.442695, %v1122_v31 }
 0x699   :  { %v1111_v37 = vpop.xlane.xlu1 %1110 }
 0x69a   :  { %v1121_v34 = vsub.f32 %v8932_v59, %v1111_v37  ;;  %v7877_v62 = vpop.permute.xlu0 %7876 }
 0x69b   :  { %v7878_v55 = vunpack.i.l.bf16 %v7877_v62 }
 0x69c   :  { %v1135_v47 = vmul.f32 1.442695, %v1121_v34 }
 0x69d   :  { %v1376_v63 = vpop.permute.xlu1 %1375 }
 0x69e   :  { %8103 = vpow2.f32 %v1135_v47  ;;  %v7450_v47 = vpack.c.bf16 %v7869_v49, %v7868_v33 }
 0x69f   :  { %8105 = vpow2.f32 %v1137_v45 }
 0x6a1   :  { %v1380_v0 = vpop.permute.xlu1 %1379 }
 0x6a5   :  { %v1384_v4 = vpop.permute.xlu1 %1383 }
 0x6a8   :  { %v9012_v35 = vpop.eup %8103 }
 0x6a9   :  { %v9014_v61 = vpop.eup %8105  ;;  %v1388_v1 = vpop.permute.xlu1 %1387  ;;  %6803 = vmatprep.mubr.msk.f32.mxu1 %vm672_vm4, %v9012_v35 }
 0x6aa   :  { %6804 = vmatmul.mubr.msk.f32.gmra.mrb[26].mxu1 %vm672_vm4, %v9014_v61 }
 0x6ab   :  { %6822 = vmatprep.mubr.msk.f32.mxu1 %vm534_vm2, %v1374_v57  ;;  %v7879_v57 = vunpack.i.h.bf16 %v7877_v62 }
 0x6ad   :  { %v7862_v59 = vpop.permute.xlu1 %7861 }
 0x6ae   :  { %v7864_v24 = vunpack.i.h.bf16 %v7862_v59  ;;  %v7863_v6 = vunpack.i.l.bf16 %v7862_v59  ;;  %6823 = vmatmul.mubr.msk.f32.vlgmr.msra.gmra.mrb[28].mxu1 %vm534_vm2, %v1376_v63 }
 0x6af   :  { %6825 = vmatprep.mubr.msk.f32.mxu1 %vm534_vm2, %v1378_v58  ;;  %v9027_v58 = vpack.c.bf16 %v7879_v57, %v7878_v55 }
 0x6b0   :  { %v7446_v31 = vpack.c.bf16 %v7864_v24, %v7863_v6 }
 0x6b1   :  { %v7872_v37 = vpop.permute.xlu1 %7871 }
 0x6b2   :  { %v7874_v34 = vunpack.i.h.bf16 %v7872_v37  ;;  %v7873_v45 = vunpack.i.l.bf16 %v7872_v37  ;;  %6826 = vmatmul.mubr.msk.f32.gmra.mrb[30].mxu1 %vm534_vm2, %v1380_v0  ;;  %7447 = vmatprep.subr.bf16.mxu0 %v7446_v31 }
 0x6b3   :  { %6828 = vmatprep.mubr.msk.f32.mxu1 %vm534_vm2, %v1382_v46  ;;  %7449 = vmatpush3.bf16.msra.mxu0 %v7446_v31 }
 0x6b4   :  { %7451 = vmatprep.subr.bf16.mxu0 %v7450_v47  ;;  %v7454_v63 = vpack.c.bf16 %v7874_v34, %v7873_v45 }
 0x6b6   :  { %6829 = vmatmul.mubr.msk.f32.gmra.mrb[32].mxu1 %vm534_vm2, %v1384_v4 }
 0x6b7   :  { %6831 = vmatprep.mubr.msk.f32.mxu1 %vm534_vm2, %v1386_v39  ;;  %7453 = vmatpush3.bf16.msra.mxu0 %v7450_v47 }
 0x6b8   :  { %7455 = vmatprep.subr.bf16.mxu0 %v7454_v63 }
 0x6ba   :  { %6832 = vmatmul.mubr.msk.f32.gmra.mrb[34].mxu1 %vm534_vm2, %v1388_v1 }
 0x6bb   :  { %7457 = vmatpush3.bf16.msra.mxu0 %v7454_v63 }
 0x6bc   :  { %7460 = vmatprep.subr.msk.bf16.mxu0 %vm8758_vm3, %v9027_v58 }
 0x741   :  { %v9033_v46 = vpop.f32.mrb[20].mxu1 }
 0x742   :  { %v9035_v0 = vpop.f32.mrb[21].mxu1 }
 0x745   :  { %v9037_v62 = vpop.f32.mrb[22].mxu1 }
 0x746   :  { %v9039_v4 = vpop.f32.mrb[23].mxu1 }
 0x74d   :  { %v9041_v39 = vpop.f32.mrb[24].mxu1 }
 0x74e   :  { %v9043_v59 = vpop.f32.mrb[25].mxu1 }
 0x77d   :  { %v9045_v49 = vpop.f32.mrb[26].mxu1 }
 0x77e   :  { %v9047_v1 = vpop.f32.mrb[27].mxu1 }
 0x781   :  { %v6824_v33 = vpop.f32.mrb[28].mxu1 }
 0x782   :  { %v1503_v24 = vpop.f32.mrb[29].mxu1  ;;  %v1545_v6 = vsel %vm672_vm4, %v6824_v33, -inf }
 0x783   :  { %1546 = vmax.xlane.f32.xlu1 %v1545_v6  ;;  %v1542_v31 = vsel %vm672_vm4, %v1503_v24, -inf }
 0x784   :  { %1543 = vmax.xlane.f32.xlu0 %v1542_v31 }
 0x785   :  { %v6827_v37 = vpop.f32.mrb[30].mxu1 }
 0x786   :  { %v1513_v34 = vpop.f32.mrb[31].mxu1  ;;  %v1551_v45 = vsel %vm672_vm4, %v6827_v37, -inf }
 0x787   :  { %1552 = vmax.xlane.f32.xlu1 %v1551_v45  ;;  %v1548_v47 = vsel %vm672_vm4, %v1513_v34, -inf }
 0x788   :  { %1549 = vmax.xlane.f32.xlu0 %v1548_v47 }
 0x789   :  { %v6830_v57 = vpop.f32.mrb[32].mxu1 }
 0x78a   :  { %v1523_v55 = vpop.f32.mrb[33].mxu1  ;;  %v1557_v63 = vsel %vm672_vm4, %v6830_v57, -inf }
 0x78b   :  { %v1554_v6 = vsel %vm672_vm4, %v1523_v55, -inf }
 0x78c   :  { %1558 = vmax.xlane.f32.xlu0 %v1557_v63 }
 0x78d   :  { %v9054_v60 = vpop.f32.mrb[34].mxu1 }
 0x78e   :  { %v9056_v56 = vpop.f32.mrb[35].mxu1  ;;  %v1563_v31 = vsel %vm672_vm4, %v9054_v60, -inf }
 0x790   :  { %1555 = vmax.xlane.f32.xlu0 %v1554_v6 }
 0x798   :  { %7891 = vrot.lane.b32.xlu1 %v8742_v21, %s10684_s1 }
 0x7a6   :  { %7886 = vrot.lane.b32.xlu0 %v8730_v17, %s10684_s1 }
 0x7aa   :  { %1824 = vrot.lane.b32.xlu0 %v8704_v5, %s10682_s22  ;;  %v1560_v5 = vsel %vm672_vm4, %v9056_v56, -inf }
 0x7ae   :  { %1828 = vrot.lane.b32.xlu0 %v8714_v10, %s10682_s22  ;;  %v7882_v10 = vpop.permute.xlu1 %7881 }
 0x7af   :  { %v7884_v50 = vunpack.i.h.bf16 %v7882_v10  ;;  %v7883_v48 = vunpack.i.l.bf16 %v7882_v10 }
 0x7b2   :  { %1832 = vrot.lane.b32.xlu0 %v8724_v15, %s10682_s22 }
 0x7b6   :  { %1836 = vrot.lane.b32.xlu0 %v8734_v20, %s10682_s22 }
 0x7ba   :  { %7901 = vrot.lane.b32.xlu0 %v8720_v12, %s10680_s25 }
 0x7bc   :  { %1564 = vmax.xlane.f32.xlu1 %v1563_v31 }
 0x7c0   :  { %1561 = vmax.xlane.f32.xlu1 %v1560_v5 }
 0x7d1   :  { %1826 = vrot.lane.b32.xlu1 %v8702_v3, %s10682_s22 }
 0x7d5   :  { %1830 = vrot.lane.b32.xlu1 %v8712_v8, %s10682_s22 }
 0x7d9   :  { %1834 = vrot.lane.b32.xlu1 %v8722_v13, %s10682_s22 }
 0x7dd   :  { %1838 = vrot.lane.b32.xlu1 %v8732_v18, %s10682_s22 }
 0x7e1   :  { %7896 = vrot.lane.b32.xlu1 %v8710_v7, %s10680_s25 }
 0x810   :  { %v1547_v12 = vpop.xlane.xlu1 %1546 }
 0x811   :  { %v1567_v15 = vsub.f32 %v6824_v33, %v1547_v12  ;;  %v1544_v20 = vpop.xlane.xlu0 %1543 }
 0x812   :  { %v1566_v45 = vsub.f32 %v1503_v24, %v1544_v20 }
 0x813   :  { %v1576_v47 = vmul.f32 1.442695, %v1567_v15 }
 0x814   :  { %v1574_v63 = vmul.f32 1.442695, %v1566_v45  ;;  %v1553_v3 = vpop.xlane.xlu1 %1552 }
 0x815   :  { %v1569_v6 = vsub.f32 %v6827_v37, %v1553_v3  ;;  %v1550_v31 = vpop.xlane.xlu0 %1549  ;;  %v7464_v37 = vpack.c.bf16 %v7884_v50, %v7883_v48 }
 0x816   :  { %8107 = vpow2.f32 %v1574_v63  ;;  %v1568_v8 = vsub.f32 %v1513_v34, %v1550_v31 }
 0x817   :  { %8109 = vpow2.f32 %v1576_v47  ;;  %v1580_v13 = vmul.f32 1.442695, %v1569_v6 }
 0x818   :  { %v1578_v5 = vmul.f32 1.442695, %v1568_v8  ;;  %v7892_v10 = vpop.permute.xlu1 %7891 }
 0x819   :  { %v1559_v54 = vpop.xlane.xlu0 %1558  ;;  %v7894_v47 = vunpack.i.h.bf16 %v7892_v10  ;;  %v7893_v63 = vunpack.i.l.bf16 %v7892_v10 }
 0x81a   :  { %8111 = vpow2.f32 %v1578_v5  ;;  %v1571_v18 = vsub.f32 %v6830_v57, %v1559_v54 }
 0x81b   :  { %8113 = vpow2.f32 %v1580_v13  ;;  %v7476_v3 = vpack.c.bf16 %v7894_v47, %v7893_v63 }
 0x81c   :  { %v1584_v12 = vmul.f32 1.442695, %v1571_v18 }
 0x81d   :  { %v1556_v7 = vpop.xlane.xlu0 %1555 }
 0x81e   :  { %v1570_v33 = vsub.f32 %v1523_v55, %v1556_v7 }
 0x820   :  { %v9087_v24 = vpop.eup %8107  ;;  %v1582_v15 = vmul.f32 1.442695, %v1570_v33 }
 0x821   :  { %v9089_v20 = vpop.eup %8109  ;;  %6850 = vmatprep.mubr.msk.f32.mxu0 %vm672_vm4, %v9087_v24  ;;  %v7887_v54 = vpop.permute.xlu0 %7886 }
 0x822   :  { %8115 = vpow2.f32 %v1582_v15  ;;  %6851 = vmatmul.mubr.msk.f32.vlgmr.msra.gmra.mrb[28].mxu0 %vm672_vm4, %v9089_v20  ;;  %v7889_v48 = vunpack.i.h.bf16 %v7887_v54  ;;  %v7888_v50 = vunpack.i.l.bf16 %v7887_v54 }
 0x823   :  { %8117 = vpow2.f32 %v1584_v12  ;;  %7463 = vmatpush3.bf16.xpose.msk.msra.mxu0 %vm8758_vm3, %v9027_v58 }
 0x824   :  { %v9098_v34 = vpop.eup %8111  ;;  %7466 = vmatprep.subr.msk.bf16.mxu0 %vm8758_vm3, %v7464_v37  ;;  %v7470_v55 = vpack.c.bf16 %v7889_v48, %v7888_v50 }
 0x825   :  { %v9102_v57 = vpop.eup %8113  ;;  %6853 = vmatprep.mubr.msk.f32.mxu0 %vm672_vm4, %v9098_v34  ;;  %v1825_v6 = vpop.permute.xlu0 %1824 }
 0x826   :  { %6854 = vmatmul.mubr.msk.f32.gmra.mrb[30].mxu0 %vm672_vm4, %v9102_v57 }
 0x829   :  { %v1829_v13 = vpop.permute.xlu0 %1828 }
 0x82b   :  { %7469 = vmatpush3.bf16.xpose.msk.msra.mxu0 %vm8758_vm3, %v7464_v37 }
 0x82c   :  { %v9110_v58 = vpop.eup %8115  ;;  %7472 = vmatprep.subr.msk.bf16.mxu0 %vm8758_vm3, %v7470_v55 }
 0x82d   :  { %v9114_v45 = vpop.eup %8117  ;;  %6856 = vmatprep.mubr.msk.f32.mxu0 %vm672_vm4, %v9110_v58  ;;  %v1833_v15 = vpop.permute.xlu0 %1832 }
 0x82e   :  { %6857 = vmatmul.mubr.msk.f32.gmra.mrb[32].mxu0 %vm672_vm4, %v9114_v45 }
 0x831   :  { %v1837_v54 = vpop.permute.xlu0 %1836 }
 0x833   :  { %7475 = vmatpush3.bf16.xpose.msk.msra.mxu0 %vm8758_vm3, %v7470_v55 }
 0x834   :  { %7478 = vmatprep.subr.msk.bf16.mxu0 %vm8758_vm3, %v7476_v3 }
 0x83b   :  { %7481 = vmatpush3.bf16.xpose.msk.msra.mxu0 %vm8758_vm3, %v7476_v3 }
 0x849   :  { %v1565_v31 = vpop.xlane.xlu1 %1564 }
 0x84a   :  { %v1573_v8 = vsub.f32 %v9054_v60, %v1565_v31 }
 0x84c   :  { %v1588_v7 = vmul.f32 1.442695, %v1573_v8 }
 0x84d   :  { %v1562_v5 = vpop.xlane.xlu1 %1561 }
 0x84e   :  { %v1572_v18 = vsub.f32 %v9056_v56, %v1562_v5  ;;  %v7902_v56 = vpop.permute.xlu0 %7901 }
 0x84f   :  { %v7904_v47 = vunpack.i.h.bf16 %v7902_v56  ;;  %v7903_v63 = vunpack.i.l.bf16 %v7902_v56 }
 0x850   :  { %v1586_v33 = vmul.f32 1.442695, %v1572_v18 }
 0x851   :  { %v1827_v12 = vpop.permute.xlu1 %1826  ;;  %v7486_v5 = vpack.c.bf16 %v7904_v47, %v7903_v63 }
 0x852   :  { %8119 = vpow2.f32 %v1586_v33 }
 0x853   :  { %8121 = vpow2.f32 %v1588_v7 }
 0x855   :  { %v1831_v37 = vpop.permute.xlu1 %1830 }
 0x859   :  { %v1835_v48 = vpop.permute.xlu1 %1834 }
 0x85c   :  { %v9128_v50 = vpop.eup %8119 }
 0x85d   :  { %v9130_v55 = vpop.eup %8121  ;;  %6859 = vmatprep.mubr.msk.f32.mxu0 %vm672_vm4, %v9128_v50  ;;  %v1839_v60 = vpop.permute.xlu1 %1838 }
 0x85e   :  { %6860 = vmatmul.mubr.msk.f32.gmra.mrb[34].mxu0 %vm672_vm4, %v9130_v55 }
 0x85f   :  { %6878 = vmatprep.mubr.msk.f32.mxu0 %vm534_vm2, %v1825_v6 }
 0x861   :  { %v7897_v10 = vpop.permute.xlu1 %7896 }
 0x862   :  { %v7899_v3 = vunpack.i.h.bf16 %v7897_v10  ;;  %v7898_v31 = vunpack.i.l.bf16 %v7897_v10  ;;  %6879 = vmatmul.mubr.msk.f32.vlgmr.msra.gmra.mrb[36].mxu0 %vm534_vm2, %v1827_v12 }
 0x863   :  { %6881 = vmatprep.mubr.msk.f32.mxu0 %vm534_vm2, %v1829_v13 }
 0x864   :  { %v7482_v8 = vpack.c.bf16 %v7899_v3, %v7898_v31 }
 0x866   :  { %6882 = vmatmul.mubr.msk.f32.gmra.mrb[38].mxu0 %vm534_vm2, %v1831_v37  ;;  %7483 = vmatprep.subr.bf16.mxu1 %v7482_v8 }
 0x867   :  { %6884 = vmatprep.mubr.msk.f32.mxu0 %vm534_vm2, %v1833_v15  ;;  %7485 = vmatpush3.bf16.msra.mxu1 %v7482_v8 }
 0x868   :  { %7487 = vmatprep.subr.bf16.mxu1 %v7486_v5 }
 0x86a   :  { %6885 = vmatmul.mubr.msk.f32.gmra.mrb[40].mxu0 %vm534_vm2, %v1835_v48 }
 0x86b   :  { %6887 = vmatprep.mubr.msk.f32.mxu0 %vm534_vm2, %v1837_v54  ;;  %7489 = vmatpush3.bf16.msra.mxu1 %v7486_v5 }
 0x86e   :  { %6888 = vmatmul.mubr.msk.f32.gmra.mrb[42].mxu0 %vm534_vm2, %v1839_v60 }
 0x8f5   :  { %v9144_v6 = vpop.f32.mrb[28].mxu0 }
 0x8f6   :  { %v9146_v18 = vpop.f32.mrb[29].mxu0 }
 0x8f9   :  { %v9148_v13 = vpop.f32.mrb[30].mxu0 }
 0x8fa   :  { %v9150_v7 = vpop.f32.mrb[31].mxu0 }
 0x901   :  { %v9152_v33 = vpop.f32.mrb[32].mxu0 }
 0x902   :  { %v9154_v12 = vpop.f32.mrb[33].mxu0 }
 0x931   :  { %v9156_v15 = vpop.f32.mrb[34].mxu0 }
 0x932   :  { %v9158_v37 = vpop.f32.mrb[35].mxu0 }
 0x935   :  { %v6880_v54 = vpop.f32.mrb[36].mxu0 }
 0x936   :  { %v1954_v48 = vpop.f32.mrb[37].mxu0  ;;  %v1996_v60 = vsel %vm672_vm4, %v6880_v54, -inf }
 0x937   :  { %1997 = vmax.xlane.f32.xlu1 %v1996_v60  ;;  %v1993_v56 = vsel %vm672_vm4, %v1954_v48, -inf }
 0x938   :  { %1994 = vmax.xlane.f32.xlu0 %v1993_v56 }
 0x939   :  { %v6883_v10 = vpop.f32.mrb[38].mxu0 }
 0x93a   :  { %v1964_v47 = vpop.f32.mrb[39].mxu0  ;;  %v2002_v63 = vsel %vm672_vm4, %v6883_v10, -inf }
 0x93b   :  { %v1999_v5 = vsel %vm672_vm4, %v1964_v47, -inf }
 0x93c   :  { %2003 = vmax.xlane.f32.xlu0 %v2002_v63  ;;  %v1142_v63 = vsel %vm672_vm4, %v8973_v36, 0.0  ;;  %v1139_v36 = vsel %vm672_vm4, %v8971_v26, 0.0  ;;  %v1596_v26 = vsel %vm672_vm4, %v9098_v34, 0.0 }
 0x93d   :  { %v6886_v3 = vpop.f32.mrb[40].mxu0 }
 0x93e   :  { %v9163_v31 = vpop.f32.mrb[41].mxu0  ;;  %v2008_v8 = vsel %vm672_vm4, %v6886_v3, -inf }
 0x93f   :  { %2009 = vmax.xlane.f32.xlu1 %v2008_v8  ;;  %v2005_v56 = vsel %vm672_vm4, %v9163_v31, -inf  ;;  %v1154_v8 = vsel %vm672_vm4, %v8998_v40, 0.0  ;;  %v1590_v40 = vsel %vm672_vm4, %v9087_v24, 0.0  ;;  %v1599_v24 = vsel %vm672_vm4, %v9102_v57, 0.0 }
 0x940   :  { %2000 = vmax.xlane.f32.xlu0 %v1999_v5 }
 0x941   :  { %v9167_v25 = vpop.f32.mrb[42].mxu0 }
 0x942   :  { %v9169_v60 = vpop.f32.mrb[43].mxu0 }
 0x943   :  { %v2011_v5 = vsel %vm672_vm4, %v9169_v60, -inf }
 0x944   :  { %2006 = vmax.xlane.f32.xlu0 %v2005_v56  ;;  %v1605_v56 = vsel %vm672_vm4, %v9114_v45, 0.0  ;;  %v1593_v45 = vsel %vm672_vm4, %v9089_v20, 0.0  ;;  %v1151_v20 = vsel %vm672_vm4, %v8994_v38, 0.0 }
 0x950   :  { %7911 = vrot.lane.b32.xlu1 %v8742_v21, %s10680_s25  ;;  %v2014_v21 = vsel %vm672_vm4, %v9167_v25, -inf }
 0x95a   :  { %7906 = vrot.lane.b32.xlu0 %v8730_v17, %s10680_s25  ;;  %v1160_v17 = vsel %vm672_vm4, %v9014_v61, 0.0  ;;  %v1148_v61 = vsel %vm672_vm4, %v8986_v52, 0.0 }
 0x974   :  { %1143 = vadd.xlane.f32.xlu1 %v1142_v63  ;;  %v1145_v63 = vsel %vm672_vm4, %v8982_v51, 0.0  ;;  %v1602_v51 = vsel %vm672_vm4, %v9110_v58, 0.0 }
 0x978   :  { %1155 = vadd.xlane.f32.xlu1 %v1154_v8 }
 0x979   :  { %2012 = vmax.xlane.f32.xlu0 %v2011_v5 }
 0x97c   :  { %1606 = vadd.xlane.f32.xlu1 %v1605_v56 }
 0x97d   :  { %2015 = vmax.xlane.f32.xlu0 %v2014_v21 }
 0x980   :  { %1161 = vadd.xlane.f32.xlu1 %v1160_v17 }
 0x981   :  { %1140 = vadd.xlane.f32.xlu0 %v1139_v36 }
 0x985   :  { %1591 = vadd.xlane.f32.xlu0 %v1590_v40 }
 0x989   :  { %1594 = vadd.xlane.f32.xlu0 %v1593_v45 }
 0x98d   :  { %1146 = vadd.xlane.f32.xlu0 %v1145_v63 }
 0x991   :  { %1149 = vadd.xlane.f32.xlu0 %v1148_v61 }
 0x995   :  { %1597 = vadd.xlane.f32.xlu0 %v1596_v26 }
 0x999   :  { %1600 = vadd.xlane.f32.xlu0 %v1599_v24 }
 0x99d   :  { %1152 = vadd.xlane.f32.xlu0 %v1151_v20 }
 0x9a1   :  { %1603 = vadd.xlane.f32.xlu0 %v1602_v51 }
 0x9c4   :  { %v1998_v8 = vpop.xlane.xlu1 %1997 }
 0x9c5   :  { %v2018_v5 = vsub.f32 %v6880_v54, %v1998_v8  ;;  %v1995_v52 = vpop.xlane.xlu0 %1994 }
 0x9c6   :  { %v2017_v56 = vsub.f32 %v1954_v48, %v1995_v52 }
 0x9c7   :  { %v2027_v21 = vmul.f32 1.442695, %v2018_v5 }
 0x9c8   :  { %v2025_v17 = vmul.f32 1.442695, %v2017_v56 }
 0x9c9   :  { %8123 = vpow2.f32 %v2027_v21  ;;  %v2004_v34 = vpop.xlane.xlu0 %2003 }
 0x9ca   :  { %8125 = vpow2.f32 %v2025_v17  ;;  %v2020_v36 = vsub.f32 %v6883_v10, %v2004_v34 }
 0x9cc   :  { %v2031_v57 = vmul.f32 1.442695, %v2020_v36  ;;  %v2010_v40 = vpop.xlane.xlu1 %2009  ;;  %v1157_v36 = vsel %vm672_vm4, %v9012_v35, 0.0  ;;  %v1608_v35 = vsel %vm672_vm4, %v9128_v50, 0.0 }
 0x9cd   :  { %v2022_v45 = vsub.f32 %v6886_v3, %v2010_v40  ;;  %v2001_v63 = vpop.xlane.xlu0 %2000  ;;  %v1611_v40 = vsel %vm672_vm4, %v9130_v55, 0.0  ;;  %v724_v55 = vsel %vm672_vm4, %v8849_v29, 0.0 }
 0x9ce   :  { %8127 = vpow2.f32 %v2031_v57  ;;  %v2019_v38 = vsub.f32 %v1964_v47, %v2001_v63 }
 0x9cf   :  { %v2035_v61 = vmul.f32 1.442695, %v2022_v45 }
 0x9d0   :  { %v2029_v26 = vmul.f32 1.442695, %v2019_v38  ;;  %v7912_v54 = vpop.permute.xlu1 %7911 }
 0x9d1   :  { %v2007_v58 = vpop.xlane.xlu0 %2006  ;;  %v7914_v3 = vunpack.i.h.bf16 %v7912_v54  ;;  %v7913_v8 = vunpack.i.l.bf16 %v7912_v54 }
 0x9d2   :  { %8129 = vpow2.f32 %v2029_v26  ;;  %v2021_v48 = vsub.f32 %v9163_v31, %v2007_v58  ;;  %v721_v58 = vsel %vm672_vm4, %v8847_v27, 0.0 }
 0x9d3   :  { %v8124_v24 = vpop.eup %8123  ;;  %8131 = vpow2.f32 %v2035_v61  ;;  %v7494_v34 = vpack.c.bf16 %v7914_v3, %v7913_v8 }
 0x9d4   :  { %v8126_v20 = vpop.eup %8125  ;;  %v2044_v51 = vsel %vm672_vm4, %v8124_v24, 0.0  ;;  %v2033_v52 = vmul.f32 1.442695, %v2021_v48 }
 0x9d5   :  { %6906 = vmatprep.mubr.msk.f32.mxu1 %vm672_vm4, %v8126_v20  ;;  %v7907_v10 = vpop.permute.xlu0 %7906  ;;  %2045 = vadd.xlane.f32.xlu0 %v2044_v51  ;;  %v2041_v21 = vsel %vm672_vm4, %v8126_v20, 0.0 }
 0x9d6   :  { %v7909_v5 = vunpack.i.h.bf16 %v7907_v10  ;;  %v7908_v47 = vunpack.i.l.bf16 %v7907_v10  ;;  %8133 = vpow2.f32 %v2033_v52  ;;  %v733_v52 = vsel %vm672_vm4, %v8870_v23, 0.0 }
 0x9d8   :  { %v8128_v56 = vpop.eup %8127  ;;  %v7490_v17 = vpack.c.bf16 %v7909_v5, %v7908_v47 }
 0x9d9   :  { %2042 = vadd.xlane.f32.xlu0 %v2041_v21  ;;  %v2050_v31 = vsel %vm672_vm4, %v8128_v56, 0.0  ;;  %v739_v21 = vsel %vm672_vm4, %v8888_v28, 0.0 }
 0x9da   :  { %2051 = vadd.xlane.f32.xlu1 %v2050_v31  ;;  %7491 = vmatprep.subr.bf16.mxu1 %v7490_v17 }
 0x9db   :  { %7493 = vmatpush3.bf16.msra.mxu1 %v7490_v17  ;;  %v736_v17 = vsel %vm672_vm4, %v8874_v41, 0.0 }
 0x9dc   :  { %7495 = vmatprep.subr.bf16.mxu1 %v7494_v34  ;;  %v8130_v57 = vpop.eup %8129 }
 0x9dd   :  { %1158 = vadd.xlane.f32.xlu0 %v1157_v36  ;;  %v8132_v45 = vpop.eup %8131  ;;  %v2047_v63 = vsel %vm672_vm4, %v8130_v57, 0.0 }
 0x9de   :  { %1612 = vadd.xlane.f32.xlu1 %v1611_v40  ;;  %v2056_v38 = vsel %vm672_vm4, %v8132_v45, 0.0 }
 0x9df   :  { %7497 = vmatpush3.bf16.msra.mxu1 %v7494_v34  ;;  %v742_v34 = vsel %vm672_vm4, %v8890_v30, 0.0 }
 0x9e0   :  { %v8134_v61 = vpop.eup %8133 }
 0x9e1   :  { %2048 = vadd.xlane.f32.xlu0 %v2047_v63  ;;  %v2053_v26 = vsel %vm672_vm4, %v8134_v61, 0.0 }
 0x9e2   :  { %2057 = vadd.xlane.f32.xlu1 %v2056_v38  ;;  %6907 = vmatmul.mubr.msk.f32.vlgmr.msra.gmra.mrb[36].mxu1 %vm672_vm4, %v8124_v24 }
 0x9e3   :  { %6909 = vmatprep.mubr.msk.f32.mxu1 %vm672_vm4, %v8130_v57 }
 0x9e5   :  { %1609 = vadd.xlane.f32.xlu0 %v1608_v35 }
 0x9e6   :  { %725 = vadd.xlane.f32.xlu1 %v724_v55  ;;  %6910 = vmatmul.mubr.msk.f32.gmra.mrb[38].mxu1 %vm672_vm4, %v8128_v56  ;;  %v730_v56 = vsel %vm672_vm4, %v8862_v32, 0.0 }
 0x9e7   :  { %6912 = vmatprep.mubr.msk.f32.mxu1 %vm672_vm4, %v8134_v61 }
 0x9e9   :  { %2054 = vadd.xlane.f32.xlu0 %v2053_v26 }
 0x9ea   :  { %6913 = vmatmul.mubr.msk.f32.gmra.mrb[40].mxu1 %vm672_vm4, %v8132_v45 }
 0x9ed   :  { %722 = vadd.xlane.f32.xlu0 %v721_v58 }
 0xa01   :  { %v1144_v31 = vpop.xlane.xlu1 %1143 }
 0xa05   :  { %v1156_v45 = vpop.xlane.xlu1 %1155 }
 0xa06   :  { %v2013_v50 = vpop.xlane.xlu0 %2012 }
 0xa07   :  { %v2023_v24 = vsub.f32 %v9169_v60, %v2013_v50  ;;  %v727_v60 = vsel %vm672_vm4, %v8858_v2, 0.0 }
 0xa09   :  { %v2037_v54 = vmul.f32 1.442695, %v2023_v24 }
 0xa0a   :  { %v2016_v48 = vpop.xlane.xlu0 %2015 }
 0xa0b   :  { %8135 = vpow2.f32 %v2037_v54  ;;  %v2024_v29 = vsub.f32 %v9167_v25, %v2016_v48 }
 0xa0d   :  { %v2039_v20 = vmul.f32 1.442695, %v2024_v29 }
 0xa0e   :  { %v1141_v51 = vpop.xlane.xlu0 %1140 }
 0xa0f   :  { %8137 = vpow2.f32 %v2039_v20 }
 0xa10   :  { %8139 = vrcp.f32 %v1144_v31 }
 0xa11   :  { %8141 = vrcp.f32 %v1141_v51 }
 0xa12   :  { %v1592_v10 = vpop.xlane.xlu0 %1591 }
 0xa13   :  { %8143 = vrcp.f32 %v1592_v10 }
 0xa15   :  { %v8136_v3 = vpop.eup %8135 }
 0xa16   :  { %6915 = vmatprep.mubr.msk.f32.mxu1 %vm672_vm4, %v8136_v3  ;;  %v2059_v8 = vsel %vm672_vm4, %v8136_v3, 0.0  ;;  %v1595_v27 = vpop.xlane.xlu0 %1594 }
 0xa17   :  { %2060 = vadd.xlane.f32.xlu0 %v2059_v8  ;;  %8145 = vrcp.f32 %v1595_v27 }
 0xa19   :  { %v8138_v5 = vpop.eup %8137 }
 0xa1a   :  { %6916 = vmatmul.mubr.msk.f32.gmra.mrb[42].mxu1 %vm672_vm4, %v8138_v5  ;;  %v2062_v47 = vsel %vm672_vm4, %v8138_v5, 0.0  ;;  %v1147_v25 = vpop.xlane.xlu0 %1146  ;;  %v8140_v28 = vpop.eup %8139 }
 0xa1b   :  { %728 = vadd.xlane.f32.xlu0 %v727_v60  ;;  %2063 = vadd.xlane.f32.xlu1 %v2062_v47  ;;  %8147 = vrcp.f32 %v1147_v25  ;;  %v8142_v36 = vpop.eup %8141  ;;  %v1325_v57 = vmul.f32 %v8140_v28, %v9033_v46  ;;  %v2285_v28 = vld [vmem:[%s10648_s7 + $0x10] sm:$0xff] }
 0xa1c   :  { %v1324_v30 = vmul.f32 %v8142_v36, %v9035_v0  ;;  %v2286_v36 = vld [vmem:[%s10648_s7 + $0x18] sm:$0xff] }
 0xa1d   :  { %v8144_v40 = vpop.eup %8143 }
 0xa1e   :  { %v1150_v2 = vpop.xlane.xlu0 %1149  ;;  %v1775_v38 = vmul.f32 %v8144_v40, %v9146_v18 }
 0xa1f   :  { %734 = vadd.xlane.f32.xlu0 %v733_v52  ;;  %731 = vadd.xlane.f32.xlu1 %v730_v56  ;;  %8149 = vrcp.f32 %v1150_v2 }
 0xa21   :  { %v8146_v63 = vpop.eup %8145 }
 0xa22   :  { %v1598_v23 = vpop.xlane.xlu0 %1597  ;;  %v1776_v61 = vmul.f32 %v8146_v63, %v9144_v6 }
 0xa23   :  { %740 = vadd.xlane.f32.xlu0 %v739_v21  ;;  %737 = vadd.xlane.f32.xlu1 %v736_v17  ;;  %8151 = vrcp.f32 %v1598_v23 }
 0xa25   :  { %v8148_v35 = vpop.eup %8147 }
 0xa26   :  { %v1601_v32 = vpop.xlane.xlu0 %1600  ;;  %v1326_v46 = vmul.f32 %v8148_v35, %v9039_v4 }
 0xa27   :  { %743 = vadd.xlane.f32.xlu1 %v742_v34  ;;  %8153 = vrcp.f32 %v1601_v32 }
 0xa29   :  { %v8150_v55 = vpop.eup %8149 }
 0xa2a   :  { %v1153_v41 = vpop.xlane.xlu0 %1152  ;;  %v1327_v26 = vmul.f32 %v8150_v55, %v9037_v62  ;;  %v1607_v62 = vpop.xlane.xlu1 %1606 }
 0xa2b   :  { %8155 = vrcp.f32 %v1153_v41  ;;  %v7502_v41 = vpack.c.bf16 %v2286_v36, %v2285_v28 }
 0xa2c   :  { %8157 = vrcp.f32 %v1156_v45 }
 0xa2d   :  { %v8152_v0 = vpop.eup %8151 }
 0xa2e   :  { %v1777_v18 = vmul.f32 %v8152_v0, %v9150_v7  ;;  %v1604_v48 = vpop.xlane.xlu0 %1603  ;;  %v1162_v7 = vpop.xlane.xlu1 %1161 }
 0xa31   :  { %v8154_v58 = vpop.eup %8153 }
 0xa32   :  { %v1778_v6 = vmul.f32 %v8154_v58, %v9148_v13 }
 0xa35   :  { %v8156_v50 = vpop.eup %8155 }
 0xa36   :  { %v8158_v24 = vpop.eup %8157  ;;  %v1328_v4 = vmul.f32 %v8156_v50, %v9043_v59 }
 0xa37   :  { %v1329_v54 = vmul.f32 %v8158_v24, %v9041_v39 }
 0xa38   :  { %1342 = vrot.lane.b32.xlu1 %v1325_v57, %s8463_s23 }
 0xa39   :  { %1340 = vrot.lane.b32.xlu0 %v1324_v30, %s8463_s23 }
 0xa3c   :  { %1791 = vrot.lane.b32.xlu1 %v1775_v38, %s8464_s4 }
 0xa3d   :  { %1793 = vrot.lane.b32.xlu0 %v1776_v61, %s8464_s4 }
 0xa40   :  { %1344 = vrot.lane.b32.xlu1 %v1326_v46, %s8463_s23 }
 0xa41   :  { %1346 = vrot.lane.b32.xlu0 %v1327_v26, %s8463_s23 }
 0xa44   :  { %1795 = vrot.lane.b32.xlu1 %v1777_v18, %s8464_s4 }
 0xa45   :  { %1797 = vrot.lane.b32.xlu0 %v1778_v6, %s8464_s4 }
 0xa48   :  { %1348 = vrot.lane.b32.xlu1 %v1328_v4, %s8463_s23 }
 0xa49   :  { %1350 = vrot.lane.b32.xlu0 %v1329_v54, %s8463_s23 }
 0xa62   :  { %v2046_v29 = vpop.xlane.xlu0 %2045 }
 0xa66   :  { %v2043_v20 = vpop.xlane.xlu0 %2042 }
 0xa67   :  { %v2052_v51 = vpop.xlane.xlu1 %2051 }
 0xa6a   :  { %v1159_v13 = vpop.xlane.xlu0 %1158 }
 0xa6b   :  { %v9268_v10 = vpop.xlane.xlu1 %1612 }
 0xa6e   :  { %v2049_v3 = vpop.xlane.xlu0 %2048 }
 0xa6f   :  { %v9270_v8 = vpop.xlane.xlu1 %2057 }
 0xa72   :  { %v9272_v27 = vpop.xlane.xlu0 %1609 }
 0xa73   :  { %v726_v59 = vpop.xlane.xlu1 %725 }
 0xa74   :  { %8159 = vrcp.f32 %v726_v59 }
 0xa76   :  { %v9274_v39 = vpop.xlane.xlu0 %2054 }
 0xa7a   :  { %v723_v5 = vpop.xlane.xlu0 %722 }
 0xa7b   :  { %8161 = vrcp.f32 %v723_v5 }
 0xa7c   :  { %8163 = vrcp.f32 %v1607_v62 }
 0xa7e   :  { %v8160_v60 = vpop.eup %8159 }
 0xa7f   :  { %v907_v47 = vmul.f32 %v8160_v60, %v8909_v43  ;;  %v2283_v43 = vld [vmem:[%s10648_s7] sm:$0xff] }
 0xa81   :  { %915 = vst.msk [vmem:[#allocation2 + $0x8] sm:$0xff] %vm534_vm2, %v907_v47 }
 0xa85   :  { %v8162_v25 = vpop.eup %8161 }
 0xa86   :  { %v906_v52 = vmul.f32 %v8162_v25, %v8911_v9  ;;  %v2284_v9 = vld [vmem:[%s10648_s7 + $0x8] sm:$0xff]  ;;  %v8164_v57 = vpop.eup %8163 }
 0xa87   :  { %v7498_v34 = vpack.c.bf16 %v2284_v9, %v2283_v43 }
 0xa88   :  { %914 = vst.msk [vmem:[#allocation2] sm:$0xff] %vm534_vm2, %v906_v52 }
 0xa89   :  { %7499 = vmatprep.subr.bf16.mxu1 %v7498_v34 }
 0xa8a   :  { %7501 = vmatpush3.bf16.msra.mxu1 %v7498_v34 }
 0xa8b   :  { %7503 = vmatprep.subr.bf16.mxu1 %v7502_v41 }
 0xa8e   :  { %7505 = vmatpush3.bf16.msra.mxu1 %v7502_v41 }
 0xaa4   :  { %v9280_v56 = vpop.xlane.xlu0 %2060 }
 0xaa8   :  { %v729_v21 = vpop.xlane.xlu0 %728  ;;  %v9282_v17 = vpop.xlane.xlu1 %2063 }
 0xaa9   :  { %8165 = vrcp.f32 %v729_v21 }
 0xaaa   :  { %8167 = vrcp.f32 %v1604_v48  ;;  %v1780_v48 = vmul.f32 %v8164_v57, %v9152_v33 }
 0xaab   :  { %8169 = vrcp.f32 %v2046_v29 }
 0xaac   :  { %8171 = vrcp.f32 %v2043_v20  ;;  %v735_v2 = vpop.xlane.xlu0 %734  ;;  %v732_v31 = vpop.xlane.xlu1 %731 }
 0xaad   :  { %8173 = vrcp.f32 %v735_v2 }
 0xaae   :  { %8175 = vrcp.f32 %v732_v31 }
 0xaaf   :  { %8177 = vrcp.f32 %v1162_v7 }
 0xab0   :  { %v741_v23 = vpop.xlane.xlu0 %740  ;;  %v738_v32 = vpop.xlane.xlu1 %737 }
 0xab1   :  { %8179 = vrcp.f32 %v741_v23 }
 0xab2   :  { %8181 = vrcp.f32 %v738_v32 }
 0xab3   :  { %v8166_v40 = vpop.eup %8165  ;;  %8183 = vrcp.f32 %v2052_v51 }
 0xab4   :  { %v8168_v45 = vpop.eup %8167  ;;  %8185 = vrcp.f32 %v2049_v3  ;;  %v1341_v30 = vpop.permute.xlu0 %1340  ;;  %v908_v38 = vmul.f32 %v8166_v40, %v8915_v14 }
 0xab5   :  { %v744_v63 = vpop.xlane.xlu1 %743  ;;  %v8170_v35 = vpop.eup %8169  ;;  %1365 = vst.msk [vmem:[#allocation2] sm:$0xff] %vm1364_vm5, %v1341_v30 }
 0xab6   :  { %8187 = vrcp.f32 %v744_v63  ;;  %v6908_v61 = vpop.f32.mrb[36].mxu1  ;;  %v8172_v55 = vpop.eup %8171  ;;  %916 = vst.msk [vmem:[#allocation2 + $0x10] sm:$0xff] %vm534_vm2, %v908_v38 }
 0xab7   :  { %8189 = vrcp.f32 %v1159_v13  ;;  %v2227_v46 = vmul.f32 %v8170_v35, %v6908_v61  ;;  %v2187_v0 = vpop.f32.mrb[37].mxu1  ;;  %v8174_v26 = vpop.eup %8173 }
 0xab8   :  { %v2226_v58 = vmul.f32 %v8172_v55, %v2187_v0  ;;  %v8176_v18 = vpop.eup %8175  ;;  %v1794_v50 = vpop.permute.xlu0 %1793  ;;  %v910_v14 = vmul.f32 %v8174_v26, %v8919_v16  ;;  %8191 = vrcp.f32 %v9270_v8  ;;  %v1779_v16 = vmul.f32 %v8168_v45, %v9154_v12 }
 0xab9   :  { %v1343_v6 = vpop.permute.xlu1 %1342  ;;  %2244 = vrot.lane.b32.xlu0 %v2227_v46, %s10690_s20  ;;  %v6911_v24 = vpop.f32.mrb[38].mxu1  ;;  %v909_v4 = vmul.f32 %v8176_v18, %v8913_v11  ;;  %8193 = vrcp.f32 %v9274_v39 }
 0xaba   :  { %1366 = vst.msk [vmem:[#allocation2 + $0x8] sm:$0xff] %vm1364_vm5, %v1343_v6  ;;  %2242 = vrot.lane.b32.xlu1 %v2226_v58, %s10690_s20  ;;  %v8178_v54 = vpop.eup %8177  ;;  %v2197_v62 = vpop.f32.mrb[39].mxu1  ;;  %8195 = vrcp.f32 %v9268_v10 }
 0xabb   :  { %1817 = vst.msk [vmem:[#allocation2 + $0x8] sm:$0xff] %vm1815_vm6, %v1794_v50  ;;  %v8180_v29 = vpop.eup %8179  ;;  %8197 = vrcp.f32 %v9272_v27 }
 0xabc   :  { %918 = vst.msk [vmem:[#allocation2 + $0x20] sm:$0xff] %vm534_vm2, %v910_v14  ;;  %917 = vst.msk [vmem:[#allocation2 + $0x18] sm:$0xff] %vm534_vm2, %v909_v4  ;;  %v8182_v7 = vpop.eup %8181  ;;  %v1347_v20 = vpop.permute.xlu0 %1346  ;;  %v912_v51 = vmul.f32 %v8180_v29, %v8923_v22  ;;  %8199 = vrcp.f32 %v9282_v17 }
 0xabd   :  { %v1792_v11 = vpop.permute.xlu1 %1791  ;;  %1801 = vrot.lane.b32.xlu0 %v1780_v48, %s8464_s4  ;;  %v8184_v13 = vpop.eup %8183  ;;  %1368 = vst.msk [vmem:[#allocation2 + $0x18] sm:$0xff] %vm1364_vm5, %v1347_v20  ;;  %v911_v12 = vmul.f32 %v8182_v7, %v8917_v53  ;;  %v1331_v53 = vmul.f32 %v8178_v54, %v9045_v49  ;;  %8201 = vrcp.f32 %v9280_v56  ;;  %v6040_v54 = vld [vmem:[%s10649_s8] ss:$0 sm:$0xff]  ;;  %v10716_v7 = vmax.f32 %v8651_v42, 0.0 }
 0xabe   :  { %1816 = vst.msk [vmem:[#allocation2] sm:$0xff] %vm1815_vm6, %v1792_v11  ;;  %1799 = vrot.lane.b32.xlu1 %v1779_v16, %s8464_s4  ;;  %v6914_v33 = vpop.f32.mrb[40].mxu1  ;;  %v8186_v3 = vpop.eup %8185  ;;  %v2229_v8 = vmul.f32 %v8184_v13, %v6911_v24  ;;  %v10717_v11 = vmax.f32 %v8653_v44, 0.0 }
 0xabf   :  { %v2207_v59 = vpop.f32.mrb[41].mxu1  ;;  %920 = vst.msk [vmem:[#allocation2 + $0x30] sm:$0xff] %vm534_vm2, %v912_v51  ;;  %v2228_v39 = vmul.f32 %v8186_v3, %v2197_v62  ;;  %919 = vst.msk [vmem:[#allocation2 + $0x28] sm:$0xff] %vm534_vm2, %v911_v12 }
 0xac0   :  { %v8188_v22 = vpop.eup %8187  ;;  %v1798_v5 = vpop.permute.xlu0 %1797 }
 0xac1   :  { %v8190_v10 = vpop.eup %8189  ;;  %v1345_v60 = vpop.permute.xlu1 %1344  ;;  %2248 = vrot.lane.b32.xlu0 %v2229_v8, %s10690_s20  ;;  %v913_v47 = vmul.f32 %v8188_v22, %v8921_v19  ;;  %1819 = vst.msk [vmem:[#allocation2 + $0x18] sm:$0xff] %vm1815_vm6, %v1798_v5  ;;  %v10718_v22 = vld [vmem:[#allocation6_spill] sm:$0xff]  ;;  %v10720_v5 = vld [vmem:[#allocation7_spill] sm:$0xff] }
 0xac2   :  { %1367 = vst.msk [vmem:[#allocation2 + $0x10] sm:$0xff] %vm1364_vm5, %v1345_v60  ;;  %2246 = vrot.lane.b32.xlu1 %v2228_v39, %s10690_s20  ;;  %v1330_v27 = vmul.f32 %v8190_v10, %v9047_v1  ;;  %v8192_v21 = vpop.eup %8191  ;;  %v10719_v39 = vmax.f32 %v10718_v22, 0.0  ;;  %v10721_v60 = vmax.f32 %v10720_v5, 0.0 }
 0xac3   :  { %921 = vst.msk [vmem:[#allocation2 + $0x38] sm:$0xff] %vm534_vm2, %v913_v47  ;;  %v8194_v19 = vpop.eup %8193  ;;  %v2231_v2 = vmul.f32 %v8192_v21, %v6914_v33  ;;  %v10722_v21 = vld [vmem:[#allocation8_spill] sm:$0xff] }
 0xac4   :  { %v1351_v25 = vpop.permute.xlu0 %1350  ;;  %v8196_v31 = vpop.eup %8195  ;;  %v2230_v43 = vmul.f32 %v8194_v19, %v2207_v59  ;;  %v10723_v19 = vmax.f32 %v10722_v21, 0.0 }
 0xac5   :  { %v1796_v52 = vpop.permute.xlu1 %1795  ;;  %1354 = vrot.lane.b32.xlu0 %v1331_v53, %s8463_s23  ;;  %1370 = vst.msk [vmem:[#allocation2 + $0x28] sm:$0xff] %vm1364_vm5, %v1351_v25  ;;  %v8198_v49 = vpop.eup %8197  ;;  %v1782_v1 = vmul.f32 %v8196_v31, %v9156_v15  ;;  %v10724_v31 = vld [vmem:[#allocation9_spill] sm:$0xff] }
 0xac6   :  { %1818 = vst.msk [vmem:[#allocation2 + $0x10] sm:$0xff] %vm1815_vm6, %v1796_v52  ;;  %1352 = vrot.lane.b32.xlu1 %v1330_v27, %s8463_s23  ;;  %v1781_v34 = vmul.f32 %v8198_v49, %v9158_v37  ;;  %v8200_v23 = vpop.eup %8199 }
 0xac7   :  { %v8202_v28 = vpop.eup %8201 }
 0xac9   :  { %v1349_v9 = vpop.permute.xlu1 %1348  ;;  %2252 = vrot.lane.b32.xlu0 %v2231_v2, %s10690_s20 }
 0xaca   :  { %1369 = vst.msk [vmem:[#allocation2 + $0x20] sm:$0xff] %vm1364_vm5, %v1349_v9  ;;  %2250 = vrot.lane.b32.xlu1 %v2230_v43, %s10690_s20  ;;  %v10725_v43 = vmax.f32 %v10724_v31, 0.0 }
 0xacd   :  { %1805 = vrot.lane.b32.xlu0 %v1782_v1, %s8464_s4 }
 0xace   :  { %1803 = vrot.lane.b32.xlu1 %v1781_v34, %s8464_s4 }
 0xaed   :  { %v6917_v32 = vpop.f32.mrb[42].mxu1 }
 0xaee   :  { %v2233_v36 = vmul.f32 %v8200_v23, %v6917_v32  ;;  %v2217_v41 = vpop.f32.mrb[43].mxu1 }
 0xaef   :  { %v2232_v57 = vmul.f32 %v8202_v28, %v2217_v41 }
 0xaf0   :  { %2256 = vrot.lane.b32.xlu0 %v2233_v36, %s10690_s20  ;;  %v10726_v36 = vld [vmem:[#allocation10_spill] sm:$0xff] }
 0xaf1   :  { %2254 = vrot.lane.b32.xlu1 %v2232_v57, %s10690_s20  ;;  %v10727_v41 = vmax.f32 %v10726_v36, 0.0 }
 0xb2b   :  { %v2245_v15 = vpop.permute.xlu0 %2244 }
 0xb2c   :  { %2268 = vst.msk [vmem:[#allocation2 + $0x8] sm:$0xff] %vm2266_vm7, %v2245_v15  ;;  %v2243_v37 = vpop.permute.xlu1 %2242  ;;  %v10728_v15 = vld [vmem:[#allocation11_spill] sm:$0xff] }
 0xb2d   :  { %2267 = vst.msk [vmem:[#allocation2] sm:$0xff] %vm2266_vm7, %v2243_v37  ;;  %v10729_v37 = vmax.f32 %v10728_v15, 0.0  ;;  %v6049_v15 = vld [vmem:[%s10650_s9] ss:$0 sm:$0xff] }
 0xb2f   :  { %v1802_v17 = vpop.permute.xlu0 %1801 }
 0xb30   :  { %1821 = vst.msk [vmem:[#allocation2 + $0x28] sm:$0xff] %vm1815_vm6, %v1802_v17  ;;  %v1800_v56 = vpop.permute.xlu1 %1799 }
 0xb31   :  { %1820 = vst.msk [vmem:[#allocation2 + $0x20] sm:$0xff] %vm1815_vm6, %v1800_v56 }
 0xb33   :  { %v2249_v40 = vpop.permute.xlu0 %2248  ;;  %v2276_v63 = vld [vmem:[#allocation2 + $0x8] sm:$0xff] }
 0xb34   :  { %2270 = vst.msk [vmem:[#allocation2 + $0x18] sm:$0xff] %vm2266_vm7, %v2249_v40  ;;  %v2247_v45 = vpop.permute.xlu1 %2246  ;;  %v2275_v30 = vld [vmem:[#allocation2] sm:$0xff] }
 0xb35   :  { %2269 = vst.msk [vmem:[#allocation2 + $0x10] sm:$0xff] %vm2266_vm7, %v2247_v45  ;;  %6926 = vmatprep.mubr.msk.f32.mxu1 %vm232_vm1, %v2275_v30 }
 0xb36   :  { %6927 = vmatmul.mubr.msk.f32.vlgmr.msra.gmra.mrb[44].mxu1 %vm232_vm1, %v2276_v63 }
 0xb37   :  { %v1355_v38 = vpop.permute.xlu0 %1354 }
 0xb38   :  { %1372 = vst.msk [vmem:[#allocation2 + $0x38] sm:$0xff] %vm1364_vm5, %v1355_v38  ;;  %v1353_v35 = vpop.permute.xlu1 %1352 }
 0xb39   :  { %1371 = vst.msk [vmem:[#allocation2 + $0x30] sm:$0xff] %vm1364_vm5, %v1353_v35 }
 0xb3b   :  { %v2253_v61 = vpop.permute.xlu0 %2252  ;;  %v2278_v0 = vld [vmem:[#allocation2 + $0x18] sm:$0xff] }
 0xb3c   :  { %2272 = vst.msk [vmem:[#allocation2 + $0x28] sm:$0xff] %vm2266_vm7, %v2253_v61  ;;  %v2251_v55 = vpop.permute.xlu1 %2250  ;;  %v2277_v46 = vld [vmem:[#allocation2 + $0x10] sm:$0xff] }
 0xb3d   :  { %2271 = vst.msk [vmem:[#allocation2 + $0x20] sm:$0xff] %vm2266_vm7, %v2251_v55  ;;  %6929 = vmatprep.mubr.msk.f32.mxu1 %vm232_vm1, %v2277_v46 }
 0xb3e   :  { %6930 = vmatmul.mubr.msk.f32.gmra.mrb[46].mxu1 %vm232_vm1, %v2278_v0 }
 0xb3f   :  { %v1806_v26 = vpop.permute.xlu0 %1805 }
 0xb40   :  { %1823 = vst.msk [vmem:[#allocation2 + $0x38] sm:$0xff] %vm1815_vm6, %v1806_v26  ;;  %v1804_v58 = vpop.permute.xlu1 %1803 }
 0xb41   :  { %1822 = vst.msk [vmem:[#allocation2 + $0x30] sm:$0xff] %vm1815_vm6, %v1804_v58 }
 0xb43   :  { %v2280_v50 = vld [vmem:[#allocation2 + $0x28] sm:$0xff] }
 0xb44   :  { %v2279_v18 = vld [vmem:[#allocation2 + $0x20] sm:$0xff] }
 0xb45   :  { %6932 = vmatprep.mubr.msk.f32.mxu1 %vm232_vm1, %v2279_v18 }
 0xb46   :  { %6933 = vmatmul.mubr.msk.f32.gmra.mrb[48].mxu1 %vm232_vm1, %v2280_v50 }
 0xb62   :  { %v2257_v6 = vpop.permute.xlu0 %2256 }
 0xb63   :  { %2274 = vst.msk [vmem:[#allocation2 + $0x38] sm:$0xff] %vm2266_vm7, %v2257_v6  ;;  %v2255_v14 = vpop.permute.xlu1 %2254 }
 0xb64   :  { %2273 = vst.msk [vmem:[#allocation2 + $0x30] sm:$0xff] %vm2266_vm7, %v2255_v14 }
 0xb6a   :  { %v2282_v4 = vld [vmem:[#allocation2 + $0x38] sm:$0xff] }
 0xb6b   :  { %v2281_v24 = vld [vmem:[#allocation2 + $0x30] sm:$0xff] }
 0xb6c   :  { %6935 = vmatprep.mubr.msk.f32.mxu1 %vm232_vm1, %v2281_v24 }
 0xb6d   :  { %6936 = vmatmul.mubr.msk.f32.gmra.mrb[50].mxu1 %vm232_vm1, %v2282_v4 }
 0xc09   :  { %v6928_v62 = vpop.f32.mrb[44].mxu1 }
 0xc0a   :  { %v2390_v48 = vadd.f32 %v6928_v62, %v6040_v54  ;;  %v2384_v29 = vpop.f32.mrb[45].mxu1 }
 0xc0b   :  { %v2385_v16 = vadd.f32 %v6040_v54, %v2384_v29 }
 0xc0c   :  { %v2424_v20 = vadd.f32 %v2390_v48, %v10716_v7 }
 0xc0d   :  { %v2423_v51 = vadd.f32 %v2385_v16, %v10717_v11 }
 0xc0e   :  { %v2436_v13 = vsel %vm232_vm1, %v2424_v20, 0.0 }
 0xc0f   :  { %2437 = vadd.xlane.f32.xlu0 %v2436_v13  ;;  %v2433_v33 = vsel %vm232_vm1, %v2423_v51, 0.0 }
 0xc10   :  { %2434 = vadd.xlane.f32.xlu1 %v2433_v33 }
 0xc11   :  { %v6931_v12 = vpop.f32.mrb[46].mxu1 }
 0xc12   :  { %v2400_v3 = vadd.f32 %v6931_v12, %v6040_v54  ;;  %v2394_v8 = vpop.f32.mrb[47].mxu1 }
 0xc13   :  { %v2395_v59 = vadd.f32 %v6040_v54, %v2394_v8  ;;  %v2566_v8 = vld [vmem:[%s10652_s11] sm:$0xff] }
 0xc14   :  { %v2426_v10 = vadd.f32 %v2400_v3, %v10719_v39  ;;  %v2568_v39 = vld [vmem:[%s10652_s11 + $0x10] sm:$0xff] }
 0xc15   :  { %v2425_v42 = vadd.f32 %v2395_v59, %v10721_v60  ;;  %v2567_v59 = vld [vmem:[%s10652_s11 + $0x8] sm:$0xff] }
 0xc16   :  { %v2442_v47 = vsel %vm232_vm1, %v2426_v10, 0.0  ;;  %v7506_v22 = vpack.c.bf16 %v2567_v59, %v2566_v8 }
 0xc17   :  { %2443 = vadd.xlane.f32.xlu1 %v2442_v47  ;;  %v2439_v44 = vsel %vm232_vm1, %v2425_v42, 0.0 }
 0xc18   :  { %2440 = vadd.xlane.f32.xlu0 %v2439_v44  ;;  %7507 = vmatprep.subr.bf16.mxu0 %v7506_v22 }
 0xc19   :  { %v6934_v53 = vpop.f32.mrb[48].mxu1  ;;  %7509 = vmatpush3.bf16.msra.mxu0 %v7506_v22 }
 0xc1a   :  { %v2410_v27 = vadd.f32 %v6934_v53, %v6040_v54  ;;  %v2404_v25 = vpop.f32.mrb[49].mxu1 }
 0xc1b   :  { %v2405_v52 = vadd.f32 %v6040_v54, %v2404_v25 }
 0xc1c   :  { %v2428_v2 = vadd.f32 %v2410_v27, %v10723_v19 }
 0xc1d   :  { %v2427_v49 = vadd.f32 %v2405_v52, %v10725_v43 }
 0xc1e   :  { %v2448_v9 = vsel %vm232_vm1, %v2428_v2, 0.0 }
 0xc1f   :  { %2449 = vadd.xlane.f32.xlu1 %v2448_v9  ;;  %v2445_v1 = vsel %vm232_vm1, %v2427_v49, 0.0 }
 0xc20   :  { %2446 = vadd.xlane.f32.xlu0 %v2445_v1 }
 0xc40   :  { %v6937_v34 = vpop.f32.mrb[50].mxu1 }
 0xc41   :  { %v2420_v23 = vadd.f32 %v6937_v34, %v6040_v54  ;;  %v2414_v32 = vpop.f32.mrb[51].mxu1 }
 0xc42   :  { %v2415_v28 = vadd.f32 %v6040_v54, %v2414_v32 }
 0xc43   :  { %v2430_v57 = vadd.f32 %v2420_v23, %v10727_v41 }
 0xc44   :  { %v2429_v17 = vadd.f32 %v2415_v28, %v10729_v37 }
 0xc45   :  { %v2454_v56 = vsel %vm232_vm1, %v2430_v57, 0.0 }
 0xc46   :  { %2455 = vadd.xlane.f32.xlu1 %v2454_v56  ;;  %v2451_v40 = vsel %vm232_vm1, %v2429_v17, 0.0 }
 0xc47   :  { %2452 = vadd.xlane.f32.xlu0 %v2451_v40 }
 0xc9c   :  { %v2438_v45 = vpop.xlane.xlu0 %2437 }
 0xc9d   :  { %v2459_v30 = vmul.f32 0.03125, %v2438_v45  ;;  %v2435_v63 = vpop.xlane.xlu1 %2434 }
 0xc9e   :  { %v2458_v38 = vmul.f32 0.03125, %v2435_v63 }
 0xc9f   :  { %v9393_v35 = vsub.f32 %v2424_v20, %v2459_v30 }
 0xca0   :  { %v9395_v61 = vsub.f32 %v2423_v51, %v2458_v38 }
 0xca1   :  { %v2475_v55 = vmul.f32 %v9393_v35, %v9393_v35 }
 0xca2   :  { %v2474_v46 = vmul.f32 %v9395_v61, %v9395_v61 }
 0xca3   :  { %v2485_v0 = vsel %vm232_vm1, %v2475_v55, 0.0  ;;  %v6050_v55 = vld [vmem:[%s10651_s10] ss:$0 sm:$0xff] }
 0xca4   :  { %2486 = vadd.xlane.f32.xlu1 %v2485_v0  ;;  %v2444_v26 = vpop.xlane.xlu1 %2443  ;;  %v2482_v58 = vsel %vm232_vm1, %v2474_v46, 0.0 }
 0xca5   :  { %v2461_v18 = vmul.f32 0.03125, %v2444_v26  ;;  %v2441_v50 = vpop.xlane.xlu0 %2440  ;;  %2483 = vadd.xlane.f32.xlu0 %v2482_v58 }
 0xca6   :  { %v2460_v6 = vmul.f32 0.03125, %v2441_v50 }
 0xca7   :  { %v9403_v14 = vsub.f32 %v2426_v10, %v2461_v18  ;;  %v2569_v10 = vld [vmem:[%s10652_s11 + $0x18] sm:$0xff] }
 0xca8   :  { %v9405_v24 = vsub.f32 %v2425_v42, %v2460_v6  ;;  %v7510_v5 = vpack.c.bf16 %v2569_v10, %v2568_v39 }
 0xca9   :  { %v2477_v4 = vmul.f32 %v9403_v14, %v9403_v14 }
 0xcaa   :  { %v2476_v54 = vmul.f32 %v9405_v24, %v9405_v24  ;;  %7511 = vmatprep.subr.bf16.mxu0 %v7510_v5 }
 0xcab   :  { %v2491_v62 = vsel %vm232_vm1, %v2477_v4, 0.0  ;;  %7513 = vmatpush3.bf16.msra.mxu0 %v7510_v5 }
 0xcac   :  { %2492 = vadd.xlane.f32.xlu1 %v2491_v62  ;;  %v2450_v48 = vpop.xlane.xlu1 %2449  ;;  %v2488_v29 = vsel %vm232_vm1, %v2476_v54, 0.0 }
 0xcad   :  { %v2463_v16 = vmul.f32 0.03125, %v2450_v48  ;;  %v2447_v7 = vpop.xlane.xlu0 %2446  ;;  %2489 = vadd.xlane.f32.xlu0 %v2488_v29 }
 0xcae   :  { %v2462_v20 = vmul.f32 0.03125, %v2447_v7 }
 0xcaf   :  { %v9413_v11 = vsub.f32 %v2428_v2, %v2463_v16 }
 0xcb0   :  { %v9415_v51 = vsub.f32 %v2427_v49, %v2462_v20 }
 0xcb1   :  { %v2479_v13 = vmul.f32 %v9413_v11, %v9413_v11 }
 0xcb2   :  { %v2478_v33 = vmul.f32 %v9415_v51, %v9415_v51 }
 0xcb3   :  { %v2497_v12 = vsel %vm232_vm1, %v2479_v13, 0.0 }
 0xcb4   :  { %2498 = vadd.xlane.f32.xlu1 %v2497_v12  ;;  %v2494_v3 = vsel %vm232_vm1, %v2478_v33, 0.0 }
 0xcb5   :  { %2495 = vadd.xlane.f32.xlu0 %v2494_v3 }
 0xcd3   :  { %v2456_v60 = vpop.xlane.xlu1 %2455 }
 0xcd4   :  { %v2465_v42 = vmul.f32 0.03125, %v2456_v60  ;;  %v2453_v47 = vpop.xlane.xlu0 %2452 }
 0xcd5   :  { %v2464_v44 = vmul.f32 0.03125, %v2453_v47 }
 0xcd6   :  { %v9435_v53 = vsub.f32 %v2430_v57, %v2465_v42 }
 0xcd7   :  { %v9437_v27 = vsub.f32 %v2429_v17, %v2464_v44 }
 0xcd8   :  { %v2481_v25 = vmul.f32 %v9435_v53, %v9435_v53 }
 0xcd9   :  { %v2480_v52 = vmul.f32 %v9437_v27, %v9437_v27 }
 0xcda   :  { %v2503_v21 = vsel %vm232_vm1, %v2481_v25, 0.0  ;;  %v2778_v25 = vld [vmem:[%s10654_s13] sm:$0xff] }
 0xcdb   :  { %2504 = vadd.xlane.f32.xlu1 %v2503_v21  ;;  %v2500_v19 = vsel %vm232_vm1, %v2480_v52, 0.0  ;;  %v2780_v52 = vld [vmem:[%s10654_s13 + $0x10] sm:$0xff]  ;;  %v2781_v21 = vld [vmem:[%s10654_s13 + $0x18] sm:$0xff] }
 0xcdc   :  { %2501 = vadd.xlane.f32.xlu0 %v2500_v19  ;;  %v7518_v19 = vpack.c.bf16 %v2781_v21, %v2780_v52 }
 0xd31   :  { %v2487_v2 = vpop.xlane.xlu1 %2486 }
 0xd32   :  { %v2507_v31 = vmul.f32 0.03125, %v2487_v2  ;;  %v2484_v43 = vpop.xlane.xlu0 %2483  ;;  %v2782_v2 = vld [vmem:[%s10654_s13 + $0x20] sm:$0xff] }
 0xd33   :  { %v2506_v49 = vmul.f32 0.03125, %v2484_v43 }
 0xd34   :  { %v2515_v9 = vadd.f32 1e-12, %v2507_v31  ;;  %v2783_v31 = vld [vmem:[%s10654_s13 + $0x28] sm:$0xff] }
 0xd35   :  { %v2514_v1 = vadd.f32 1e-12, %v2506_v49  ;;  %v7522_v43 = vpack.c.bf16 %v2783_v31, %v2782_v2  ;;  %v2784_v49 = vld [vmem:[%s10654_s13 + $0x30] sm:$0xff] }
 0xd36   :  { %8203 = vrsqrt.f32 %v2515_v9  ;;  %v2785_v9 = vld [vmem:[%s10654_s13 + $0x38] sm:$0xff] }
 0xd37   :  { %8205 = vrsqrt.f32 %v2514_v1  ;;  %v7526_v1 = vpack.c.bf16 %v2785_v9, %v2784_v49 }
 0xd39   :  { %v2493_v34 = vpop.xlane.xlu1 %2492 }
 0xd3a   :  { %v2509_v23 = vmul.f32 0.03125, %v2493_v34  ;;  %v2490_v32 = vpop.xlane.xlu0 %2489  ;;  %v9518_v34 = vld [vmem:[%s10653_s12] ss:$0 sm:$0xff] }
 0xd3b   :  { %v2508_v28 = vmul.f32 0.03125, %v2490_v32 }
 0xd3c   :  { %v2517_v36 = vadd.f32 1e-12, %v2509_v23 }
 0xd3d   :  { %v2516_v41 = vadd.f32 1e-12, %v2508_v28 }
 0xd3e   :  { %8207 = vrsqrt.f32 %v2517_v36 }
 0xd3f   :  { %8209 = vrsqrt.f32 %v2516_v41 }
 0xd40   :  { %v8204_v57 = vpop.eup %8203 }
 0xd41   :  { %v8206_v37 = vpop.eup %8205  ;;  %v2531_v17 = vmul.f32 %v8204_v57, %v9393_v35  ;;  %v2499_v56 = vpop.xlane.xlu1 %2498 }
 0xd42   :  { %v2511_v40 = vmul.f32 0.03125, %v2499_v56  ;;  %v2496_v45 = vpop.xlane.xlu0 %2495  ;;  %v2530_v30 = vmul.f32 %v8206_v37, %v9395_v61 }
 0xd43   :  { %v2545_v63 = vmul.f32 %v6049_v15, %v2531_v17  ;;  %v2510_v38 = vmul.f32 0.03125, %v2496_v45 }
 0xd44   :  { %v2519_v46 = vadd.f32 1e-12, %v2511_v40  ;;  %v2544_v0 = vmul.f32 %v6049_v15, %v2530_v30 }
 0xd45   :  { %v2518_v26 = vadd.f32 1e-12, %v2510_v38  ;;  %v9455_v18 = vadd.f32 %v6050_v55, %v2545_v63 }
 0xd46   :  { %8211 = vrsqrt.f32 %v2519_v46  ;;  %v9453_v58 = vadd.f32 %v6050_v55, %v2544_v0 }
 0xd47   :  { %8213 = vrsqrt.f32 %v2518_v26 }
 0xd48   :  { %v8208_v35 = vpop.eup %8207  ;;  %6946 = vmatprep.mubr.msk.f32.mxu0 %vm232_vm1, %v9453_v58 }
 0xd49   :  { %v8210_v61 = vpop.eup %8209  ;;  %6947 = vmatmul.mubr.msk.f32.vlgmr.msra.gmra.mrb[44].mxu0 %vm232_vm1, %v9455_v18  ;;  %v2533_v50 = vmul.f32 %v8208_v35, %v9403_v14 }
 0xd4a   :  { %v2532_v6 = vmul.f32 %v8210_v61, %v9405_v24 }
 0xd4b   :  { %v2547_v4 = vmul.f32 %v6049_v15, %v2533_v50 }
 0xd4c   :  { %v2546_v54 = vmul.f32 %v6049_v15, %v2532_v6 }
 0xd4d   :  { %v9465_v48 = vadd.f32 %v6050_v55, %v2547_v4 }
 0xd4e   :  { %v9463_v62 = vadd.f32 %v6050_v55, %v2546_v54 }
 0xd50   :  { %v8212_v29 = vpop.eup %8211  ;;  %6949 = vmatprep.mubr.msk.f32.mxu0 %vm232_vm1, %v9463_v62 }
 0xd51   :  { %v8214_v16 = vpop.eup %8213  ;;  %6950 = vmatmul.mubr.msk.f32.gmra.mrb[46].mxu0 %vm232_vm1, %v9465_v48  ;;  %v2535_v7 = vmul.f32 %v8212_v29, %v9413_v11 }
 0xd52   :  { %v2534_v14 = vmul.f32 %v8214_v16, %v9415_v51 }
 0xd53   :  { %v2549_v20 = vmul.f32 %v6049_v15, %v2535_v7 }
 0xd54   :  { %v2548_v24 = vmul.f32 %v6049_v15, %v2534_v14 }
 0xd55   :  { %v9475_v33 = vadd.f32 %v6050_v55, %v2549_v20 }
 0xd56   :  { %v9473_v13 = vadd.f32 %v6050_v55, %v2548_v24 }
 0xd58   :  { %6952 = vmatprep.mubr.msk.f32.mxu0 %vm232_vm1, %v9473_v13 }
 0xd59   :  { %6953 = vmatmul.mubr.msk.f32.gmra.mrb[48].mxu0 %vm232_vm1, %v9475_v33 }
 0xd68   :  { %v2505_v12 = vpop.xlane.xlu1 %2504 }
 0xd69   :  { %v2513_v3 = vmul.f32 0.03125, %v2505_v12  ;;  %v2502_v8 = vpop.xlane.xlu0 %2501 }
 0xd6a   :  { %v2512_v59 = vmul.f32 0.03125, %v2502_v8 }
 0xd6b   :  { %v2521_v22 = vadd.f32 1e-12, %v2513_v3 }
 0xd6c   :  { %v2520_v11 = vadd.f32 1e-12, %v2512_v59 }
 0xd6d   :  { %8215 = vrsqrt.f32 %v2521_v22 }
 0xd6e   :  { %8217 = vrsqrt.f32 %v2520_v11 }
 0xd77   :  { %v8216_v51 = vpop.eup %8215 }
 0xd78   :  { %v8218_v39 = vpop.eup %8217  ;;  %v2537_v10 = vmul.f32 %v8216_v51, %v9435_v53  ;;  %v2779_v53 = vld [vmem:[%s10654_s13 + $0x8] sm:$0xff] }
 0xd79   :  { %v2536_v5 = vmul.f32 %v8218_v39, %v9437_v27  ;;  %v7514_v27 = vpack.c.bf16 %v2779_v53, %v2778_v25 }
 0xd7a   :  { %v2551_v60 = vmul.f32 %v6049_v15, %v2537_v10 }
 0xd7b   :  { %v2550_v42 = vmul.f32 %v6049_v15, %v2536_v5  ;;  %7515 = vmatprep.subr.bf16.mxu1 %v7514_v27 }
 0xd7c   :  { %v9485_v44 = vadd.f32 %v6050_v55, %v2551_v60  ;;  %7517 = vmatpush3.bf16.msra.mxu1 %v7514_v27 }
 0xd7d   :  { %v9483_v47 = vadd.f32 %v6050_v55, %v2550_v42  ;;  %7519 = vmatprep.subr.bf16.mxu1 %v7518_v19 }
 0xd7f   :  { %6955 = vmatprep.mubr.msk.f32.mxu0 %vm232_vm1, %v9483_v47 }
 0xd80   :  { %6956 = vmatmul.mubr.msk.f32.gmra.mrb[50].mxu0 %vm232_vm1, %v9485_v44  ;;  %7521 = vmatpush3.bf16.msra.mxu1 %v7518_v19 }
 0xd81   :  { %7523 = vmatprep.subr.bf16.mxu1 %v7522_v43 }
 0xd84   :  { %7525 = vmatpush3.bf16.msra.mxu1 %v7522_v43 }
 0xd85   :  { %7527 = vmatprep.subr.bf16.mxu1 %v7526_v1 }
 0xd88   :  { %7529 = vmatpush3.bf16.msra.mxu1 %v7526_v1 }
 0xe1c   :  { %v6948_v23 = vpop.f32.mrb[44].mxu0 }
 0xe1d   :  { %v2673_v32 = vadd.f32 %v6948_v23, %v9518_v34  ;;  %v2667_v28 = vpop.f32.mrb[45].mxu0 }
 0xe1e   :  { %v2668_v36 = vadd.f32 %v9518_v34, %v2667_v28 }
 0xe1f   :  { %v2707_v41 = vmul.f32 %v2673_v32, %v2673_v32 }
 0xe20   :  { %v2706_v57 = vmul.f32 %v2668_v36, %v2668_v36 }
 0xe21   :  { %v2715_v15 = vmul.f32 %v2707_v41, %v2673_v32 }
 0xe22   :  { %v2714_v37 = vmul.f32 %v2706_v57, %v2668_v36 }
 0xe23   :  { %v2723_v17 = vmul.f32 0.044715, %v2715_v15 }
 0xe24   :  { %v2722_v56 = vmul.f32 0.044715, %v2714_v37  ;;  %v6951_v40 = vpop.f32.mrb[46].mxu0 }
 0xe25   :  { %v2731_v45 = vadd.f32 %v2723_v17, %v2673_v32  ;;  %v2683_v30 = vadd.f32 %v6951_v40, %v9518_v34  ;;  %v2677_v63 = vpop.f32.mrb[47].mxu0 }
 0xe26   :  { %v2730_v38 = vadd.f32 %v2722_v56, %v2668_v36  ;;  %v2678_v55 = vadd.f32 %v9518_v34, %v2677_v63 }
 0xe27   :  { %v2739_v46 = vmul.f32 0.7978846, %v2731_v45  ;;  %v2709_v0 = vmul.f32 %v2683_v30, %v2683_v30 }
 0xe28   :  { %v2738_v26 = vmul.f32 0.7978846, %v2730_v38  ;;  %v2708_v35 = vmul.f32 %v2678_v55, %v2678_v55 }
 0xe29   :  { %8219 = vtanh.f32 %v2739_v46  ;;  %v2717_v61 = vmul.f32 %v2709_v0, %v2683_v30 }
 0xe2a   :  { %8221 = vtanh.f32 %v2738_v26  ;;  %v2716_v50 = vmul.f32 %v2708_v35, %v2678_v55 }
 0xe2b   :  { %v2725_v6 = vmul.f32 0.044715, %v2717_v61 }
 0xe2c   :  { %v2724_v4 = vmul.f32 0.044715, %v2716_v50  ;;  %v6954_v54 = vpop.f32.mrb[48].mxu0 }
 0xe2d   :  { %v2733_v29 = vadd.f32 %v2725_v6, %v2683_v30  ;;  %v2693_v16 = vadd.f32 %v6954_v54, %v9518_v34  ;;  %v2687_v7 = vpop.f32.mrb[49].mxu0 }
 0xe2e   :  { %v2732_v14 = vadd.f32 %v2724_v4, %v2678_v55  ;;  %v2688_v20 = vadd.f32 %v9518_v34, %v2687_v7 }
 0xe2f   :  { %v2741_v24 = vmul.f32 0.7978846, %v2733_v29  ;;  %v2711_v12 = vmul.f32 %v2693_v16, %v2693_v16 }
 0xe30   :  { %v2740_v3 = vmul.f32 0.7978846, %v2732_v14  ;;  %v2710_v8 = vmul.f32 %v2688_v20, %v2688_v20 }
 0xe31   :  { %8223 = vtanh.f32 %v2741_v24  ;;  %v2719_v59 = vmul.f32 %v2711_v12, %v2693_v16 }
 0xe32   :  { %8225 = vtanh.f32 %v2740_v3  ;;  %v2718_v22 = vmul.f32 %v2710_v8, %v2688_v20  ;;  %v6060_v3 = vld [vmem:[%s10655_s14] ss:$0 sm:$0xff] }
 0xe33   :  { %v8220_v11 = vpop.eup %8219  ;;  %v2727_v51 = vmul.f32 0.044715, %v2719_v59 }
 0xe34   :  { %v8222_v39 = vpop.eup %8221  ;;  %v2755_v10 = vadd.f32 1.0, %v8220_v11  ;;  %v2726_v5 = vmul.f32 0.044715, %v2718_v22 }
 0xe35   :  { %v2735_v60 = vadd.f32 %v2727_v51, %v2693_v16  ;;  %v2754_v42 = vadd.f32 1.0, %v8222_v39 }
 0xe36   :  { %v2763_v25 = vmul.f32 0.5, %v2755_v10  ;;  %v2734_v53 = vadd.f32 %v2726_v5, %v2688_v20 }
 0xe37   :  { %v2743_v27 = vmul.f32 0.7978846, %v2735_v60  ;;  %v2762_v52 = vmul.f32 0.5, %v2754_v42 }
 0xe38   :  { %v2742_v21 = vmul.f32 0.7978846, %v2734_v53  ;;  %v2771_v2 = vmul.f32 %v2763_v25, %v2673_v32 }
 0xe39   :  { %8227 = vtanh.f32 %v2743_v27  ;;  %v2770_v19 = vmul.f32 %v2762_v52, %v2668_v36 }
 0xe3a   :  { %8229 = vtanh.f32 %v2742_v21 }
 0xe3b   :  { %v8224_v31 = vpop.eup %8223  ;;  %6974 = vmatprep.mubr.msk.f32.mxu1 %vm672_vm4, %v2770_v19 }
 0xe3c   :  { %v8226_v43 = vpop.eup %8225  ;;  %6975 = vmatmul.mubr.msk.f32.vlgmr.msra.gmra.mrb[52].mxu1 %vm672_vm4, %v2771_v2  ;;  %v2757_v49 = vadd.f32 1.0, %v8224_v31 }
 0xe3d   :  { %v2756_v9 = vadd.f32 1.0, %v8226_v43 }
 0xe3e   :  { %v2765_v1 = vmul.f32 0.5, %v2757_v49 }
 0xe3f   :  { %v2764_v23 = vmul.f32 0.5, %v2756_v9 }
 0xe40   :  { %v2773_v41 = vmul.f32 %v2765_v1, %v2683_v30 }
 0xe41   :  { %v2772_v28 = vmul.f32 %v2764_v23, %v2678_v55 }
 0xe43   :  { %v8228_v57 = vpop.eup %8227  ;;  %6977 = vmatprep.mubr.msk.f32.mxu1 %vm672_vm4, %v2772_v28 }
 0xe44   :  { %v8230_v15 = vpop.eup %8229  ;;  %6978 = vmatmul.mubr.msk.f32.gmra.mrb[54].mxu1 %vm672_vm4, %v2773_v41  ;;  %v2759_v32 = vadd.f32 1.0, %v8228_v57 }
 0xe45   :  { %v2758_v36 = vadd.f32 1.0, %v8230_v15 }
 0xe46   :  { %v2767_v37 = vmul.f32 0.5, %v2759_v32 }
 0xe47   :  { %v2766_v17 = vmul.f32 0.5, %v2758_v36 }
 0xe48   :  { %v2775_v40 = vmul.f32 %v2767_v37, %v2693_v16 }
 0xe49   :  { %v2774_v56 = vmul.f32 %v2766_v17, %v2688_v20 }
 0xe4b   :  { %6980 = vmatprep.mubr.msk.f32.mxu1 %vm672_vm4, %v2774_v56 }
 0xe4c   :  { %6981 = vmatmul.mubr.msk.f32.gmra.mrb[56].mxu1 %vm672_vm4, %v2775_v40 }
 0xe53   :  { %v6957_v45 = vpop.f32.mrb[50].mxu0 }
 0xe54   :  { %v2703_v63 = vadd.f32 %v6957_v45, %v9518_v34  ;;  %v2697_v30 = vpop.f32.mrb[51].mxu0 }
 0xe55   :  { %v2698_v38 = vadd.f32 %v9518_v34, %v2697_v30 }
 0xe56   :  { %v2713_v55 = vmul.f32 %v2703_v63, %v2703_v63 }
 0xe57   :  { %v2712_v46 = vmul.f32 %v2698_v38, %v2698_v38 }
 0xe58   :  { %v2721_v0 = vmul.f32 %v2713_v55, %v2703_v63 }
 0xe59   :  { %v2720_v26 = vmul.f32 %v2712_v46, %v2698_v38 }
 0xe5a   :  { %v2729_v35 = vmul.f32 0.044715, %v2721_v0 }
 0xe5b   :  { %v2728_v61 = vmul.f32 0.044715, %v2720_v26 }
 0xe5c   :  { %v2737_v50 = vadd.f32 %v2729_v35, %v2703_v63 }
 0xe5d   :  { %v2736_v6 = vadd.f32 %v2728_v61, %v2698_v38 }
 0xe5e   :  { %v2745_v4 = vmul.f32 0.7978846, %v2737_v50 }
 0xe5f   :  { %v2744_v54 = vmul.f32 0.7978846, %v2736_v6 }
 0xe60   :  { %8231 = vtanh.f32 %v2745_v4 }
 0xe61   :  { %8233 = vtanh.f32 %v2744_v54 }
 0xe6a   :  { %v8232_v29 = vpop.eup %8231 }
 0xe6b   :  { %v8234_v16 = vpop.eup %8233  ;;  %v2761_v7 = vadd.f32 1.0, %v8232_v29 }
 0xe6c   :  { %v2760_v14 = vadd.f32 1.0, %v8234_v16 }
 0xe6d   :  { %v2769_v20 = vmul.f32 0.5, %v2761_v7 }
 0xe6e   :  { %v2768_v24 = vmul.f32 0.5, %v2760_v14 }
 0xe6f   :  { %v2777_v34 = vmul.f32 %v2769_v20, %v2703_v63 }
 0xe70   :  { %v2776_v12 = vmul.f32 %v2768_v24, %v2698_v38 }
 0xe72   :  { %6983 = vmatprep.mubr.msk.f32.mxu1 %vm672_vm4, %v2776_v12 }
 0xe73   :  { %6984 = vmatmul.mubr.msk.f32.gmra.mrb[58].mxu1 %vm672_vm4, %v2777_v34  ;;  %v6071_v34 = vld [vmem:[%s10646_s5 + $0x20] sm:$0xff] }
 0xf0f   :  { %v6976_v8 = vpop.f32.mrb[52].mxu1 }
 0xf10   :  { %v2889_v59 = vadd.f32 %v6976_v8, %v6060_v3  ;;  %v2883_v22 = vpop.f32.mrb[53].mxu1 }
 0xf11   :  { %v2884_v11 = vadd.f32 %v6060_v3, %v2883_v22  ;;  %v6074_v22 = vld [vmem:[%s10646_s5 + $0x38] sm:$0xff] }
 0xf12   :  { %v2923_v51 = vadd.f32 %v2889_v59, %v9455_v18  ;;  %v6073_v59 = vld [vmem:[%s10646_s5 + $0x30] sm:$0xff] }
 0xf13   :  { %v2922_v39 = vadd.f32 %v2884_v11, %v9453_v58  ;;  %v7534_v11 = vpack.c.bf16 %v6074_v22, %v6073_v59 }
 0xf14   :  { %v2935_v10 = vsel %vm232_vm1, %v2923_v51, 0.0 }
 0xf15   :  { %2936 = vadd.xlane.f32.xlu1 %v2935_v10  ;;  %v2932_v5 = vsel %vm232_vm1, %v2922_v39, 0.0 }
 0xf16   :  { %2933 = vadd.xlane.f32.xlu0 %v2932_v5 }
 0xf17   :  { %v6979_v60 = vpop.f32.mrb[54].mxu1 }
 0xf18   :  { %v2899_v42 = vadd.f32 %v6979_v60, %v6060_v3  ;;  %v2893_v25 = vpop.f32.mrb[55].mxu1 }
 0xf19   :  { %v2894_v53 = vadd.f32 %v6060_v3, %v2893_v25 }
 0xf1a   :  { %v2925_v27 = vadd.f32 %v2899_v42, %v9465_v48 }
 0xf1b   :  { %v2924_v52 = vadd.f32 %v2894_v53, %v9463_v62 }
 0xf1c   :  { %v2941_v21 = vsel %vm232_vm1, %v2925_v27, 0.0 }
 0xf1d   :  { %2942 = vadd.xlane.f32.xlu1 %v2941_v21  ;;  %v2938_v18 = vsel %vm232_vm1, %v2924_v52, 0.0 }
 0xf1e   :  { %2939 = vadd.xlane.f32.xlu0 %v2938_v18 }
 0xf1f   :  { %v6982_v58 = vpop.f32.mrb[56].mxu1 }
 0xf20   :  { %v2909_v19 = vadd.f32 %v6982_v58, %v6060_v3  ;;  %v2903_v2 = vpop.f32.mrb[57].mxu1 }
 0xf21   :  { %v2904_v31 = vadd.f32 %v6060_v3, %v2903_v2 }
 0xf22   :  { %v2927_v43 = vadd.f32 %v2909_v19, %v9475_v33 }
 0xf23   :  { %v2926_v49 = vadd.f32 %v2904_v31, %v9473_v13 }
 0xf24   :  { %v2947_v9 = vsel %vm232_vm1, %v2927_v43, 0.0 }
 0xf25   :  { %2948 = vadd.xlane.f32.xlu1 %v2947_v9  ;;  %v2944_v48 = vsel %vm232_vm1, %v2926_v49, 0.0 }
 0xf26   :  { %2945 = vadd.xlane.f32.xlu0 %v2944_v48 }
 0xf46   :  { %v6985_v62 = vpop.f32.mrb[58].mxu1 }
 0xf47   :  { %v2919_v1 = vadd.f32 %v6985_v62, %v6060_v3  ;;  %v2913_v23 = vpop.f32.mrb[59].mxu1 }
 0xf48   :  { %v2914_v28 = vadd.f32 %v6060_v3, %v2913_v23  ;;  %v6072_v3 = vld [vmem:[%s10646_s5 + $0x28] sm:$0xff] }
 0xf49   :  { %v2929_v41 = vadd.f32 %v2919_v1, %v9485_v44  ;;  %v7530_v8 = vpack.c.bf16 %v6072_v3, %v6071_v34 }
 0xf4a   :  { %v2928_v57 = vadd.f32 %v2914_v28, %v9483_v47  ;;  %v6069_v28 = vld [vmem:[%s10656_s15] ss:$0 sm:$0xff] }
 0xf4b   :  { %v2953_v15 = vsel %vm232_vm1, %v2929_v41, 0.0  ;;  %7531 = vmatprep.subr.bf16.mxu0 %v7530_v8 }
 0xf4c   :  { %2954 = vadd.xlane.f32.xlu1 %v2953_v15  ;;  %v2950_v33 = vsel %vm232_vm1, %v2928_v57, 0.0  ;;  %7533 = vmatpush3.bf16.msra.mxu0 %v7530_v8 }
 0xf4d   :  { %2951 = vadd.xlane.f32.xlu0 %v2950_v33  ;;  %7535 = vmatprep.subr.bf16.mxu0 %v7534_v11 }
 0xf50   :  { %7537 = vmatpush3.bf16.msra.mxu0 %v7534_v11 }
 0xfa2   :  { %v2937_v13 = vpop.xlane.xlu1 %2936 }
 0xfa3   :  { %v2957_v32 = vmul.f32 0.03125, %v2937_v13  ;;  %v2934_v36 = vpop.xlane.xlu0 %2933 }
 0xfa4   :  { %v2956_v37 = vmul.f32 0.03125, %v2934_v36 }
 0xfa5   :  { %v9555_v17 = vsub.f32 %v2923_v51, %v2957_v32 }
 0xfa6   :  { %v9557_v56 = vsub.f32 %v2922_v39, %v2956_v37 }
 0xfa7   :  { %v2973_v40 = vmul.f32 %v9555_v17, %v9555_v17 }
 0xfa8   :  { %v2972_v47 = vmul.f32 %v9557_v56, %v9557_v56 }
 0xfa9   :  { %v2983_v44 = vsel %vm232_vm1, %v2973_v40, 0.0  ;;  %v6070_v40 = vld [vmem:[%s10657_s16] ss:$0 sm:$0xff] }
 0xfaa   :  { %2984 = vadd.xlane.f32.xlu1 %v2983_v44  ;;  %v2943_v45 = vpop.xlane.xlu1 %2942  ;;  %v2980_v63 = vsel %vm232_vm1, %v2972_v47, 0.0 }
 0xfab   :  { %v2959_v30 = vmul.f32 0.03125, %v2943_v45  ;;  %v2940_v38 = vpop.xlane.xlu0 %2939  ;;  %2981 = vadd.xlane.f32.xlu0 %v2980_v63 }
 0xfac   :  { %v2958_v55 = vmul.f32 0.03125, %v2940_v38 }
 0xfad   :  { %v9565_v46 = vsub.f32 %v2925_v27, %v2959_v30 }
 0xfae   :  { %v9567_v0 = vsub.f32 %v2924_v52, %v2958_v55 }
 0xfaf   :  { %v2975_v26 = vmul.f32 %v9565_v46, %v9565_v46 }
 0xfb0   :  { %v2974_v35 = vmul.f32 %v9567_v0, %v9567_v0 }
 0xfb1   :  { %v2989_v61 = vsel %vm232_vm1, %v2975_v26, 0.0 }
 0xfb2   :  { %2990 = vadd.xlane.f32.xlu1 %v2989_v61  ;;  %v2949_v50 = vpop.xlane.xlu1 %2948  ;;  %v2986_v6 = vsel %vm232_vm1, %v2974_v35, 0.0 }
 0xfb3   :  { %v2961_v4 = vmul.f32 0.03125, %v2949_v50  ;;  %v2946_v54 = vpop.xlane.xlu0 %2945  ;;  %2987 = vadd.xlane.f32.xlu0 %v2986_v6 }
 0xfb4   :  { %v2960_v29 = vmul.f32 0.03125, %v2946_v54 }
 0xfb5   :  { %v9575_v16 = vsub.f32 %v2927_v43, %v2961_v4 }
 0xfb6   :  { %v9577_v7 = vsub.f32 %v2926_v49, %v2960_v29 }
 0xfb7   :  { %v2977_v14 = vmul.f32 %v9575_v16, %v9575_v16 }
 0xfb8   :  { %v2976_v20 = vmul.f32 %v9577_v7, %v9577_v7 }
 0xfb9   :  { %v2995_v24 = vsel %vm232_vm1, %v2977_v14, 0.0 }
 0xfba   :  { %2996 = vadd.xlane.f32.xlu1 %v2995_v24  ;;  %v2992_v12 = vsel %vm232_vm1, %v2976_v20, 0.0 }
 0xfbb   :  { %2993 = vadd.xlane.f32.xlu0 %v2992_v12 }
 0xfd9   :  { %v2955_v51 = vpop.xlane.xlu1 %2954 }
 0xfda   :  { %v2963_v39 = vmul.f32 0.03125, %v2955_v51  ;;  %v2952_v10 = vpop.xlane.xlu0 %2951 }
 0xfdb   :  { %v2962_v5 = vmul.f32 0.03125, %v2952_v10 }
 0xfdc   :  { %v9597_v60 = vsub.f32 %v2929_v41, %v2963_v39 }
 0xfdd   :  { %v9599_v42 = vsub.f32 %v2928_v57, %v2962_v5 }
 0xfde   :  { %v2979_v25 = vmul.f32 %v9597_v60, %v9597_v60 }
 0xfdf   :  { %v2978_v53 = vmul.f32 %v9599_v42, %v9599_v42 }
 0xfe0   :  { %v3001_v27 = vsel %vm232_vm1, %v2979_v25, 0.0  ;;  %v6076_v25 = vld [vmem:[%s10647_s6 + $0x1] ss:$0 sm:$0xff]  ;;  %s10738_s6 = smov 112  }
 0xfe1   :  { %3002 = vadd.xlane.f32.xlu1 %v3001_v27  ;;  %v2998_v52 = vsel %vm232_vm1, %v2978_v53, 0.0 }
 0xfe2   :  { %2999 = vadd.xlane.f32.xlu0 %v2998_v52 }
0x1037   :  { %v2985_v21 = vpop.xlane.xlu1 %2984 }
0x1038   :  { %v3005_v18 = vmul.f32 0.03125, %v2985_v21  ;;  %v2982_v58 = vpop.xlane.xlu0 %2981 }
0x1039   :  { %v3004_v19 = vmul.f32 0.03125, %v2982_v58 }
0x103a   :  { %v3013_v2 = vadd.f32 1e-12, %v3005_v18 }
0x103b   :  { %v3012_v31 = vadd.f32 1e-12, %v3004_v19 }
0x103c   :  { %8235 = vrsqrt.f32 %v3013_v2 }
0x103d   :  { %8237 = vrsqrt.f32 %v3012_v31 }
0x103f   :  { %v2991_v43 = vpop.xlane.xlu1 %2990 }
0x1040   :  { %v3007_v49 = vmul.f32 0.03125, %v2991_v43  ;;  %v2988_v9 = vpop.xlane.xlu0 %2987 }
0x1041   :  { %v3006_v48 = vmul.f32 0.03125, %v2988_v9 }
0x1042   :  { %v3015_v62 = vadd.f32 1e-12, %v3007_v49 }
0x1043   :  { %v3014_v1 = vadd.f32 1e-12, %v3006_v48 }
0x1044   :  { %8239 = vrsqrt.f32 %v3015_v62 }
0x1045   :  { %8241 = vrsqrt.f32 %v3014_v1 }
0x1046   :  { %v8236_v23 = vpop.eup %8235 }
0x1047   :  { %v8238_v41 = vpop.eup %8237  ;;  %v3029_v57 = vmul.f32 %v8236_v23, %v9555_v17  ;;  %v2997_v15 = vpop.xlane.xlu1 %2996 }
0x1048   :  { %v3009_v33 = vmul.f32 0.03125, %v2997_v15  ;;  %v2994_v13 = vpop.xlane.xlu0 %2993  ;;  %v3028_v32 = vmul.f32 %v8238_v41, %v9557_v56 }
0x1049   :  { %v3043_v36 = vmul.f32 %v6069_v28, %v3029_v57  ;;  %v3008_v37 = vmul.f32 0.03125, %v2994_v13 }
0x104a   :  { %v3017_v47 = vadd.f32 1e-12, %v3009_v33  ;;  %v3042_v44 = vmul.f32 %v6069_v28, %v3028_v32 }
0x104b   :  { %v3016_v45 = vadd.f32 1e-12, %v3008_v37  ;;  %v9617_v30 = vadd.f32 %v6070_v40, %v3043_v36 }
0x104c   :  { %8243 = vrsqrt.f32 %v3017_v47  ;;  %v9615_v63 = vadd.f32 %v6070_v40, %v3042_v44 }
0x104d   :  { %8245 = vrsqrt.f32 %v3016_v45 }
0x104e   :  { %10730 = vst [vmem:[#allocation6_spill] sm:$0xff] %v9615_v63  ;;  %v8240_v17 = vpop.eup %8239  ;;  %6994 = vmatprep.mubr.msk.f32.mxu0 %vm232_vm1, %v9615_v63 }
0x104f   :  { %v8242_v56 = vpop.eup %8241  ;;  %6995 = vmatmul.mubr.msk.f32.vlgmr.msra.gmra.mrb[52].mxu0 %vm232_vm1, %v9617_v30  ;;  %v3031_v38 = vmul.f32 %v8240_v17, %v9565_v46 }
0x1050   :  { %v3030_v55 = vmul.f32 %v8242_v56, %v9567_v0 }
0x1051   :  { %v3045_v26 = vmul.f32 %v6069_v28, %v3031_v38 }
0x1052   :  { %v3044_v35 = vmul.f32 %v6069_v28, %v3030_v55 }
0x1053   :  { %v9627_v50 = vadd.f32 %v6070_v40, %v3045_v26 }
0x1054   :  { %v9625_v61 = vadd.f32 %v6070_v40, %v3044_v35 }
0x1055   :  { %10732 = vst [vmem:[#allocation8_spill] sm:$0xff] %v9627_v50 }
0x1056   :  { %10731 = vst [vmem:[#allocation7_spill] sm:$0xff] %v9625_v61  ;;  %v8244_v6 = vpop.eup %8243  ;;  %6997 = vmatprep.mubr.msk.f32.mxu0 %vm232_vm1, %v9625_v61 }
0x1057   :  { %v8246_v4 = vpop.eup %8245  ;;  %6998 = vmatmul.mubr.msk.f32.gmra.mrb[54].mxu0 %vm232_vm1, %v9627_v50  ;;  %v3033_v54 = vmul.f32 %v8244_v6, %v9575_v16 }
0x1058   :  { %v3032_v46 = vmul.f32 %v8246_v4, %v9577_v7 }
0x1059   :  { %v3047_v29 = vmul.f32 %v6069_v28, %v3033_v54 }
0x105a   :  { %v3046_v0 = vmul.f32 %v6069_v28, %v3032_v46 }
0x105b   :  { %v9637_v20 = vadd.f32 %v6070_v40, %v3047_v29 }
0x105c   :  { %v9635_v14 = vadd.f32 %v6070_v40, %v3046_v0 }
0x105d   :  { %10734 = vst [vmem:[#allocation10_spill] sm:$0xff] %v9637_v20 }
0x105e   :  { %10733 = vst [vmem:[#allocation9_spill] sm:$0xff] %v9635_v14  ;;  %7000 = vmatprep.mubr.msk.f32.mxu0 %vm232_vm1, %v9635_v14 }
0x105f   :  { %7001 = vmatmul.mubr.msk.f32.gmra.mrb[56].mxu0 %vm232_vm1, %v9637_v20 }
0x106e   :  { %v3003_v24 = vpop.xlane.xlu1 %3002 }
0x106f   :  { %v3011_v12 = vmul.f32 0.03125, %v3003_v24  ;;  %v3000_v34 = vpop.xlane.xlu0 %2999 }
0x1070   :  { %v3010_v3 = vmul.f32 0.03125, %v3000_v34 }
0x1071   :  { %v3019_v8 = vadd.f32 1e-12, %v3011_v12 }
0x1072   :  { %v3018_v16 = vadd.f32 1e-12, %v3010_v3 }
0x1073   :  { %8247 = vrsqrt.f32 %v3019_v8 }
0x1074   :  { %8249 = vrsqrt.f32 %v3018_v16 }
0x107d   :  { %v8248_v7 = vpop.eup %8247 }
0x107e   :  { %v8250_v59 = vpop.eup %8249  ;;  %v3035_v22 = vmul.f32 %v8248_v7, %v9597_v60 }
0x107f   :  { %v3034_v11 = vmul.f32 %v8250_v59, %v9599_v42 }
0x1080   :  { %v3049_v51 = vmul.f32 %v6069_v28, %v3035_v22 }
0x1081   :  { %v3048_v39 = vmul.f32 %v6069_v28, %v3034_v11 }
0x1082   :  { %v9647_v5 = vadd.f32 %v6070_v40, %v3049_v51 }
0x1083   :  { %v9645_v10 = vadd.f32 %v6070_v40, %v3048_v39 }
0x1084   :  { %10736 = vst [vmem:[#allocation13_spill] sm:$0xff] %v9647_v5 }
0x1085   :  { %10735 = vst [vmem:[#allocation11_spill] sm:$0xff] %v9645_v10  ;;  %7003 = vmatprep.mubr.msk.f32.mxu0 %vm232_vm1, %v9645_v10 }
0x1086   :  { %7004 = vmatmul.mubr.msk.f32.gmra.mrb[58].mxu0 %vm232_vm1, %v9647_v5 }
0x1122   :  { %v6996_v53 = vpop.f32.mrb[52].mxu0 }
0x1123   :  { %v9656_v60 = vadd.f32 %v6996_v53, %v6076_v25  ;;  %v3167_v42 = vpop.f32.mrb[53].mxu0 }
0x1124   :  { %v9658_v27 = vadd.f32 %v6076_v25, %v3167_v42 }
0x1126   :  { %7022 = vmatprep.mubr.msk.f32.mxu1 %vm534_vm2, %v9658_v27  ;;  %v9664_v52 = vpack.i.bf16 %v9656_v60, %v9658_v27 }
0x1128   :  { %7916 = vrot.lane.b32.xlu0 %v9664_v52, %s8452_s26 }
0x112a   :  { %v6999_v21 = vpop.f32.mrb[54].mxu0 }
0x112b   :  { %v9668_v18 = vadd.f32 %v6999_v21, %v6076_v25  ;;  %v3177_v58 = vpop.f32.mrb[55].mxu0 }
0x112c   :  { %v9670_v19 = vadd.f32 %v6076_v25, %v3177_v58 }
0x112e   :  { %v9674_v2 = vpack.i.bf16 %v9668_v18, %v9670_v19 }
0x1130   :  { %7921 = vrot.lane.b32.xlu1 %v9674_v2, %s8452_s26 }
0x1132   :  { %v7002_v31 = vpop.f32.mrb[56].mxu0 }
0x1133   :  { %v9678_v43 = vadd.f32 %v7002_v31, %v6076_v25  ;;  %v3187_v49 = vpop.f32.mrb[57].mxu0 }
0x1134   :  { %v9680_v9 = vadd.f32 %v6076_v25, %v3187_v49 }
0x1136   :  { %v9684_v48 = vpack.i.bf16 %v9678_v43, %v9680_v9 }
0x1138   :  { %7926 = vrot.lane.b32.xlu1 %v9684_v48, %s8452_s26 }
0x113c   :  { %7941 = vrot.lane.b32.xlu1 %v9674_v2, %s8453_s27 }
0x1140   :  { %7946 = vrot.lane.b32.xlu1 %v9684_v48, %s8453_s27 }
0x1144   :  { %7951 = vrot.lane.b32.xlu1 %v9664_v52, %s8454_s28 }
0x1159   :  { %v7005_v62 = vpop.f32.mrb[58].mxu0 }
0x115a   :  { %v9694_v1 = vadd.f32 %v7005_v62, %v6076_v25  ;;  %v3197_v23 = vpop.f32.mrb[59].mxu0 }
0x115b   :  { %v9696_v28 = vadd.f32 %v6076_v25, %v3197_v23 }
0x115d   :  { %v9700_v41 = vpack.i.bf16 %v9694_v1, %v9696_v28 }
0x115f   :  { %7931 = vrot.lane.b32.xlu0 %v9700_v41, %s8452_s26  ;;  %s10739_s26 = smov 48  }
0x1163   :  { %7936 = vrot.lane.b32.xlu0 %v9664_v52, %s8453_s27 }
0x1167   :  { %7956 = vrot.lane.b32.xlu0 %v9700_v41, %s8453_s27  ;;  %s10740_s27 = smov 72  }
0x119a   :  { %v7917_v57 = vpop.permute.xlu0 %7916 }
0x119b   :  { %v7919_v15 = vunpack.i.h.bf16 %v7917_v57  ;;  %v7918_v33 = vunpack.i.l.bf16 %v7917_v57 }
0x119d   :  { %v7538_v13 = vpack.c.bf16 %v7919_v15, %v7918_v33 }
0x119f   :  { %7540 = vmatprep.subr.msk.bf16.mxu1 %vm8758_vm3, %v7538_v13 }
0x11a0   :  { %7543 = vmatpush3.bf16.xpose.msk.msra.mxu1 %vm8758_vm3, %v7538_v13 }
0x11a2   :  { %v7922_v36 = vpop.permute.xlu1 %7921 }
0x11a3   :  { %v7924_v37 = vunpack.i.h.bf16 %v7922_v36  ;;  %v7923_v40 = vunpack.i.l.bf16 %v7922_v36 }
0x11a5   :  { %v7544_v47 = vpack.c.bf16 %v7924_v37, %v7923_v40 }
0x11a7   :  { %7546 = vmatprep.subr.msk.bf16.mxu1 %vm8758_vm3, %v7544_v47 }
0x11a8   :  { %7549 = vmatpush3.bf16.xpose.msk.msra.mxu1 %vm8758_vm3, %v7544_v47 }
0x11aa   :  { %v7927_v44 = vpop.permute.xlu1 %7926 }
0x11ab   :  { %v7929_v45 = vunpack.i.h.bf16 %v7927_v44  ;;  %v7928_v17 = vunpack.i.l.bf16 %v7927_v44 }
0x11ad   :  { %v7550_v56 = vpack.c.bf16 %v7929_v45, %v7928_v17 }
0x11ae   :  { %v7942_v38 = vpop.permute.xlu1 %7941 }
0x11af   :  { %7552 = vmatprep.subr.msk.bf16.mxu1 %vm8758_vm3, %v7550_v56  ;;  %v7944_v54 = vunpack.i.h.bf16 %v7942_v38  ;;  %v7943_v46 = vunpack.i.l.bf16 %v7942_v38 }
0x11b0   :  { %7555 = vmatpush3.bf16.xpose.msk.msra.mxu1 %vm8758_vm3, %v7550_v56 }
0x11b1   :  { %v7566_v8 = vpack.c.bf16 %v7944_v54, %v7943_v46 }
0x11b2   :  { %v7947_v24 = vpop.permute.xlu1 %7946 }
0x11b3   :  { %v7949_v34 = vunpack.i.h.bf16 %v7947_v24  ;;  %v7948_v3 = vunpack.i.l.bf16 %v7947_v24 }
0x11b5   :  { %v7570_v22 = vpack.c.bf16 %v7949_v34, %v7948_v3 }
0x11b6   :  { %v7952_v11 = vpop.permute.xlu1 %7951 }
0x11b7   :  { %v7954_v51 = vunpack.i.h.bf16 %v7952_v11  ;;  %v7953_v39 = vunpack.i.l.bf16 %v7952_v11 }
0x11b9   :  { %v9732_v53 = vpack.c.bf16 %v7954_v51, %v7953_v39 }
0x11d1   :  { %v7932_v55 = vpop.permute.xlu0 %7931 }
0x11d2   :  { %v7934_v26 = vunpack.i.h.bf16 %v7932_v55  ;;  %v7933_v35 = vunpack.i.l.bf16 %v7932_v55 }
0x11d4   :  { %v7556_v6 = vpack.c.bf16 %v7934_v26, %v7933_v35 }
0x11d5   :  { %v7937_v4 = vpop.permute.xlu0 %7936 }
0x11d6   :  { %v7939_v29 = vunpack.i.h.bf16 %v7937_v4  ;;  %v7938_v0 = vunpack.i.l.bf16 %v7937_v4  ;;  %7558 = vmatprep.subr.msk.bf16.mxu1 %vm8758_vm3, %v7556_v6 }
0x11d7   :  { %7561 = vmatpush3.bf16.xpose.msk.msra.mxu1 %vm8758_vm3, %v7556_v6 }
0x11d8   :  { %v7562_v12 = vpack.c.bf16 %v7939_v29, %v7938_v0 }
0x11d9   :  { %v7957_v16 = vpop.permute.xlu0 %7956 }
0x11da   :  { %7563 = vmatprep.subr.bf16.mxu0 %v7562_v12  ;;  %v7959_v7 = vunpack.i.h.bf16 %v7957_v16  ;;  %v7958_v59 = vunpack.i.l.bf16 %v7957_v16 }
0x11db   :  { %7565 = vmatpush3.bf16.msra.mxu0 %v7562_v12 }
0x11dc   :  { %7567 = vmatprep.subr.bf16.mxu0 %v7566_v8  ;;  %v7574_v25 = vpack.c.bf16 %v7959_v7, %v7958_v59 }
0x11de   :  { %7023 = vmatmul.mubr.msk.f32.vlgmr.msra.gmra.mrb[60].mxu1 %vm534_vm2, %v9656_v60 }
0x11df   :  { %7025 = vmatprep.mubr.msk.f32.mxu1 %vm534_vm2, %v9670_v19  ;;  %7569 = vmatpush3.bf16.msra.mxu0 %v7566_v8 }
0x11e0   :  { %7571 = vmatprep.subr.bf16.mxu0 %v7570_v22 }
0x11e2   :  { %7026 = vmatmul.mubr.msk.f32.gmra.mrb[62].mxu1 %vm534_vm2, %v9668_v18 }
0x11e3   :  { %7028 = vmatprep.mubr.msk.f32.mxu1 %vm534_vm2, %v9680_v9  ;;  %7573 = vmatpush3.bf16.msra.mxu0 %v7570_v22 }
0x11e4   :  { %7575 = vmatprep.subr.bf16.mxu0 %v7574_v25 }
0x11e6   :  { %7029 = vmatmul.mubr.msk.f32.gmra.mrb[64].mxu1 %vm534_vm2, %v9678_v43 }
0x11e7   :  { %7031 = vmatprep.mubr.msk.f32.mxu1 %vm534_vm2, %v9696_v28  ;;  %7577 = vmatpush3.bf16.msra.mxu0 %v7574_v25 }
0x11e8   :  { %7580 = vmatprep.subr.msk.bf16.mxu0 %vm8758_vm3, %v9732_v53 }
0x11ea   :  { %7032 = vmatmul.mubr.msk.f32.gmra.mrb[66].mxu1 %vm534_vm2, %v9694_v1 }
0x12b1   :  { %v7024_v42 = vpop.f32.mrb[60].mxu1 }
0x12b2   :  { %v3328_v21 = vpop.f32.mrb[61].mxu1  ;;  %v3370_v58 = vsel %vm672_vm4, %v7024_v42, -inf }
0x12b3   :  { %3371 = vmax.xlane.f32.xlu0 %v3370_v58  ;;  %v3367_v31 = vsel %vm672_vm4, %v3328_v21, -inf }
0x12b4   :  { %3368 = vmax.xlane.f32.xlu1 %v3367_v31 }
0x12b5   :  { %v7027_v49 = vpop.f32.mrb[62].mxu1 }
0x12b6   :  { %v3338_v62 = vpop.f32.mrb[63].mxu1  ;;  %v3376_v23 = vsel %vm672_vm4, %v7027_v49, -inf }
0x12b7   :  { %3377 = vmax.xlane.f32.xlu0 %v3376_v23  ;;  %v3373_v57 = vsel %vm672_vm4, %v3338_v62, -inf }
0x12b8   :  { %3374 = vmax.xlane.f32.xlu1 %v3373_v57 }
0x12b9   :  { %v7030_v15 = vpop.f32.mrb[64].mxu1 }
0x12ba   :  { %v3348_v33 = vpop.f32.mrb[65].mxu1  ;;  %v3382_v13 = vsel %vm672_vm4, %v7030_v15, -inf }
0x12bb   :  { %v3379_v36 = vsel %vm672_vm4, %v3348_v33, -inf }
0x12bc   :  { %3383 = vmax.xlane.f32.xlu1 %v3382_v13  ;;  %3380 = vmax.xlane.f32.xlu0 %v3379_v36 }
0x12bd   :  { %v7033_v37 = vpop.f32.mrb[66].mxu1 }
0x12be   :  { %v3358_v40 = vpop.f32.mrb[67].mxu1  ;;  %v3388_v47 = vsel %vm672_vm4, %v7033_v37, -inf }
0x12bf   :  { %v3385_v44 = vsel %vm672_vm4, %v3358_v40, -inf }
0x12c0   :  { %3389 = vmax.xlane.f32.xlu0 %v3388_v47 }
0x12c4   :  { %3386 = vmax.xlane.f32.xlu0 %v3385_v44 }
0x12cd   :  { %7966 = vrot.lane.b32.xlu1 %v9684_v48, %s8454_s28 }
0x12d1   :  { %7971 = vrot.lane.b32.xlu1 %v9700_v41, %s8454_s28 }
0x12d5   :  { %3616 = vrot.lane.b32.xlu1 %v9658_v27, %s8455_s29 }
0x12d9   :  { %3620 = vrot.lane.b32.xlu1 %v9670_v19, %s8455_s29 }
0x12da   :  { %7961 = vrot.lane.b32.xlu0 %v9674_v2, %s8454_s28  ;;  %s10741_s28 = smov 104  }
0x12dd   :  { %3624 = vrot.lane.b32.xlu1 %v9680_v9, %s8455_s29 }
0x12de   :  { %3618 = vrot.lane.b32.xlu0 %v9656_v60, %s8455_s29 }
0x12e1   :  { %3628 = vrot.lane.b32.xlu1 %v9696_v28, %s8455_s29 }
0x12e2   :  { %3622 = vrot.lane.b32.xlu0 %v9668_v18, %s8455_s29 }
0x12e5   :  { %7981 = vrot.lane.b32.xlu1 %v9674_v2, %s8456_s0 }
0x12e6   :  { %3626 = vrot.lane.b32.xlu0 %v9678_v43, %s8455_s29 }
0x12e9   :  { %7986 = vrot.lane.b32.xlu1 %v9684_v48, %s8456_s0 }
0x12ea   :  { %3630 = vrot.lane.b32.xlu0 %v9694_v1, %s8455_s29  ;;  %s10742_s29 = smov 40  }
0x12ed   :  { %7996 = vrot.lane.b32.xlu1 %v9664_v52, %s8457_s2 }
0x12ee   :  { %7976 = vrot.lane.b32.xlu0 %v9664_v52, %s8456_s0 }
0x12f2   :  { %7991 = vrot.lane.b32.xlu0 %v9700_v41, %s8456_s0 }
0x1340   :  { %v3372_v45 = vpop.xlane.xlu0 %3371 }
0x1341   :  { %v3392_v17 = vsub.f32 %v7024_v42, %v3372_v45  ;;  %v3369_v56 = vpop.xlane.xlu1 %3368 }
0x1342   :  { %v3391_v38 = vsub.f32 %v3328_v21, %v3369_v56 }
0x1343   :  { %v3401_v55 = vmul.f32 1.442695, %v3392_v17 }
0x1344   :  { %v3399_v26 = vmul.f32 1.442695, %v3391_v38  ;;  %v3378_v35 = vpop.xlane.xlu0 %3377 }
0x1345   :  { %v3394_v6 = vsub.f32 %v7027_v49, %v3378_v35  ;;  %v3375_v4 = vpop.xlane.xlu1 %3374 }
0x1346   :  { %8251 = vpow2.f32 %v3399_v26  ;;  %v3393_v54 = vsub.f32 %v3338_v62, %v3375_v4 }
0x1347   :  { %8253 = vpow2.f32 %v3401_v55  ;;  %v3405_v46 = vmul.f32 1.442695, %v3394_v6 }
0x1348   :  { %v3403_v29 = vmul.f32 1.442695, %v3393_v54 }
0x1349   :  { %v3384_v0 = vpop.xlane.xlu1 %3383  ;;  %v3381_v24 = vpop.xlane.xlu0 %3380 }
0x134a   :  { %8255 = vpow2.f32 %v3403_v29  ;;  %v3396_v12 = vsub.f32 %v7030_v15, %v3384_v0  ;;  %v3395_v34 = vsub.f32 %v3348_v33, %v3381_v24 }
0x134b   :  { %8257 = vpow2.f32 %v3405_v46 }
0x134c   :  { %v3409_v3 = vmul.f32 1.442695, %v3396_v12  ;;  %v3407_v8 = vmul.f32 1.442695, %v3395_v34 }
0x134d   :  { %v7967_v16 = vpop.permute.xlu1 %7966  ;;  %v3390_v7 = vpop.xlane.xlu0 %3389 }
0x134e   :  { %8259 = vpow2.f32 %v3409_v3  ;;  %v3398_v59 = vsub.f32 %v7033_v37, %v3390_v7  ;;  %v7969_v15 = vunpack.i.h.bf16 %v7967_v16  ;;  %v7968_v33 = vunpack.i.l.bf16 %v7967_v16 }
0x134f   :  { %8261 = vpow2.f32 %v3407_v8 }
0x1350   :  { %v9783_v22 = vpop.eup %8251  ;;  %v3413_v42 = vmul.f32 1.442695, %v3398_v59  ;;  %v7590_v47 = vpack.c.bf16 %v7969_v15, %v7968_v33 }
0x1351   :  { %v9785_v11 = vpop.eup %8253  ;;  %7050 = vmatprep.mubr.msk.f32.mxu0 %vm672_vm4, %v9783_v22  ;;  %v7972_v51 = vpop.permute.xlu1 %7971 }
0x1352   :  { %v3387_v39 = vpop.xlane.xlu0 %3386  ;;  %7051 = vmatmul.mubr.msk.f32.vlgmr.msra.gmra.mrb[60].mxu0 %vm672_vm4, %v9785_v11  ;;  %v7974_v17 = vunpack.i.h.bf16 %v7972_v51  ;;  %v7973_v56 = vunpack.i.l.bf16 %v7972_v51 }
0x1353   :  { %v3397_v25 = vsub.f32 %v3358_v40, %v3387_v39  ;;  %7583 = vmatpush3.bf16.xpose.msk.msra.mxu0 %vm8758_vm3, %v9732_v53 }
0x1354   :  { %v9794_v21 = vpop.eup %8255  ;;  %v7596_v6 = vpack.c.bf16 %v7974_v17, %v7973_v56 }
0x1355   :  { %v3411_v58 = vmul.f32 1.442695, %v3397_v25  ;;  %v9796_v31 = vpop.eup %8257  ;;  %7053 = vmatprep.mubr.msk.f32.mxu0 %vm672_vm4, %v9794_v21  ;;  %v3617_v49 = vpop.permute.xlu1 %3616 }
0x1356   :  { %v7962_v62 = vpop.permute.xlu0 %7961  ;;  %7054 = vmatmul.mubr.msk.f32.gmra.mrb[62].mxu0 %vm672_vm4, %v9796_v31 }
0x1357   :  { %8263 = vpow2.f32 %v3411_v58  ;;  %v7964_v23 = vunpack.i.h.bf16 %v7962_v62  ;;  %v7963_v57 = vunpack.i.l.bf16 %v7962_v62 }
0x1358   :  { %8265 = vpow2.f32 %v3413_v42  ;;  %v9802_v53 = vpop.eup %8259 }
0x1359   :  { %v7584_v13 = vpack.c.bf16 %v7964_v23, %v7963_v57  ;;  %v9804_v36 = vpop.eup %8261  ;;  %v3621_v37 = vpop.permute.xlu1 %3620 }
0x135a   :  { %v3619_v40 = vpop.permute.xlu0 %3618  ;;  %7056 = vmatprep.mubr.msk.f32.mxu0 %vm672_vm4, %v9804_v36 }
0x135b   :  { %7586 = vmatprep.subr.msk.bf16.mxu0 %vm8758_vm3, %v7584_v13  ;;  %7057 = vmatmul.mubr.msk.f32.gmra.mrb[64].mxu0 %vm672_vm4, %v9802_v53 }
0x135c   :  { %7589 = vmatpush3.bf16.xpose.msk.msra.mxu0 %vm8758_vm3, %v7584_v13 }
0x135d   :  { %7592 = vmatprep.subr.msk.bf16.mxu0 %vm8758_vm3, %v7590_v47  ;;  %v3625_v44 = vpop.permute.xlu1 %3624 }
0x135e   :  { %v3623_v45 = vpop.permute.xlu0 %3622 }
0x1361   :  { %v9816_v38 = vpop.eup %8263  ;;  %v3629_v26 = vpop.permute.xlu1 %3628 }
0x1362   :  { %v9818_v55 = vpop.eup %8265  ;;  %7059 = vmatprep.mubr.msk.f32.mxu0 %vm672_vm4, %v9816_v38  ;;  %v3627_v35 = vpop.permute.xlu0 %3626 }
0x1363   :  { %7060 = vmatmul.mubr.msk.f32.gmra.mrb[66].mxu0 %vm672_vm4, %v9818_v55 }
0x1364   :  { %7078 = vmatprep.mubr.msk.f32.mxu0 %vm534_vm2, %v3617_v49  ;;  %7595 = vmatpush3.bf16.xpose.msk.msra.mxu0 %vm8758_vm3, %v7590_v47 }
0x1365   :  { %7598 = vmatprep.subr.msk.bf16.mxu0 %vm8758_vm3, %v7596_v6  ;;  %v7982_v4 = vpop.permute.xlu1 %7981 }
0x1366   :  { %v3631_v54 = vpop.permute.xlu0 %3630  ;;  %v7984_v29 = vunpack.i.h.bf16 %v7982_v4  ;;  %v7983_v0 = vunpack.i.l.bf16 %v7982_v4 }
0x1368   :  { %v7606_v7 = vpack.c.bf16 %v7984_v29, %v7983_v0 }
0x1369   :  { %v7987_v34 = vpop.permute.xlu1 %7986 }
0x136a   :  { %v7977_v46 = vpop.permute.xlu0 %7976  ;;  %v7989_v8 = vunpack.i.h.bf16 %v7987_v34  ;;  %v7988_v16 = vunpack.i.l.bf16 %v7987_v34 }
0x136b   :  { %v7979_v24 = vunpack.i.h.bf16 %v7977_v46  ;;  %v7978_v12 = vunpack.i.l.bf16 %v7977_v46 }
0x136c   :  { %7601 = vmatpush3.bf16.xpose.msk.msra.mxu0 %vm8758_vm3, %v7596_v6  ;;  %v7610_v25 = vpack.c.bf16 %v7989_v8, %v7988_v16 }
0x136d   :  { %v7602_v3 = vpack.c.bf16 %v7979_v24, %v7978_v12  ;;  %v7997_v42 = vpop.permute.xlu1 %7996 }
0x136e   :  { %v7992_v59 = vpop.permute.xlu0 %7991  ;;  %v7999_v58 = vunpack.i.h.bf16 %v7997_v42  ;;  %v7998_v49 = vunpack.i.l.bf16 %v7997_v42 }
0x136f   :  { %7603 = vmatprep.subr.bf16.mxu1 %v7602_v3  ;;  %v7994_v51 = vunpack.i.h.bf16 %v7992_v59  ;;  %v7993_v39 = vunpack.i.l.bf16 %v7992_v59 }
0x1370   :  { %7605 = vmatpush3.bf16.msra.mxu1 %v7602_v3  ;;  %v9835_v23 = vpack.c.bf16 %v7999_v58, %v7998_v49 }
0x1371   :  { %7607 = vmatprep.subr.bf16.mxu1 %v7606_v7  ;;  %v7614_v62 = vpack.c.bf16 %v7994_v51, %v7993_v39 }
0x1373   :  { %7079 = vmatmul.mubr.msk.f32.vlgmr.msra.gmra.mrb[68].mxu0 %vm534_vm2, %v3619_v40 }
0x1374   :  { %7609 = vmatpush3.bf16.msra.mxu1 %v7606_v7  ;;  %7081 = vmatprep.mubr.msk.f32.mxu0 %vm534_vm2, %v3621_v37 }
0x1375   :  { %7611 = vmatprep.subr.bf16.mxu1 %v7610_v25 }
0x1377   :  { %7082 = vmatmul.mubr.msk.f32.gmra.mrb[70].mxu0 %vm534_vm2, %v3623_v45 }
0x1378   :  { %7613 = vmatpush3.bf16.msra.mxu1 %v7610_v25  ;;  %7084 = vmatprep.mubr.msk.f32.mxu0 %vm534_vm2, %v3625_v44 }
0x1379   :  { %7615 = vmatprep.subr.bf16.mxu1 %v7614_v62 }
0x137b   :  { %7085 = vmatmul.mubr.msk.f32.gmra.mrb[72].mxu0 %vm534_vm2, %v3627_v35 }
0x137c   :  { %7617 = vmatpush3.bf16.msra.mxu1 %v7614_v62  ;;  %7087 = vmatprep.mubr.msk.f32.mxu0 %vm534_vm2, %v3629_v26 }
0x137d   :  { %7620 = vmatprep.subr.msk.bf16.mxu1 %vm8758_vm3, %v9835_v23 }
0x137f   :  { %7088 = vmatmul.mubr.msk.f32.gmra.mrb[74].mxu0 %vm534_vm2, %v3631_v54 }
0x1425   :  { %v9843_v57 = vpop.f32.mrb[60].mxu0 }
0x1426   :  { %v9845_v15 = vpop.f32.mrb[61].mxu0 }
0x1429   :  { %v9847_v33 = vpop.f32.mrb[62].mxu0 }
0x142a   :  { %v9849_v13 = vpop.f32.mrb[63].mxu0 }
0x142e   :  { %v9851_v37 = vpop.f32.mrb[64].mxu0 }
0x142f   :  { %v9853_v40 = vpop.f32.mrb[65].mxu0 }
0x1436   :  { %v9855_v47 = vpop.f32.mrb[66].mxu0 }
0x1437   :  { %v9857_v44 = vpop.f32.mrb[67].mxu0 }
0x1446   :  { %v7080_v45 = vpop.f32.mrb[68].mxu0 }
0x1447   :  { %v3746_v17 = vpop.f32.mrb[69].mxu0  ;;  %v3788_v56 = vsel %vm672_vm4, %v7080_v45, -inf }
0x1448   :  { %3789 = vmax.xlane.f32.xlu0 %v3788_v56  ;;  %v3785_v26 = vsel %vm672_vm4, %v3746_v17, -inf }
0x1449   :  { %3786 = vmax.xlane.f32.xlu1 %v3785_v26 }
0x144a   :  { %v7083_v35 = vpop.f32.mrb[70].mxu0 }
0x144b   :  { %v3756_v6 = vpop.f32.mrb[71].mxu0  ;;  %v3794_v4 = vsel %vm672_vm4, %v7083_v35, -inf }
0x144c   :  { %3795 = vmax.xlane.f32.xlu0 %v3794_v4  ;;  %v3791_v54 = vsel %vm672_vm4, %v3756_v6, -inf }
0x144d   :  { %3792 = vmax.xlane.f32.xlu1 %v3791_v54 }
0x144e   :  { %v7086_v46 = vpop.f32.mrb[72].mxu0 }
0x144f   :  { %v3766_v29 = vpop.f32.mrb[73].mxu0  ;;  %v3800_v0 = vsel %vm672_vm4, %v7086_v46, -inf }
0x1450   :  { %v3797_v24 = vsel %vm672_vm4, %v3766_v29, -inf }
0x1451   :  { %3801 = vmax.xlane.f32.xlu1 %v3800_v0  ;;  %3798 = vmax.xlane.f32.xlu0 %v3797_v24 }
0x1452   :  { %v7089_v12 = vpop.f32.mrb[74].mxu0 }
0x1453   :  { %v3776_v34 = vpop.f32.mrb[75].mxu0  ;;  %v3806_v3 = vsel %vm672_vm4, %v7089_v12, -inf }
0x1454   :  { %v3803_v8 = vsel %vm672_vm4, %v3776_v34, -inf }
0x1455   :  { %3807 = vmax.xlane.f32.xlu0 %v3806_v3 }
0x1459   :  { %3804 = vmax.xlane.f32.xlu0 %v3803_v8 }
0x1462   :  { %8006 = vrot.lane.b32.xlu1 %v9684_v48, %s8457_s2 }
0x1466   :  { %8011 = vrot.lane.b32.xlu1 %v9700_v41, %s8457_s2 }
0x146a   :  { %4066 = vrot.lane.b32.xlu1 %v9658_v27, %s10738_s6 }
0x146e   :  { %4070 = vrot.lane.b32.xlu1 %v9670_v19, %s10738_s6 }
0x146f   :  { %8001 = vrot.lane.b32.xlu0 %v9674_v2, %s8457_s2 }
0x1472   :  { %4074 = vrot.lane.b32.xlu1 %v9680_v9, %s10738_s6 }
0x1473   :  { %4068 = vrot.lane.b32.xlu0 %v9656_v60, %s10738_s6 }
0x1476   :  { %4078 = vrot.lane.b32.xlu1 %v9696_v28, %s10738_s6 }
0x1477   :  { %4072 = vrot.lane.b32.xlu0 %v9668_v18, %s10738_s6 }
0x147a   :  { %8021 = vrot.lane.b32.xlu1 %v9674_v2, %s10739_s26 }
0x147b   :  { %4076 = vrot.lane.b32.xlu0 %v9678_v43, %s10738_s6 }
0x147e   :  { %8026 = vrot.lane.b32.xlu1 %v9684_v48, %s10739_s26 }
0x147f   :  { %4080 = vrot.lane.b32.xlu0 %v9694_v1, %s10738_s6 }
0x1482   :  { %8036 = vrot.lane.b32.xlu1 %v9664_v52, %s10740_s27 }
0x1483   :  { %8016 = vrot.lane.b32.xlu0 %v9664_v52, %s10739_s26 }
0x1487   :  { %8031 = vrot.lane.b32.xlu0 %v9700_v41, %s10739_s26 }
0x14d5   :  { %v3790_v16 = vpop.xlane.xlu0 %3789 }
0x14d6   :  { %v3810_v7 = vsub.f32 %v7080_v45, %v3790_v16  ;;  %v3787_v59 = vpop.xlane.xlu1 %3786 }
0x14d7   :  { %v3809_v51 = vsub.f32 %v3746_v17, %v3787_v59 }
0x14d8   :  { %v3819_v39 = vmul.f32 1.442695, %v3810_v7 }
0x14d9   :  { %v3817_v25 = vmul.f32 1.442695, %v3809_v51  ;;  %v3796_v42 = vpop.xlane.xlu0 %3795 }
0x14da   :  { %v3812_v58 = vsub.f32 %v7083_v35, %v3796_v42  ;;  %v3793_v49 = vpop.xlane.xlu1 %3792 }
0x14db   :  { %8267 = vpow2.f32 %v3817_v25  ;;  %v3811_v62 = vsub.f32 %v3756_v6, %v3793_v49 }
0x14dc   :  { %8269 = vpow2.f32 %v3819_v39  ;;  %v3823_v56 = vmul.f32 1.442695, %v3812_v58 }
0x14dd   :  { %v3821_v26 = vmul.f32 1.442695, %v3811_v62 }
0x14de   :  { %v3802_v4 = vpop.xlane.xlu1 %3801  ;;  %v3799_v54 = vpop.xlane.xlu0 %3798 }
0x14df   :  { %8271 = vpow2.f32 %v3821_v26  ;;  %v3814_v0 = vsub.f32 %v7086_v46, %v3802_v4  ;;  %v3813_v24 = vsub.f32 %v3766_v29, %v3799_v54 }
0x14e0   :  { %8273 = vpow2.f32 %v3823_v56 }
0x14e1   :  { %v3827_v3 = vmul.f32 1.442695, %v3814_v0  ;;  %v3825_v45 = vmul.f32 1.442695, %v3813_v24 }
0x14e2   :  { %v8007_v8 = vpop.permute.xlu1 %8006  ;;  %v3808_v17 = vpop.xlane.xlu0 %3807 }
0x14e3   :  { %8275 = vpow2.f32 %v3827_v3  ;;  %v3816_v16 = vsub.f32 %v7089_v12, %v3808_v17  ;;  %v8009_v49 = vunpack.i.h.bf16 %v8007_v8  ;;  %v8008_v62 = vunpack.i.l.bf16 %v8007_v8 }
0x14e4   :  { %8277 = vpow2.f32 %v3825_v45 }
0x14e5   :  { %v9899_v35 = vpop.eup %8267  ;;  %v3831_v46 = vmul.f32 1.442695, %v3816_v16  ;;  %v7630_v0 = vpack.c.bf16 %v8009_v49, %v8008_v62 }
0x14e6   :  { %v9901_v7 = vpop.eup %8269  ;;  %7106 = vmatprep.mubr.msk.f32.mxu1 %vm672_vm4, %v9899_v35  ;;  %v8012_v6 = vpop.permute.xlu1 %8011 }
0x14e7   :  { %v3805_v59 = vpop.xlane.xlu0 %3804  ;;  %7107 = vmatmul.mubr.msk.f32.vlgmr.msra.gmra.mrb[68].mxu1 %vm672_vm4, %v9901_v7  ;;  %v8014_v45 = vunpack.i.h.bf16 %v8012_v6  ;;  %v8013_v8 = vunpack.i.l.bf16 %v8012_v6 }
0x14e8   :  { %v3815_v51 = vsub.f32 %v3776_v34, %v3805_v59  ;;  %7623 = vmatpush3.bf16.xpose.msk.msra.mxu1 %vm8758_vm3, %v9835_v23 }
0x14e9   :  { %v9910_v29 = vpop.eup %8271 }
0x14ea   :  { %v3829_v12 = vmul.f32 1.442695, %v3815_v51  ;;  %v9912_v39 = vpop.eup %8273  ;;  %7109 = vmatprep.mubr.msk.f32.mxu1 %vm672_vm4, %v9910_v29  ;;  %v4067_v25 = vpop.permute.xlu1 %4066 }
0x14eb   :  { %v8002_v42 = vpop.permute.xlu0 %8001  ;;  %7110 = vmatmul.mubr.msk.f32.gmra.mrb[70].mxu1 %vm672_vm4, %v9912_v39 }
0x14ec   :  { %8279 = vpow2.f32 %v3829_v12  ;;  %v8004_v34 = vunpack.i.h.bf16 %v8002_v42  ;;  %v8003_v58 = vunpack.i.l.bf16 %v8002_v42 }
0x14ed   :  { %8281 = vpow2.f32 %v3831_v46  ;;  %v9918_v23 = vpop.eup %8275  ;;  %v7636_v46 = vpack.c.bf16 %v8014_v45, %v8013_v8 }
0x14ee   :  { %v7624_v56 = vpack.c.bf16 %v8004_v34, %v8003_v58  ;;  %v9920_v26 = vpop.eup %8277  ;;  %v4071_v4 = vpop.permute.xlu1 %4070 }
0x14ef   :  { %v4069_v54 = vpop.permute.xlu0 %4068  ;;  %7112 = vmatprep.mubr.msk.f32.mxu1 %vm672_vm4, %v9920_v26 }
0x14f0   :  { %7626 = vmatprep.subr.msk.bf16.mxu1 %vm8758_vm3, %v7624_v56  ;;  %7113 = vmatmul.mubr.msk.f32.gmra.mrb[72].mxu1 %vm672_vm4, %v9918_v23 }
0x14f1   :  { %7629 = vmatpush3.bf16.xpose.msk.msra.mxu1 %vm8758_vm3, %v7624_v56 }
0x14f2   :  { %7632 = vmatprep.subr.msk.bf16.mxu1 %vm8758_vm3, %v7630_v0  ;;  %v4075_v24 = vpop.permute.xlu1 %4074 }
0x14f3   :  { %v4073_v3 = vpop.permute.xlu0 %4072 }
0x14f6   :  { %v9932_v17 = vpop.eup %8279  ;;  %v4079_v59 = vpop.permute.xlu1 %4078 }
0x14f7   :  { %v9934_v16 = vpop.eup %8281  ;;  %7115 = vmatprep.mubr.msk.f32.mxu1 %vm672_vm4, %v9932_v17  ;;  %v4077_v51 = vpop.permute.xlu0 %4076 }
0x14f8   :  { %7116 = vmatmul.mubr.msk.f32.gmra.mrb[74].mxu1 %vm672_vm4, %v9934_v16 }
0x14f9   :  { %7134 = vmatprep.mubr.msk.f32.mxu1 %vm534_vm2, %v4067_v25  ;;  %7635 = vmatpush3.bf16.xpose.msk.msra.mxu1 %vm8758_vm3, %v7630_v0 }
0x14fa   :  { %7638 = vmatprep.subr.msk.bf16.mxu1 %vm8758_vm3, %v7636_v46  ;;  %v8022_v6 = vpop.permute.xlu1 %8021 }
0x14fb   :  { %v4081_v12 = vpop.permute.xlu0 %4080  ;;  %v8024_v34 = vunpack.i.h.bf16 %v8022_v6  ;;  %v8023_v58 = vunpack.i.l.bf16 %v8022_v6 }
0x14fd   :  { %v7646_v10 = vpack.c.bf16 %v8024_v34, %v8023_v58 }
0x14fe   :  { %v8027_v56 = vpop.permute.xlu1 %8026 }
0x14ff   :  { %v8017_v42 = vpop.permute.xlu0 %8016  ;;  %v8029_v8 = vunpack.i.h.bf16 %v8027_v56  ;;  %v8028_v25 = vunpack.i.l.bf16 %v8027_v56 }
0x1500   :  { %v8019_v49 = vunpack.i.h.bf16 %v8017_v42  ;;  %v8018_v62 = vunpack.i.l.bf16 %v8017_v42 }
0x1501   :  { %7641 = vmatpush3.bf16.xpose.msk.msra.mxu1 %vm8758_vm3, %v7636_v46  ;;  %v7650_v20 = vpack.c.bf16 %v8029_v8, %v8028_v25 }
0x1502   :  { %v7642_v45 = vpack.c.bf16 %v8019_v49, %v8018_v62  ;;  %v8037_v61 = vpop.permute.xlu1 %8036 }
0x1503   :  { %v8032_v0 = vpop.permute.xlu0 %8031  ;;  %v8039_v6 = vunpack.i.h.bf16 %v8037_v61  ;;  %v8038_v46 = vunpack.i.l.bf16 %v8037_v61 }
0x1504   :  { %7643 = vmatprep.subr.bf16.mxu0 %v7642_v45  ;;  %v8034_v5 = vunpack.i.h.bf16 %v8032_v0  ;;  %v8033_v14 = vunpack.i.l.bf16 %v8032_v0 }
0x1505   :  { %7645 = vmatpush3.bf16.msra.mxu0 %v7642_v45  ;;  %v9951_v34 = vpack.c.bf16 %v8039_v6, %v8038_v46 }
0x1506   :  { %7647 = vmatprep.subr.bf16.mxu0 %v7646_v10  ;;  %v7654_v42 = vpack.c.bf16 %v8034_v5, %v8033_v14 }
0x1508   :  { %7135 = vmatmul.mubr.msk.f32.vlgmr.msra.gmra.mrb[76].mxu1 %vm534_vm2, %v4069_v54 }
0x1509   :  { %7649 = vmatpush3.bf16.msra.mxu0 %v7646_v10  ;;  %7137 = vmatprep.mubr.msk.f32.mxu1 %vm534_vm2, %v4071_v4 }
0x150a   :  { %7651 = vmatprep.subr.bf16.mxu0 %v7650_v20 }
0x150c   :  { %7138 = vmatmul.mubr.msk.f32.gmra.mrb[78].mxu1 %vm534_vm2, %v4073_v3 }
0x150d   :  { %7653 = vmatpush3.bf16.msra.mxu0 %v7650_v20  ;;  %7140 = vmatprep.mubr.msk.f32.mxu1 %vm534_vm2, %v4075_v24 }
0x150e   :  { %7655 = vmatprep.subr.bf16.mxu0 %v7654_v42 }
0x1510   :  { %7141 = vmatmul.mubr.msk.f32.gmra.mrb[80].mxu1 %vm534_vm2, %v4077_v51 }
0x1511   :  { %7657 = vmatpush3.bf16.msra.mxu0 %v7654_v42  ;;  %7143 = vmatprep.mubr.msk.f32.mxu1 %vm534_vm2, %v4079_v59 }
0x1512   :  { %7660 = vmatprep.subr.msk.bf16.mxu0 %vm8758_vm3, %v9951_v34 }
0x1514   :  { %7144 = vmatmul.mubr.msk.f32.gmra.mrb[82].mxu1 %vm534_vm2, %v4081_v12 }
0x15ba   :  { %v9959_v61 = vpop.f32.mrb[68].mxu1 }
0x15bb   :  { %v9961_v14 = vpop.f32.mrb[69].mxu1 }
0x15be   :  { %v9963_v20 = vpop.f32.mrb[70].mxu1 }
0x15bf   :  { %v9965_v10 = vpop.f32.mrb[71].mxu1 }
0x15c3   :  { %v9967_v5 = vpop.f32.mrb[72].mxu1 }
0x15c4   :  { %v9969_v4 = vpop.f32.mrb[73].mxu1 }
0x15cb   :  { %v9971_v54 = vpop.f32.mrb[74].mxu1 }
0x15cc   :  { %v9973_v24 = vpop.f32.mrb[75].mxu1 }
0x15db   :  { %v7136_v3 = vpop.f32.mrb[76].mxu1 }
0x15dc   :  { %v4196_v59 = vpop.f32.mrb[77].mxu1  ;;  %v4238_v51 = vsel %vm672_vm4, %v7136_v3, -inf }
0x15dd   :  { %4239 = vmax.xlane.f32.xlu0 %v4238_v51  ;;  %v4235_v12 = vsel %vm672_vm4, %v4196_v59, -inf }
0x15de   :  { %4236 = vmax.xlane.f32.xlu1 %v4235_v12 }
0x15df   :  { %v7139_v58 = vpop.f32.mrb[78].mxu1 }
0x15e0   :  { %v4206_v49 = vpop.f32.mrb[79].mxu1  ;;  %v4244_v62 = vsel %vm672_vm4, %v7139_v58, -inf }
0x15e1   :  { %4245 = vmax.xlane.f32.xlu0 %v4244_v62  ;;  %v4241_v56 = vsel %vm672_vm4, %v4206_v49, -inf }
0x15e2   :  { %4242 = vmax.xlane.f32.xlu1 %v4241_v56 }
0x15e3   :  { %v7142_v45 = vpop.f32.mrb[80].mxu1 }
0x15e4   :  { %v4216_v8 = vpop.f32.mrb[81].mxu1  ;;  %v4250_v25 = vsel %vm672_vm4, %v7142_v45, -inf }
0x15e5   :  { %v4247_v0 = vsel %vm672_vm4, %v4216_v8, -inf }
0x15e6   :  { %4251 = vmax.xlane.f32.xlu1 %v4250_v25  ;;  %4248 = vmax.xlane.f32.xlu0 %v4247_v0 }
0x15e7   :  { %v7145_v6 = vpop.f32.mrb[82].mxu1 }
0x15e8   :  { %v4226_v46 = vpop.f32.mrb[83].mxu1  ;;  %v4256_v42 = vsel %vm672_vm4, %v7145_v6, -inf }
0x15e9   :  { %v4253_v51 = vsel %vm672_vm4, %v4226_v46, -inf }
0x15ea   :  { %4257 = vmax.xlane.f32.xlu0 %v4256_v42 }
0x15ee   :  { %4254 = vmax.xlane.f32.xlu0 %v4253_v51 }
0x15f7   :  { %8046 = vrot.lane.b32.xlu1 %v9684_v48, %s10740_s27 }
0x15fb   :  { %8051 = vrot.lane.b32.xlu1 %v9700_v41, %s10740_s27 }
0x15ff   :  { %4516 = vrot.lane.b32.xlu1 %v9658_v27, %s10741_s28 }
0x1603   :  { %4520 = vrot.lane.b32.xlu1 %v9670_v19, %s10741_s28 }
0x1604   :  { %8041 = vrot.lane.b32.xlu0 %v9674_v2, %s10740_s27 }
0x1607   :  { %4524 = vrot.lane.b32.xlu1 %v9680_v9, %s10741_s28 }
0x1608   :  { %4518 = vrot.lane.b32.xlu0 %v9656_v60, %s10741_s28 }
0x160b   :  { %4528 = vrot.lane.b32.xlu1 %v9696_v28, %s10741_s28 }
0x160c   :  { %4522 = vrot.lane.b32.xlu0 %v9668_v18, %s10741_s28 }
0x160f   :  { %8056 = vrot.lane.b32.xlu1 %v9664_v52, %s10742_s29 }
0x1610   :  { %4526 = vrot.lane.b32.xlu0 %v9678_v43, %s10741_s28 }
0x1614   :  { %4530 = vrot.lane.b32.xlu0 %v9694_v1, %s10741_s28 }
0x166a   :  { %v4240_v27 = vpop.xlane.xlu0 %4239 }
0x166b   :  { %v4260_v19 = vsub.f32 %v7136_v3, %v4240_v27  ;;  %v4237_v9 = vpop.xlane.xlu1 %4236 }
0x166c   :  { %v4259_v12 = vsub.f32 %v4196_v59, %v4237_v9 }
0x166d   :  { %v4269_v60 = vmul.f32 1.442695, %v4260_v19 }
0x166e   :  { %v4267_v62 = vmul.f32 1.442695, %v4259_v12  ;;  %v4246_v56 = vpop.xlane.xlu0 %4245 }
0x166f   :  { %v4262_v28 = vsub.f32 %v7139_v58, %v4246_v56  ;;  %v4243_v25 = vpop.xlane.xlu1 %4242 }
0x1670   :  { %8283 = vpow2.f32 %v4267_v62  ;;  %v4261_v18 = vsub.f32 %v4206_v49, %v4243_v25 }
0x1671   :  { %8285 = vpow2.f32 %v4269_v60  ;;  %v4273_v0 = vmul.f32 1.442695, %v4262_v28 }
0x1672   :  { %v4271_v52 = vmul.f32 1.442695, %v4261_v18 }
0x1673   :  { %v4252_v42 = vpop.xlane.xlu1 %4251  ;;  %v4249_v51 = vpop.xlane.xlu0 %4248 }
0x1674   :  { %8287 = vpow2.f32 %v4271_v52  ;;  %v4264_v43 = vsub.f32 %v7142_v45, %v4252_v42  ;;  %v4263_v50 = vsub.f32 %v4216_v8, %v4249_v51 }
0x1675   :  { %8289 = vpow2.f32 %v4273_v0 }
0x1676   :  { %v4277_v1 = vmul.f32 1.442695, %v4264_v43  ;;  %v4275_v3 = vmul.f32 1.442695, %v4263_v50 }
0x1677   :  { %v8047_v27 = vpop.permute.xlu1 %8046  ;;  %v4258_v59 = vpop.xlane.xlu0 %4257 }
0x1678   :  { %8291 = vpow2.f32 %v4277_v1  ;;  %v4266_v19 = vsub.f32 %v7145_v6, %v4258_v59  ;;  %v8049_v25 = vunpack.i.h.bf16 %v8047_v27  ;;  %v8048_v18 = vunpack.i.l.bf16 %v8047_v27 }
0x1679   :  { %8293 = vpow2.f32 %v4275_v3 }
0x167a   :  { %v10007_v58 = vpop.eup %8283  ;;  %v4281_v45 = vmul.f32 1.442695, %v4266_v19  ;;  %v7670_v51 = vpack.c.bf16 %v8049_v25, %v8048_v18 }
0x167b   :  { %v10009_v9 = vpop.eup %8285  ;;  %7162 = vmatprep.mubr.msk.f32.mxu0 %vm672_vm4, %v10007_v58  ;;  %v8052_v49 = vpop.permute.xlu1 %8051 }
0x167c   :  { %v4255_v12 = vpop.xlane.xlu0 %4254  ;;  %7163 = vmatmul.mubr.msk.f32.vlgmr.msra.gmra.mrb[76].mxu0 %vm672_vm4, %v10009_v9  ;;  %v8054_v1 = vunpack.i.h.bf16 %v8052_v49  ;;  %v8053_v3 = vunpack.i.l.bf16 %v8052_v49 }
0x167d   :  { %v4265_v60 = vsub.f32 %v4226_v46, %v4255_v12  ;;  %7663 = vmatpush3.bf16.xpose.msk.msra.mxu0 %vm8758_vm3, %v9951_v34 }
0x167e   :  { %v10018_v50 = vpop.eup %8287  ;;  %v7676_v12 = vpack.c.bf16 %v8054_v1, %v8053_v3 }
0x167f   :  { %v4279_v8 = vmul.f32 1.442695, %v4265_v60  ;;  %v10020_v6 = vpop.eup %8289  ;;  %7165 = vmatprep.mubr.msk.f32.mxu0 %vm672_vm4, %v10018_v50  ;;  %v4517_v62 = vpop.permute.xlu1 %4516 }
0x1680   :  { %v8042_v56 = vpop.permute.xlu0 %8041  ;;  %7166 = vmatmul.mubr.msk.f32.gmra.mrb[78].mxu0 %vm672_vm4, %v10020_v6 }
0x1681   :  { %8295 = vpow2.f32 %v4279_v8  ;;  %v8044_v46 = vunpack.i.h.bf16 %v8042_v56  ;;  %v8043_v28 = vunpack.i.l.bf16 %v8042_v56 }
0x1682   :  { %8297 = vpow2.f32 %v4281_v45  ;;  %v10026_v34 = vpop.eup %8291 }
0x1683   :  { %v7664_v0 = vpack.c.bf16 %v8044_v46, %v8043_v28  ;;  %v10028_v52 = vpop.eup %8293  ;;  %v4521_v42 = vpop.permute.xlu1 %4520 }
0x1684   :  { %7168 = vmatprep.mubr.msk.f32.mxu0 %vm672_vm4, %v10028_v52  ;;  %v4519_v56 = vpop.permute.xlu0 %4518 }
0x1685   :  { %7666 = vmatprep.subr.msk.bf16.mxu0 %vm8758_vm3, %v7664_v0  ;;  %7169 = vmatmul.mubr.msk.f32.gmra.mrb[80].mxu0 %vm672_vm4, %v10026_v34 }
0x1686   :  { %7669 = vmatpush3.bf16.xpose.msk.msra.mxu0 %vm8758_vm3, %v7664_v0 }
0x1687   :  { %7672 = vmatprep.subr.msk.bf16.mxu0 %vm8758_vm3, %v7670_v51  ;;  %v4525_v43 = vpop.permute.xlu1 %4524 }
0x1688   :  { %v4523_v46 = vpop.permute.xlu0 %4522 }
0x168b   :  { %v10040_v27 = vpop.eup %8295  ;;  %v4529_v19 = vpop.permute.xlu1 %4528 }
0x168c   :  { %v10042_v59 = vpop.eup %8297  ;;  %7171 = vmatprep.mubr.msk.f32.mxu0 %vm672_vm4, %v10040_v27 }
0x168d   :  { %7172 = vmatmul.mubr.msk.f32.gmra.mrb[82].mxu0 %vm672_vm4, %v10042_v59 }
0x168e   :  { %7190 = vmatprep.mubr.msk.f32.mxu0 %vm534_vm2, %v4517_v62  ;;  %7675 = vmatpush3.bf16.xpose.msk.msra.mxu0 %vm8758_vm3, %v7670_v51  ;;  %v4527_v62 = vpop.permute.xlu0 %4526 }
0x168f   :  { %7678 = vmatprep.subr.msk.bf16.mxu0 %vm8758_vm3, %v7676_v12  ;;  %v8057_v49 = vpop.permute.xlu1 %8056 }
0x1690   :  { %v8059_v60 = vunpack.i.h.bf16 %v8057_v49  ;;  %v8058_v45 = vunpack.i.l.bf16 %v8057_v49 }
0x1692   :  { %v7682_v8 = vpack.c.bf16 %v8059_v60, %v8058_v45  ;;  %v4531_v28 = vpop.permute.xlu0 %4530 }
0x1694   :  { %7683 = vmatprep.subr.bf16.mxu1 %v7682_v8 }
0x1695   :  { %7685 = vmatpush3.bf16.msra.mxu1 %v7682_v8 }
0x1696   :  { %7681 = vmatpush3.bf16.xpose.msk.msra.mxu0 %vm8758_vm3, %v7676_v12 }
0x169d   :  { %7191 = vmatmul.mubr.msk.f32.vlgmr.msra.gmra.mrb[84].mxu0 %vm534_vm2, %v4519_v56 }
0x169e   :  { %7193 = vmatprep.mubr.msk.f32.mxu0 %vm534_vm2, %v4521_v42 }
0x16a1   :  { %7194 = vmatmul.mubr.msk.f32.gmra.mrb[86].mxu0 %vm534_vm2, %v4523_v46 }
0x16a2   :  { %7196 = vmatprep.mubr.msk.f32.mxu0 %vm534_vm2, %v4525_v43 }
0x16a5   :  { %7197 = vmatmul.mubr.msk.f32.gmra.mrb[88].mxu0 %vm534_vm2, %v4527_v62 }
0x16a6   :  { %7199 = vmatprep.mubr.msk.f32.mxu0 %vm534_vm2, %v4529_v19 }
0x16a9   :  { %7200 = vmatmul.mubr.msk.f32.gmra.mrb[90].mxu0 %vm534_vm2, %v4531_v28 }
0x174f   :  { %v10062_v25 = vpop.f32.mrb[76].mxu0 }
0x1750   :  { %v10064_v32 = vpop.f32.mrb[77].mxu0 }
0x1753   :  { %v10066_v18 = vpop.f32.mrb[78].mxu0 }
0x1754   :  { %v10068_v0 = vpop.f32.mrb[79].mxu0 }
0x1758   :  { %v10070_v42 = vpop.f32.mrb[80].mxu0 }
0x1759   :  { %v10072_v51 = vpop.f32.mrb[81].mxu0 }
0x1760   :  { %v10074_v43 = vpop.f32.mrb[82].mxu0 }
0x1761   :  { %v10076_v1 = vpop.f32.mrb[83].mxu0 }
0x1770   :  { %v10078_v3 = vpop.f32.mrb[84].mxu0 }
0x1771   :  { %v10080_v19 = vpop.f32.mrb[85].mxu0  ;;  %v4688_v12 = vsel %vm672_vm4, %v10078_v3, -inf }
0x1772   :  { %4689 = vmax.xlane.f32.xlu0 %v4688_v12  ;;  %v4685_v49 = vsel %vm672_vm4, %v10080_v19, -inf }
0x1773   :  { %4686 = vmax.xlane.f32.xlu1 %v4685_v49 }
0x1774   :  { %v10086_v60 = vpop.f32.mrb[86].mxu0 }
0x1775   :  { %v10088_v45 = vpop.f32.mrb[87].mxu0  ;;  %v4694_v8 = vsel %vm672_vm4, %v10086_v60, -inf }
0x1776   :  { %v4691_v56 = vsel %vm672_vm4, %v10088_v45, -inf }
0x1777   :  { %4695 = vmax.xlane.f32.xlu1 %v4694_v8  ;;  %4692 = vmax.xlane.f32.xlu0 %v4691_v56 }
0x1778   :  { %v10094_v46 = vpop.f32.mrb[88].mxu0 }
0x1779   :  { %v10096_v62 = vpop.f32.mrb[89].mxu0  ;;  %v4700_v28 = vsel %vm672_vm4, %v10094_v46, -inf }
0x177a   :  { %v4697_v12 = vsel %vm672_vm4, %v10096_v62, -inf }
0x177b   :  { %4701 = vmax.xlane.f32.xlu1 %v4700_v28  ;;  %4698 = vmax.xlane.f32.xlu0 %v4697_v12  ;;  %v3833_v28 = vsel %vm672_vm4, %v9899_v35, 0.0  ;;  %v4286_v12 = vsel %vm672_vm4, %v10009_v9, 0.0  ;;  %v3839_v35 = vsel %vm672_vm4, %v9910_v29, 0.0  ;;  %v4289_v9 = vsel %vm672_vm4, %v10018_v50, 0.0 }
0x177c   :  { %v10102_v49 = vpop.f32.mrb[90].mxu0  ;;  %v3854_v29 = vsel %vm672_vm4, %v9934_v16, 0.0  ;;  %v3851_v50 = vsel %vm672_vm4, %v9932_v17, 0.0  ;;  %v3415_v16 = vsel %vm672_vm4, %v9783_v22, 0.0 }
0x177d   :  { %v10104_v63 = vpop.f32.mrb[91].mxu0  ;;  %v4706_v8 = vsel %vm672_vm4, %v10102_v49, -inf }
0x177e   :  { %v4703_v56 = vsel %vm672_vm4, %v10104_v63, -inf }
0x177f   :  { %4707 = vmax.xlane.f32.xlu0 %v4706_v8  ;;  %v3836_v8 = vsel %vm672_vm4, %v9901_v7, 0.0  ;;  %v3848_v7 = vsel %vm672_vm4, %v9918_v23, 0.0  ;;  %v4304_v23 = vsel %vm672_vm4, %v10042_v59, 0.0 }
0x1783   :  { %4704 = vmax.xlane.f32.xlu0 %v4703_v56 }
0x178c   :  { %8066 = vrot.lane.b32.xlu1 %v9684_v48, %s10742_s29  ;;  %v3842_v48 = vsel %vm672_vm4, %v9912_v39, 0.0  ;;  %v4298_v39 = vsel %vm672_vm4, %v10026_v34, 0.0  ;;  %v4301_v34 = vsel %vm672_vm4, %v10040_v27, 0.0 }
0x1790   :  { %8071 = vrot.lane.b32.xlu1 %v9700_v41, %s10742_s29  ;;  %v4283_v41 = vsel %vm672_vm4, %v10007_v58, 0.0  ;;  %v3845_v58 = vsel %vm672_vm4, %v9920_v26, 0.0  ;;  %v3418_v26 = vsel %vm672_vm4, %v9785_v11, 0.0 }
0x1799   :  { %8061 = vrot.lane.b32.xlu0 %v9674_v2, %s10742_s29  ;;  %v4292_v2 = vsel %vm672_vm4, %v10020_v6, 0.0  ;;  %v4295_v6 = vsel %vm672_vm4, %v10028_v52, 0.0 }
0x17b4   :  { %3834 = vadd.xlane.f32.xlu1 %v3833_v28 }
0x17b8   :  { %4287 = vadd.xlane.f32.xlu1 %v4286_v12  ;;  %3837 = vadd.xlane.f32.xlu0 %v3836_v8 }
0x17bc   :  { %3843 = vadd.xlane.f32.xlu1 %v3842_v48  ;;  %4284 = vadd.xlane.f32.xlu0 %v4283_v41 }
0x17c0   :  { %4293 = vadd.xlane.f32.xlu1 %v4292_v2  ;;  %3840 = vadd.xlane.f32.xlu0 %v3839_v35 }
0x17c4   :  { %3849 = vadd.xlane.f32.xlu1 %v3848_v7  ;;  %4290 = vadd.xlane.f32.xlu0 %v4289_v9 }
0x17c8   :  { %4299 = vadd.xlane.f32.xlu1 %v4298_v39  ;;  %3846 = vadd.xlane.f32.xlu0 %v3845_v58 }
0x17cc   :  { %3855 = vadd.xlane.f32.xlu1 %v3854_v29  ;;  %4296 = vadd.xlane.f32.xlu0 %v4295_v6 }
0x17d0   :  { %4305 = vadd.xlane.f32.xlu1 %v4304_v23  ;;  %3852 = vadd.xlane.f32.xlu0 %v3851_v50 }
0x17d4   :  { %3419 = vadd.xlane.f32.xlu1 %v3418_v26  ;;  %4302 = vadd.xlane.f32.xlu0 %v4301_v34 }
0x17d8   :  { %3416 = vadd.xlane.f32.xlu0 %v3415_v16 }
0x17ff   :  { %v4690_v52 = vpop.xlane.xlu0 %4689 }
0x1800   :  { %v4710_v59 = vsub.f32 %v10078_v3, %v4690_v52  ;;  %v4687_v56 = vpop.xlane.xlu1 %4686 }
0x1801   :  { %v4709_v17 = vsub.f32 %v10080_v19, %v4687_v56 }
0x1802   :  { %v4719_v28 = vmul.f32 1.442695, %v4710_v59 }
0x1803   :  { %v4717_v12 = vmul.f32 1.442695, %v4709_v17 }
0x1804   :  { %8299 = vpow2.f32 %v4719_v28  ;;  %v4696_v8 = vpop.xlane.xlu1 %4695  ;;  %v4693_v11 = vpop.xlane.xlu0 %4692 }
0x1805   :  { %8301 = vpow2.f32 %v4717_v12  ;;  %v4712_v27 = vsub.f32 %v10086_v60, %v4696_v8  ;;  %v4711_v48 = vsub.f32 %v10088_v45, %v4693_v11 }
0x1807   :  { %v4723_v41 = vmul.f32 1.442695, %v4712_v27  ;;  %v4721_v2 = vmul.f32 1.442695, %v4711_v48 }
0x1808   :  { %v4702_v22 = vpop.xlane.xlu1 %4701  ;;  %v4699_v35 = vpop.xlane.xlu0 %4698 }
0x1809   :  { %8303 = vpow2.f32 %v4723_v41  ;;  %v4714_v3 = vsub.f32 %v10094_v46, %v4702_v22  ;;  %v4713_v7 = vsub.f32 %v10096_v62, %v4699_v35 }
0x180a   :  { %8305 = vpow2.f32 %v4721_v2 }
0x180b   :  { %v4727_v19 = vmul.f32 1.442695, %v4714_v3  ;;  %v4725_v9 = vmul.f32 1.442695, %v4713_v7 }
0x180c   :  { %v4708_v39 = vpop.xlane.xlu0 %4707  ;;  %v8067_v23 = vpop.permute.xlu1 %8066 }
0x180d   :  { %8307 = vpow2.f32 %v4727_v19  ;;  %v4716_v58 = vsub.f32 %v10102_v49, %v4708_v39  ;;  %v8069_v16 = vunpack.i.h.bf16 %v8067_v23  ;;  %v8068_v52 = vunpack.i.l.bf16 %v8067_v23 }
0x180e   :  { %v8300_v29 = vpop.eup %8299  ;;  %8309 = vpow2.f32 %v4725_v9  ;;  %v3424_v39 = vsel %vm672_vm4, %v9796_v31, 0.0  ;;  %v3436_v31 = vsel %vm672_vm4, %v9818_v55, 0.0 }
0x180f   :  { %v8302_v60 = vpop.eup %8301  ;;  %v4731_v45 = vmul.f32 1.442695, %v4716_v58  ;;  %v4736_v6 = vsel %vm672_vm4, %v8300_v29, 0.0  ;;  %v7690_v41 = vpack.c.bf16 %v8069_v16, %v8068_v52 }
0x1810   :  { %7218 = vmatprep.mubr.msk.f32.mxu1 %vm672_vm4, %v8302_v60  ;;  %4737 = vadd.xlane.f32.xlu1 %v4736_v6  ;;  %v4705_v46 = vpop.xlane.xlu0 %4704  ;;  %v4733_v62 = vsel %vm672_vm4, %v8302_v60, 0.0  ;;  %v8072_v8 = vpop.permute.xlu1 %8071  ;;  %v3430_v60 = vsel %vm672_vm4, %v9802_v53, 0.0  ;;  %v3427_v6 = vsel %vm672_vm4, %v9804_v36, 0.0 }
0x1811   :  { %8311 = vpow2.f32 %v4731_v45  ;;  %v4715_v50 = vsub.f32 %v10104_v63, %v4705_v46  ;;  %4734 = vadd.xlane.f32.xlu0 %v4733_v62  ;;  %v8074_v2 = vunpack.i.h.bf16 %v8072_v8  ;;  %v8073_v22 = vunpack.i.l.bf16 %v8072_v8 }
0x1812   :  { %v3421_v45 = vsel %vm672_vm4, %v9794_v21, 0.0  ;;  %v3433_v21 = vsel %vm672_vm4, %v9816_v38, 0.0 }
0x1813   :  { %v8304_v26 = vpop.eup %8303  ;;  %v4729_v34 = vmul.f32 1.442695, %v4715_v50  ;;  %v7694_v19 = vpack.c.bf16 %v8074_v2, %v8073_v22 }
0x1814   :  { %v8306_v49 = vpop.eup %8305  ;;  %v8062_v59 = vpop.permute.xlu0 %8061  ;;  %v4742_v56 = vsel %vm672_vm4, %v8304_v26, 0.0 }
0x1815   :  { %8313 = vpow2.f32 %v4729_v34  ;;  %v8064_v17 = vunpack.i.h.bf16 %v8062_v59  ;;  %v8063_v28 = vunpack.i.l.bf16 %v8062_v59  ;;  %4743 = vadd.xlane.f32.xlu1 %v4742_v56  ;;  %v4739_v12 = vsel %vm672_vm4, %v8306_v49, 0.0 }
0x1816   :  { %4740 = vadd.xlane.f32.xlu0 %v4739_v12 }
0x1817   :  { %v8308_v11 = vpop.eup %8307  ;;  %v7686_v27 = vpack.c.bf16 %v8064_v17, %v8063_v28 }
0x1818   :  { %v8310_v63 = vpop.eup %8309  ;;  %v4748_v48 = vsel %vm672_vm4, %v8308_v11, 0.0 }
0x1819   :  { %4749 = vadd.xlane.f32.xlu1 %v4748_v48  ;;  %v4745_v35 = vsel %vm672_vm4, %v8310_v63, 0.0  ;;  %7687 = vmatprep.subr.bf16.mxu1 %v7686_v27 }
0x181a   :  { %4746 = vadd.xlane.f32.xlu0 %v4745_v35  ;;  %7689 = vmatpush3.bf16.msra.mxu1 %v7686_v27 }
0x181b   :  { %v8312_v3 = vpop.eup %8311  ;;  %7691 = vmatprep.subr.bf16.mxu1 %v7690_v41 }
0x181c   :  { %v4754_v7 = vsel %vm672_vm4, %v8312_v3, 0.0 }
0x181d   :  { %4755 = vadd.xlane.f32.xlu1 %v4754_v7 }
0x181e   :  { %7693 = vmatpush3.bf16.msra.mxu1 %v7690_v41 }
0x181f   :  { %v8314_v9 = vpop.eup %8313  ;;  %7695 = vmatprep.subr.bf16.mxu1 %v7694_v19 }
0x1820   :  { %v4751_v58 = vsel %vm672_vm4, %v8314_v9, 0.0 }
0x1821   :  { %3425 = vadd.xlane.f32.xlu1 %v3424_v39  ;;  %4752 = vadd.xlane.f32.xlu0 %v4751_v58 }
0x1822   :  { %7697 = vmatpush3.bf16.msra.mxu1 %v7694_v19 }
0x1825   :  { %3431 = vadd.xlane.f32.xlu1 %v3430_v60  ;;  %3422 = vadd.xlane.f32.xlu0 %v3421_v45 }
0x1826   :  { %7219 = vmatmul.mubr.msk.f32.vlgmr.msra.gmra.mrb[84].mxu1 %vm672_vm4, %v8300_v29 }
0x1827   :  { %7221 = vmatprep.mubr.msk.f32.mxu1 %vm672_vm4, %v8306_v49 }
0x1829   :  { %3437 = vadd.xlane.f32.xlu1 %v3436_v31  ;;  %3428 = vadd.xlane.f32.xlu0 %v3427_v6 }
0x182a   :  { %7222 = vmatmul.mubr.msk.f32.gmra.mrb[86].mxu1 %vm672_vm4, %v8304_v26 }
0x182b   :  { %7224 = vmatprep.mubr.msk.f32.mxu1 %vm672_vm4, %v8310_v63 }
0x182d   :  { %3434 = vadd.xlane.f32.xlu0 %v3433_v21 }
0x182e   :  { %7225 = vmatmul.mubr.msk.f32.gmra.mrb[88].mxu1 %vm672_vm4, %v8308_v11 }
0x182f   :  { %7227 = vmatprep.mubr.msk.f32.mxu1 %vm672_vm4, %v8314_v9 }
0x1832   :  { %7228 = vmatmul.mubr.msk.f32.gmra.mrb[90].mxu1 %vm672_vm4, %v8312_v3 }
0x1841   :  { %v3835_v53 = vpop.xlane.xlu1 %3834 }
0x1842   :  { %8315 = vrcp.f32 %v3835_v53 }
0x1845   :  { %v4288_v55 = vpop.xlane.xlu1 %4287  ;;  %v3838_v36 = vpop.xlane.xlu0 %3837 }
0x1846   :  { %8317 = vrcp.f32 %v4288_v55 }
0x1847   :  { %8319 = vrcp.f32 %v3838_v36 }
0x1849   :  { %v3844_v29 = vpop.xlane.xlu1 %3843  ;;  %v4285_v23 = vpop.xlane.xlu0 %4284 }
0x184a   :  { %8321 = vrcp.f32 %v3844_v29 }
0x184b   :  { %8323 = vrcp.f32 %v4285_v23 }
0x184c   :  { %v8316_v46 = vpop.eup %8315 }
0x184d   :  { %v4294_v62 = vpop.xlane.xlu1 %4293  ;;  %v3841_v38 = vpop.xlane.xlu0 %3840  ;;  %v4018_v50 = vmul.f32 %v8316_v46, %v9961_v14 }
0x184e   :  { %8325 = vrcp.f32 %v4294_v62 }
0x184f   :  { %8327 = vrcp.f32 %v3841_v38  ;;  %4034 = vrot.lane.b32.xlu0 %v4018_v50, %s8463_s23 }
0x1850   :  { %v8318_v26 = vpop.eup %8317 }
0x1851   :  { %v8320_v34 = vpop.eup %8319  ;;  %v3850_v49 = vpop.xlane.xlu1 %3849  ;;  %v4469_v52 = vmul.f32 %v8318_v26, %v10062_v25 }
0x1852   :  { %v4291_v16 = vpop.xlane.xlu0 %4290  ;;  %8329 = vrcp.f32 %v3850_v49  ;;  %v4019_v59 = vmul.f32 %v8320_v34, %v9959_v61 }
0x1853   :  { %8331 = vrcp.f32 %v4291_v16  ;;  %4486 = vrot.lane.b32.xlu0 %v4469_v52, %s8464_s4 }
0x1854   :  { %v8322_v56 = vpop.eup %8321  ;;  %4036 = vrot.lane.b32.xlu1 %v4019_v59, %s8463_s23 }
0x1855   :  { %v8324_v14 = vpop.eup %8323  ;;  %v4300_v17 = vpop.xlane.xlu1 %4299  ;;  %v4021_v12 = vmul.f32 %v8322_v56, %v9963_v20 }
0x1856   :  { %v3847_v28 = vpop.xlane.xlu0 %3846  ;;  %8333 = vrcp.f32 %v4300_v17  ;;  %v4468_v8 = vmul.f32 %v8324_v14, %v10064_v32 }
0x1857   :  { %8335 = vrcp.f32 %v3847_v28  ;;  %4040 = vrot.lane.b32.xlu0 %v4021_v12, %s8463_s23 }
0x1858   :  { %v8326_v25 = vpop.eup %8325  ;;  %4484 = vrot.lane.b32.xlu1 %v4468_v8, %s8464_s4 }
0x1859   :  { %v8328_v61 = vpop.eup %8327  ;;  %v3856_v11 = vpop.xlane.xlu1 %3855  ;;  %v4471_v63 = vmul.f32 %v8326_v25, %v10066_v18 }
0x185a   :  { %v4297_v27 = vpop.xlane.xlu0 %4296  ;;  %8337 = vrcp.f32 %v3856_v11  ;;  %v4020_v48 = vmul.f32 %v8328_v61, %v9965_v10 }
0x185b   :  { %8339 = vrcp.f32 %v4297_v27  ;;  %4490 = vrot.lane.b32.xlu0 %v4471_v63, %s8464_s4 }
0x185c   :  { %v8330_v20 = vpop.eup %8329  ;;  %4038 = vrot.lane.b32.xlu1 %v4020_v48, %s8463_s23 }
0x185d   :  { %v8332_v32 = vpop.eup %8331  ;;  %v4306_v41 = vpop.xlane.xlu1 %4305  ;;  %v4023_v22 = vmul.f32 %v8330_v20, %v9967_v5 }
0x185e   :  { %v3853_v2 = vpop.xlane.xlu0 %3852  ;;  %8341 = vrcp.f32 %v4306_v41  ;;  %v4470_v35 = vmul.f32 %v8332_v32, %v10068_v0 }
0x185f   :  { %8343 = vrcp.f32 %v3853_v2  ;;  %4044 = vrot.lane.b32.xlu0 %v4023_v22, %s8463_s23 }
0x1860   :  { %v8334_v18 = vpop.eup %8333  ;;  %4488 = vrot.lane.b32.xlu1 %v4470_v35, %s8464_s4 }
0x1861   :  { %v8336_v10 = vpop.eup %8335  ;;  %v3420_v3 = vpop.xlane.xlu1 %3419  ;;  %v4473_v19 = vmul.f32 %v8334_v18, %v10070_v42 }
0x1862   :  { %v4303_v7 = vpop.xlane.xlu0 %4302  ;;  %8345 = vrcp.f32 %v3420_v3  ;;  %v4022_v9 = vmul.f32 %v8336_v10, %v9969_v4 }
0x1863   :  { %8347 = vrcp.f32 %v4303_v7  ;;  %4494 = vrot.lane.b32.xlu0 %v4473_v19, %s8464_s4  ;;  %v6183_v7 = vld [vmem:[%s10648_s7 + $0x30] sm:$0xff]  ;;  %v6184_v19 = vld [vmem:[%s10648_s7 + $0x38] sm:$0xff] }
0x1864   :  { %v8338_v5 = vpop.eup %8337  ;;  %4042 = vrot.lane.b32.xlu1 %v4022_v9, %s8463_s23  ;;  %v7702_v9 = vpack.c.bf16 %v6184_v19, %v6183_v7 }
0x1865   :  { %v8340_v0 = vpop.eup %8339  ;;  %v4025_v58 = vmul.f32 %v8338_v5, %v9971_v54 }
0x1866   :  { %v3417_v39 = vpop.xlane.xlu0 %3416  ;;  %v4472_v60 = vmul.f32 %v8340_v0, %v10072_v51 }
0x1867   :  { %8349 = vrcp.f32 %v3417_v39  ;;  %4048 = vrot.lane.b32.xlu0 %v4025_v58, %s8463_s23 }
0x1868   :  { %v8342_v45 = vpop.eup %8341  ;;  %4492 = vrot.lane.b32.xlu1 %v4472_v60, %s8464_s4 }
0x1869   :  { %v8344_v42 = vpop.eup %8343  ;;  %v4475_v4 = vmul.f32 %v8342_v45, %v10074_v43  ;;  %v6182_v43 = vld [vmem:[%s10648_s7 + $0x28] sm:$0xff] }
0x186a   :  { %v4024_v31 = vmul.f32 %v8344_v42, %v9973_v24  ;;  %v6181_v24 = vld [vmem:[%s10648_s7 + $0x20] sm:$0xff]  ;;  %s10743_s7 = smov 24  }
0x186b   :  { %4498 = vrot.lane.b32.xlu0 %v4475_v4, %s8464_s4 }
0x186c   :  { %v8346_v6 = vpop.eup %8345  ;;  %4046 = vrot.lane.b32.xlu1 %v4024_v31, %s8463_s23 }
0x186d   :  { %v8348_v21 = vpop.eup %8347  ;;  %v3601_v54 = vmul.f32 %v8346_v6, %v9843_v57  ;;  %v7698_v57 = vpack.c.bf16 %v6182_v43, %v6181_v24 }
0x186e   :  { %v4474_v51 = vmul.f32 %v8348_v21, %v10076_v1 }
0x186f   :  { %3609 = vst.msk [vmem:[#allocation2 + $0x8] sm:$0xff] %vm534_vm2, %v3601_v54  ;;  %7699 = vmatprep.subr.bf16.mxu1 %v7698_v57 }
0x1870   :  { %4496 = vrot.lane.b32.xlu1 %v4474_v51, %s8464_s4  ;;  %7701 = vmatpush3.bf16.msra.mxu1 %v7698_v57 }
0x1871   :  { %v8350_v53 = vpop.eup %8349  ;;  %7703 = vmatprep.subr.bf16.mxu1 %v7702_v9 }
0x1872   :  { %v3600_v55 = vmul.f32 %v8350_v53, %v9845_v15 }
0x1874   :  { %3608 = vst.msk [vmem:[#allocation2] sm:$0xff] %vm534_vm2, %v3600_v55  ;;  %7705 = vmatpush3.bf16.msra.mxu1 %v7702_v9 }
0x189d   :  { %v10230_v1 = vpop.xlane.xlu1 %4737 }
0x189e   :  { %v10232_v36 = vpop.xlane.xlu0 %4734 }
0x18a2   :  { %v10234_v29 = vpop.xlane.xlu1 %4743 }
0x18a3   :  { %v10236_v15 = vpop.xlane.xlu0 %4740 }
0x18a6   :  { %v10238_v23 = vpop.xlane.xlu1 %4749 }
0x18a7   :  { %v10240_v46 = vpop.xlane.xlu0 %4746 }
0x18aa   :  { %v10242_v62 = vpop.xlane.xlu1 %4755 }
0x18ae   :  { %v3426_v38 = vpop.xlane.xlu1 %3425  ;;  %v10244_v50 = vpop.xlane.xlu0 %4752 }
0x18af   :  { %8351 = vrcp.f32 %v3426_v38 }
0x18b2   :  { %v3432_v26 = vpop.xlane.xlu1 %3431  ;;  %v3423_v34 = vpop.xlane.xlu0 %3422 }
0x18b3   :  { %8353 = vrcp.f32 %v3432_v26 }
0x18b4   :  { %8355 = vrcp.f32 %v3423_v34 }
0x18b6   :  { %v3438_v49 = vpop.xlane.xlu1 %3437  ;;  %v3429_v16 = vpop.xlane.xlu0 %3428 }
0x18b7   :  { %8357 = vrcp.f32 %v3438_v49 }
0x18b8   :  { %8359 = vrcp.f32 %v3429_v16 }
0x18b9   :  { %v8352_v52 = vpop.eup %8351 }
0x18ba   :  { %v3603_v59 = vmul.f32 %v8352_v52, %v9847_v33  ;;  %v3435_v56 = vpop.xlane.xlu0 %3434 }
0x18bb   :  { %8361 = vrcp.f32 %v3435_v56 }
0x18bc   :  { %3611 = vst.msk [vmem:[#allocation2 + $0x18] sm:$0xff] %vm534_vm2, %v3603_v59  ;;  %8363 = vrcp.f32 %v10230_v1 }
0x18bd   :  { %v8354_v14 = vpop.eup %8353  ;;  %8365 = vrcp.f32 %v10232_v36 }
0x18be   :  { %v8356_v17 = vpop.eup %8355  ;;  %v3605_v28 = vmul.f32 %v8354_v14, %v9851_v37  ;;  %8367 = vrcp.f32 %v10234_v29 }
0x18bf   :  { %v3602_v12 = vmul.f32 %v8356_v17, %v9849_v13  ;;  %8369 = vrcp.f32 %v10236_v15 }
0x18c0   :  { %3613 = vst.msk [vmem:[#allocation2 + $0x28] sm:$0xff] %vm534_vm2, %v3605_v28  ;;  %8371 = vrcp.f32 %v10238_v23 }
0x18c1   :  { %v8358_v8 = vpop.eup %8357  ;;  %3610 = vst.msk [vmem:[#allocation2 + $0x10] sm:$0xff] %vm534_vm2, %v3602_v12  ;;  %v4035_v25 = vpop.permute.xlu0 %4034  ;;  %8373 = vrcp.f32 %v10240_v46 }
0x18c2   :  { %v8360_v61 = vpop.eup %8359  ;;  %v3607_v11 = vmul.f32 %v8358_v8, %v9855_v47  ;;  %4058 = vst.msk [vmem:[#allocation2] sm:$0xff] %vm1364_vm5, %v4035_v25  ;;  %8375 = vrcp.f32 %v10242_v62 }
0x18c3   :  { %v3604_v33 = vmul.f32 %v8360_v61, %v9853_v40  ;;  %8377 = vrcp.f32 %v10244_v50  ;;  %v6186_v61 = vld [vmem:[%s10649_s8 + $0x1] ss:$0 sm:$0xff] }
0x18c4   :  { %3615 = vst.msk [vmem:[#allocation2 + $0x38] sm:$0xff] %vm534_vm2, %v3607_v11 }
0x18c5   :  { %v8362_v27 = vpop.eup %8361  ;;  %3612 = vst.msk [vmem:[#allocation2 + $0x20] sm:$0xff] %vm534_vm2, %v3604_v33  ;;  %v4487_v37 = vpop.permute.xlu0 %4486 }
0x18c6   :  { %v3606_v13 = vmul.f32 %v8362_v27, %v9857_v44  ;;  %v4037_v63 = vpop.permute.xlu1 %4036  ;;  %v8364_v5 = vpop.eup %8363 }
0x18c7   :  { %4059 = vst.msk [vmem:[#allocation2 + $0x8] sm:$0xff] %vm1364_vm5, %v4037_v63  ;;  %v8366_v39 = vpop.eup %8365  ;;  %v10744_v63 = vld [vmem:[#allocation6_spill] sm:$0xff] }
0x18c8   :  { %3614 = vst.msk [vmem:[#allocation2 + $0x30] sm:$0xff] %vm534_vm2, %v3606_v13  ;;  %v8368_v42 = vpop.eup %8367 }
0x18c9   :  { %4509 = vst.msk [vmem:[#allocation2 + $0x8] sm:$0xff] %vm1815_vm6, %v4487_v37  ;;  %v4041_v47 = vpop.permute.xlu0 %4040  ;;  %v8370_v31 = vpop.eup %8369 }
0x18ca   :  { %v4485_v48 = vpop.permute.xlu1 %4484  ;;  %4061 = vst.msk [vmem:[#allocation2 + $0x18] sm:$0xff] %vm1364_vm5, %v4041_v47  ;;  %v8372_v51 = vpop.eup %8371 }
0x18cb   :  { %4508 = vst.msk [vmem:[#allocation2] sm:$0xff] %vm1815_vm6, %v4485_v48  ;;  %v8374_v55 = vpop.eup %8373 }
0x18cc   :  { %v8376_v1 = vpop.eup %8375 }
0x18cd   :  { %v4491_v40 = vpop.permute.xlu0 %4490  ;;  %v8378_v29 = vpop.eup %8377 }
0x18ce   :  { %v4039_v20 = vpop.permute.xlu1 %4038  ;;  %4511 = vst.msk [vmem:[#allocation2 + $0x18] sm:$0xff] %vm1815_vm6, %v4491_v40 }
0x18cf   :  { %4060 = vst.msk [vmem:[#allocation2 + $0x10] sm:$0xff] %vm1364_vm5, %v4039_v20 }
0x18d1   :  { %v4045_v44 = vpop.permute.xlu0 %4044 }
0x18d2   :  { %v4489_v32 = vpop.permute.xlu1 %4488  ;;  %4063 = vst.msk [vmem:[#allocation2 + $0x28] sm:$0xff] %vm1364_vm5, %v4045_v44 }
0x18d3   :  { %4510 = vst.msk [vmem:[#allocation2 + $0x10] sm:$0xff] %vm1815_vm6, %v4489_v32 }
0x18d5   :  { %v4495_v41 = vpop.permute.xlu0 %4494 }
0x18d6   :  { %v4043_v2 = vpop.permute.xlu1 %4042  ;;  %4513 = vst.msk [vmem:[#allocation2 + $0x28] sm:$0xff] %vm1815_vm6, %v4495_v41 }
0x18d7   :  { %4062 = vst.msk [vmem:[#allocation2 + $0x20] sm:$0xff] %vm1364_vm5, %v4043_v2  ;;  %v10745_v2 = vld [vmem:[#allocation8_spill] sm:$0xff] }
0x18d9   :  { %v4049_v22 = vpop.permute.xlu0 %4048 }
0x18da   :  { %v4493_v35 = vpop.permute.xlu1 %4492  ;;  %4065 = vst.msk [vmem:[#allocation2 + $0x38] sm:$0xff] %vm1364_vm5, %v4049_v22 }
0x18db   :  { %4512 = vst.msk [vmem:[#allocation2 + $0x20] sm:$0xff] %vm1815_vm6, %v4493_v35  ;;  %v10746_v35 = vld [vmem:[#allocation7_spill] sm:$0xff] }
0x18dd   :  { %v4499_v18 = vpop.permute.xlu0 %4498 }
0x18de   :  { %v4047_v10 = vpop.permute.xlu1 %4046  ;;  %4515 = vst.msk [vmem:[#allocation2 + $0x38] sm:$0xff] %vm1815_vm6, %v4499_v18 }
0x18df   :  { %4064 = vst.msk [vmem:[#allocation2 + $0x30] sm:$0xff] %vm1364_vm5, %v4047_v10 }
0x18e2   :  { %v4497_v3 = vpop.permute.xlu1 %4496 }
0x18e3   :  { %4514 = vst.msk [vmem:[#allocation2 + $0x30] sm:$0xff] %vm1815_vm6, %v4497_v3 }
0x18f9   :  { %v7220_v0 = vpop.f32.mrb[84].mxu1 }
0x18fa   :  { %v4919_v58 = vmul.f32 %v8364_v5, %v7220_v0  ;;  %v4879_v60 = vpop.f32.mrb[85].mxu1  ;;  %v10747_v5 = vld [vmem:[#allocation10_spill] sm:$0xff] }
0x18fb   :  { %v4918_v45 = vmul.f32 %v8366_v39, %v4879_v60  ;;  %v10748_v39 = vld [vmem:[#allocation9_spill] sm:$0xff] }
0x18fc   :  { %4936 = vrot.lane.b32.xlu0 %v4919_v58, %s10743_s7 }
0x18fd   :  { %4934 = vrot.lane.b32.xlu1 %v4918_v45, %s10743_s7  ;;  %v7223_v4 = vpop.f32.mrb[86].mxu1 }
0x18fe   :  { %v4921_v6 = vmul.f32 %v8368_v42, %v7223_v4  ;;  %v4889_v21 = vpop.f32.mrb[87].mxu1 }
0x18ff   :  { %v4920_v54 = vmul.f32 %v8370_v31, %v4889_v21  ;;  %v10749_v21 = vld [vmem:[#allocation13_spill] sm:$0xff] }
0x1900   :  { %4940 = vrot.lane.b32.xlu0 %v4921_v6, %s10743_s7 }
0x1901   :  { %4938 = vrot.lane.b32.xlu1 %v4920_v54, %s10743_s7  ;;  %v7226_v53 = vpop.f32.mrb[88].mxu1 }
0x1902   :  { %v4923_v24 = vmul.f32 %v8372_v51, %v7226_v53  ;;  %v4899_v43 = vpop.f32.mrb[89].mxu1  ;;  %v10750_v51 = vld [vmem:[#allocation11_spill] sm:$0xff] }
0x1903   :  { %v4922_v57 = vmul.f32 %v8374_v55, %v4899_v43 }
0x1904   :  { %4944 = vrot.lane.b32.xlu0 %v4923_v24, %s10743_s7 }
0x1905   :  { %4942 = vrot.lane.b32.xlu1 %v4922_v57, %s10743_s7  ;;  %v7229_v36 = vpop.f32.mrb[90].mxu1 }
0x1906   :  { %v4925_v15 = vmul.f32 %v8376_v1, %v7229_v36  ;;  %v4909_v23 = vpop.f32.mrb[91].mxu1 }
0x1907   :  { %v4924_v46 = vmul.f32 %v8378_v29, %v4909_v23 }
0x1908   :  { %4948 = vrot.lane.b32.xlu0 %v4925_v15, %s10743_s7 }
0x1909   :  { %4946 = vrot.lane.b32.xlu1 %v4924_v46, %s10743_s7 }
0x196e   :  { %v4937_v62 = vpop.permute.xlu0 %4936 }
0x196f   :  { %4959 = vst.msk [vmem:[#allocation2 + $0x8] sm:$0xff] %vm2266_vm7, %v4937_v62  ;;  %v4935_v38 = vpop.permute.xlu1 %4934 }
0x1970   :  { %4958 = vst.msk [vmem:[#allocation2] sm:$0xff] %vm2266_vm7, %v4935_v38 }
0x1972   :  { %v4941_v50 = vpop.permute.xlu0 %4940 }
0x1973   :  { %4961 = vst.msk [vmem:[#allocation2 + $0x18] sm:$0xff] %vm2266_vm7, %v4941_v50  ;;  %v4939_v26 = vpop.permute.xlu1 %4938 }
0x1974   :  { %4960 = vst.msk [vmem:[#allocation2 + $0x10] sm:$0xff] %vm2266_vm7, %v4939_v26 }
0x1976   :  { %v4945_v34 = vpop.permute.xlu0 %4944  ;;  %v4967_v52 = vld [vmem:[#allocation2 + $0x8] sm:$0xff] }
0x1977   :  { %4963 = vst.msk [vmem:[#allocation2 + $0x28] sm:$0xff] %vm2266_vm7, %v4945_v34  ;;  %v4943_v49 = vpop.permute.xlu1 %4942  ;;  %v4966_v16 = vld [vmem:[#allocation2] sm:$0xff] }
0x1978   :  { %4962 = vst.msk [vmem:[#allocation2 + $0x20] sm:$0xff] %vm2266_vm7, %v4943_v49  ;;  %7238 = vmatprep.mubr.msk.f32.mxu1 %vm232_vm1, %v4966_v16 }
0x1979   :  { %7239 = vmatmul.mubr.msk.f32.vlgmr.msra.gmra.mrb[92].mxu1 %vm232_vm1, %v4967_v52 }
0x197a   :  { %v4949_v59 = vpop.permute.xlu0 %4948  ;;  %v4969_v17 = vld [vmem:[#allocation2 + $0x18] sm:$0xff] }
0x197b   :  { %4965 = vst.msk [vmem:[#allocation2 + $0x38] sm:$0xff] %vm2266_vm7, %v4949_v59  ;;  %v4947_v56 = vpop.permute.xlu1 %4946  ;;  %v4968_v14 = vld [vmem:[#allocation2 + $0x10] sm:$0xff] }
0x197c   :  { %4964 = vst.msk [vmem:[#allocation2 + $0x30] sm:$0xff] %vm2266_vm7, %v4947_v56  ;;  %7241 = vmatprep.mubr.msk.f32.mxu1 %vm232_vm1, %v4968_v14 }
0x197d   :  { %7242 = vmatmul.mubr.msk.f32.gmra.mrb[94].mxu1 %vm232_vm1, %v4969_v17 }
0x197e   :  { %v4971_v12 = vld [vmem:[#allocation2 + $0x28] sm:$0xff] }
0x197f   :  { %v4970_v28 = vld [vmem:[#allocation2 + $0x20] sm:$0xff] }
0x1980   :  { %7244 = vmatprep.mubr.msk.f32.mxu1 %vm232_vm1, %v4970_v28 }
0x1981   :  { %7245 = vmatmul.mubr.msk.f32.gmra.mrb[96].mxu1 %vm232_vm1, %v4971_v12 }
0x1982   :  { %v4973_v25 = vld [vmem:[#allocation2 + $0x38] sm:$0xff] }
0x1983   :  { %v4972_v8 = vld [vmem:[#allocation2 + $0x30] sm:$0xff] }
0x1984   :  { %7247 = vmatprep.mubr.msk.f32.mxu1 %vm232_vm1, %v4972_v8 }
0x1985   :  { %7248 = vmatmul.mubr.msk.f32.gmra.mrb[98].mxu1 %vm232_vm1, %v4973_v25 }
0x1a4c   :  { %v7240_v11 = vpop.f32.mrb[92].mxu1 }
0x1a4d   :  { %v5083_v33 = vadd.f32 %v7240_v11, %v6186_v61  ;;  %v5077_v27 = vpop.f32.mrb[93].mxu1 }
0x1a4e   :  { %v5078_v37 = vadd.f32 %v6186_v61, %v5077_v27 }
0x1a4f   :  { %v5117_v13 = vadd.f32 %v5083_v33, %v9617_v30 }
0x1a50   :  { %v5116_v47 = vadd.f32 %v5078_v37, %v10744_v63  ;;  %v7243_v48 = vpop.f32.mrb[94].mxu1 }
0x1a51   :  { %v5093_v40 = vadd.f32 %v7243_v48, %v6186_v61  ;;  %v5087_v20 = vpop.f32.mrb[95].mxu1  ;;  %v5131_v44 = vsel %vm232_vm1, %v5117_v13, 0.0 }
0x1a52   :  { %v5088_v32 = vadd.f32 %v6186_v61, %v5087_v20  ;;  %5132 = vadd.xlane.f32.xlu0 %v5131_v44  ;;  %v5128_v41 = vsel %vm232_vm1, %v5116_v47, 0.0 }
0x1a53   :  { %v5119_v22 = vadd.f32 %v5093_v40, %v10745_v2  ;;  %5129 = vadd.xlane.f32.xlu1 %v5128_v41 }
0x1a54   :  { %v5118_v18 = vadd.f32 %v5088_v32, %v10746_v35  ;;  %v7246_v10 = vpop.f32.mrb[96].mxu1  ;;  %v6199_v35 = vld [vmem:[%s10652_s11 + $0x20] sm:$0xff] }
0x1a55   :  { %v5103_v3 = vadd.f32 %v7246_v10, %v6186_v61  ;;  %v5097_v7 = vpop.f32.mrb[97].mxu1  ;;  %v5137_v30 = vsel %vm232_vm1, %v5119_v22, 0.0 }
0x1a56   :  { %v5098_v19 = vadd.f32 %v6186_v61, %v5097_v7  ;;  %v5134_v9 = vsel %vm232_vm1, %v5118_v18, 0.0  ;;  %v6202_v7 = vld [vmem:[%s10652_s11 + $0x38] sm:$0xff] }
0x1a57   :  { %v5121_v0 = vadd.f32 %v5103_v3, %v10747_v5  ;;  %5135 = vadd.xlane.f32.xlu0 %v5134_v9  ;;  %5138 = vadd.xlane.f32.xlu1 %v5137_v30  ;;  %v6201_v3 = vld [vmem:[%s10652_s11 + $0x30] sm:$0xff] }
0x1a58   :  { %v5120_v58 = vadd.f32 %v5098_v19, %v10748_v39  ;;  %v7249_v60 = vpop.f32.mrb[98].mxu1  ;;  %v7710_v30 = vpack.c.bf16 %v6202_v7, %v6201_v3  ;;  %v6215_v3 = vld [vmem:[%s10654_s13 + $0x50] sm:$0xff]  ;;  %v6216_v7 = vld [vmem:[%s10654_s13 + $0x58] sm:$0xff] }
0x1a59   :  { %v5113_v45 = vadd.f32 %v7249_v60, %v6186_v61  ;;  %v5107_v42 = vpop.f32.mrb[99].mxu1  ;;  %v5143_v4 = vsel %vm232_vm1, %v5121_v0, 0.0 }
0x1a5a   :  { %v5108_v31 = vadd.f32 %v6186_v61, %v5107_v42  ;;  %v5140_v6 = vsel %vm232_vm1, %v5120_v58, 0.0 }
0x1a5b   :  { %v5123_v54 = vadd.f32 %v5113_v45, %v10749_v21  ;;  %5141 = vadd.xlane.f32.xlu0 %v5140_v6  ;;  %5144 = vadd.xlane.f32.xlu1 %v5143_v4 }
0x1a5c   :  { %v5122_v53 = vadd.f32 %v5108_v31, %v10750_v51 }
0x1a5d   :  { %v5149_v55 = vsel %vm232_vm1, %v5123_v54, 0.0 }
0x1a5e   :  { %v5146_v24 = vsel %vm232_vm1, %v5122_v53, 0.0 }
0x1a5f   :  { %5150 = vadd.xlane.f32.xlu1 %v5149_v55  ;;  %5147 = vadd.xlane.f32.xlu0 %v5146_v24 }
0x1adf   :  { %v5133_v43 = vpop.xlane.xlu0 %5132 }
0x1ae0   :  { %v5153_v57 = vmul.f32 0.03125, %v5133_v43  ;;  %v5130_v1 = vpop.xlane.xlu1 %5129 }
0x1ae1   :  { %v5152_v36 = vmul.f32 0.03125, %v5130_v1 }
0x1ae2   :  { %v10331_v29 = vsub.f32 %v5117_v13, %v5153_v57 }
0x1ae3   :  { %v10333_v15 = vsub.f32 %v5116_v47, %v5152_v36 }
0x1ae4   :  { %v5136_v23 = vpop.xlane.xlu0 %5135  ;;  %v5139_v46 = vpop.xlane.xlu1 %5138  ;;  %v5169_v62 = vmul.f32 %v10331_v29, %v10331_v29 }
0x1ae5   :  { %v5154_v38 = vmul.f32 0.03125, %v5136_v23  ;;  %v5155_v50 = vmul.f32 0.03125, %v5139_v46  ;;  %v5168_v26 = vmul.f32 %v10333_v15, %v10333_v15  ;;  %v6197_v46 = vld [vmem:[%s10650_s9 + $0x1] ss:$0 sm:$0xff] }
0x1ae6   :  { %v5179_v34 = vsel %vm232_vm1, %v5169_v62, 0.0 }
0x1ae7   :  { %v10340_v49 = vsub.f32 %v5118_v18, %v5154_v38  ;;  %v10342_v16 = vsub.f32 %v5119_v22, %v5155_v50  ;;  %5180 = vadd.xlane.f32.xlu1 %v5179_v34  ;;  %v5176_v52 = vsel %vm232_vm1, %v5168_v26, 0.0  ;;  %v6200_v18 = vld [vmem:[%s10652_s11 + $0x28] sm:$0xff] }
0x1ae8   :  { %v5142_v59 = vpop.xlane.xlu0 %5141  ;;  %5177 = vadd.xlane.f32.xlu0 %v5176_v52  ;;  %v5145_v56 = vpop.xlane.xlu1 %5144  ;;  %v7706_v10 = vpack.c.bf16 %v6200_v18, %v6199_v35  ;;  %v6198_v52 = vld [vmem:[%s10651_s10 + $0x1] ss:$0 sm:$0xff] }
0x1ae9   :  { %v5156_v14 = vmul.f32 0.03125, %v5142_v59  ;;  %v5157_v17 = vmul.f32 0.03125, %v5145_v56  ;;  %v5170_v28 = vmul.f32 %v10340_v49, %v10340_v49  ;;  %v5171_v12 = vmul.f32 %v10342_v16, %v10342_v16 }
0x1aea   :  { %7707 = vmatprep.subr.bf16.mxu0 %v7706_v10 }
0x1aeb   :  { %v10349_v8 = vsub.f32 %v5120_v58, %v5156_v14  ;;  %v10351_v25 = vsub.f32 %v5121_v0, %v5157_v17  ;;  %v5182_v61 = vsel %vm232_vm1, %v5170_v28, 0.0  ;;  %v5185_v11 = vsel %vm232_vm1, %v5171_v12, 0.0  ;;  %7709 = vmatpush3.bf16.msra.mxu0 %v7706_v10 }
0x1aec   :  { %v5148_v33 = vpop.xlane.xlu0 %5147  ;;  %5183 = vadd.xlane.f32.xlu0 %v5182_v61  ;;  %5186 = vadd.xlane.f32.xlu1 %v5185_v11  ;;  %v5151_v27 = vpop.xlane.xlu1 %5150 }
0x1aed   :  { %v5158_v37 = vmul.f32 0.03125, %v5148_v33  ;;  %v5159_v13 = vmul.f32 0.03125, %v5151_v27  ;;  %v5172_v63 = vmul.f32 %v10349_v8, %v10349_v8  ;;  %v5173_v47 = vmul.f32 %v10351_v25, %v10351_v25  ;;  %7711 = vmatprep.subr.bf16.mxu0 %v7710_v30 }
0x1aef   :  { %v10359_v48 = vsub.f32 %v5122_v53, %v5158_v37  ;;  %v10361_v40 = vsub.f32 %v5123_v54, %v5159_v13  ;;  %v5188_v20 = vsel %vm232_vm1, %v5172_v63, 0.0  ;;  %v5191_v44 = vsel %vm232_vm1, %v5173_v47, 0.0  ;;  %7713 = vmatpush3.bf16.msra.mxu0 %v7710_v30 }
0x1af0   :  { %5189 = vadd.xlane.f32.xlu0 %v5188_v20  ;;  %5192 = vadd.xlane.f32.xlu1 %v5191_v44  ;;  %v7718_v30 = vpack.c.bf16 %v6216_v7, %v6215_v3 }
0x1af1   :  { %v5174_v32 = vmul.f32 %v10359_v48, %v10359_v48  ;;  %v5175_v41 = vmul.f32 %v10361_v40, %v10361_v40 }
0x1af3   :  { %v5194_v2 = vsel %vm232_vm1, %v5174_v32, 0.0  ;;  %v5197_v22 = vsel %vm232_vm1, %v5175_v41, 0.0 }
0x1af4   :  { %5195 = vadd.xlane.f32.xlu0 %v5194_v2  ;;  %5198 = vadd.xlane.f32.xlu1 %v5197_v22 }
0x1b74   :  { %v5181_v19 = vpop.xlane.xlu1 %5180 }
0x1b75   :  { %v5201_v9 = vmul.f32 0.03125, %v5181_v19  ;;  %v5178_v5 = vpop.xlane.xlu0 %5177  ;;  %v6217_v19 = vld [vmem:[%s10654_s13 + $0x60] sm:$0xff] }
0x1b76   :  { %v5200_v0 = vmul.f32 0.03125, %v5178_v5 }
0x1b77   :  { %v5209_v39 = vadd.f32 1e-12, %v5201_v9  ;;  %v6218_v9 = vld [vmem:[%s10654_s13 + $0x68] sm:$0xff] }
0x1b78   :  { %v5208_v58 = vadd.f32 1e-12, %v5200_v0  ;;  %v7722_v5 = vpack.c.bf16 %v6218_v9, %v6217_v19  ;;  %v6219_v0 = vld [vmem:[%s10654_s13 + $0x70] sm:$0xff] }
0x1b79   :  { %8379 = vrsqrt.f32 %v5209_v39  ;;  %v5184_v60 = vpop.xlane.xlu0 %5183  ;;  %v5187_v45 = vpop.xlane.xlu1 %5186  ;;  %v6220_v39 = vld [vmem:[%s10654_s13 + $0x78] sm:$0xff] }
0x1b7a   :  { %8381 = vrsqrt.f32 %v5208_v58  ;;  %v5202_v42 = vmul.f32 0.03125, %v5184_v60  ;;  %v5203_v4 = vmul.f32 0.03125, %v5187_v45  ;;  %v7726_v58 = vpack.c.bf16 %v6220_v39, %v6219_v0  ;;  %v6204_v60 = vld [vmem:[%s10653_s12 + $0x1] ss:$0 sm:$0xff] }
0x1b7c   :  { %v5210_v31 = vadd.f32 1e-12, %v5202_v42  ;;  %v5211_v6 = vadd.f32 1e-12, %v5203_v4 }
0x1b7d   :  { %v5190_v21 = vpop.xlane.xlu0 %5189  ;;  %v5193_v54 = vpop.xlane.xlu1 %5192 }
0x1b7e   :  { %8383 = vrsqrt.f32 %v5210_v31  ;;  %v5204_v51 = vmul.f32 0.03125, %v5190_v21  ;;  %v5205_v53 = vmul.f32 0.03125, %v5193_v54 }
0x1b7f   :  { %8385 = vrsqrt.f32 %v5211_v6 }
0x1b80   :  { %v5212_v55 = vadd.f32 1e-12, %v5204_v51  ;;  %v5213_v24 = vadd.f32 1e-12, %v5205_v53 }
0x1b81   :  { %v5196_v43 = vpop.xlane.xlu0 %5195  ;;  %v5199_v57 = vpop.xlane.xlu1 %5198 }
0x1b82   :  { %8387 = vrsqrt.f32 %v5212_v55  ;;  %v5206_v1 = vmul.f32 0.03125, %v5196_v43  ;;  %v5207_v36 = vmul.f32 0.03125, %v5199_v57 }
0x1b83   :  { %v8380_v23 = vpop.eup %8379  ;;  %8389 = vrsqrt.f32 %v5213_v24 }
0x1b84   :  { %v8382_v62 = vpop.eup %8381  ;;  %v5225_v38 = vmul.f32 %v8380_v23, %v10331_v29  ;;  %v5214_v50 = vadd.f32 1e-12, %v5206_v1  ;;  %v5215_v26 = vadd.f32 1e-12, %v5207_v36 }
0x1b85   :  { %v5224_v34 = vmul.f32 %v8382_v62, %v10333_v15 }
0x1b86   :  { %v5239_v59 = vmul.f32 %v6197_v46, %v5225_v38  ;;  %8391 = vrsqrt.f32 %v5214_v50 }
0x1b87   :  { %8393 = vrsqrt.f32 %v5215_v26  ;;  %v5238_v56 = vmul.f32 %v6197_v46, %v5224_v34 }
0x1b88   :  { %v8384_v14 = vpop.eup %8383  ;;  %v10394_v61 = vadd.f32 %v6198_v52, %v5239_v59 }
0x1b89   :  { %v8386_v17 = vpop.eup %8385  ;;  %v10391_v28 = vadd.f32 %v6198_v52, %v5238_v56  ;;  %v5226_v12 = vmul.f32 %v8384_v14, %v10340_v49 }
0x1b8a   :  { %v5227_v29 = vmul.f32 %v8386_v17, %v10342_v16 }
0x1b8b   :  { %7258 = vmatprep.mubr.msk.f32.mxu0 %vm232_vm1, %v10391_v28  ;;  %v5240_v15 = vmul.f32 %v6197_v46, %v5226_v12 }
0x1b8c   :  { %v8388_v11 = vpop.eup %8387  ;;  %7259 = vmatmul.mubr.msk.f32.vlgmr.msra.gmra.mrb[92].mxu0 %vm232_vm1, %v10394_v61  ;;  %v5241_v33 = vmul.f32 %v6197_v46, %v5227_v29 }
0x1b8d   :  { %v8390_v27 = vpop.eup %8389  ;;  %v10401_v37 = vadd.f32 %v6198_v52, %v5240_v15  ;;  %v5228_v13 = vmul.f32 %v8388_v11, %v10349_v8 }
0x1b8e   :  { %v10404_v63 = vadd.f32 %v6198_v52, %v5241_v33  ;;  %v5229_v49 = vmul.f32 %v8390_v27, %v10351_v25 }
0x1b8f   :  { %7261 = vmatprep.mubr.msk.f32.mxu0 %vm232_vm1, %v10401_v37  ;;  %v5242_v16 = vmul.f32 %v6197_v46, %v5228_v13 }
0x1b90   :  { %v8392_v47 = vpop.eup %8391  ;;  %7262 = vmatmul.mubr.msk.f32.gmra.mrb[94].mxu0 %vm232_vm1, %v10404_v63  ;;  %v5243_v20 = vmul.f32 %v6197_v46, %v5229_v49 }
0x1b91   :  { %v8394_v44 = vpop.eup %8393  ;;  %v10411_v32 = vadd.f32 %v6198_v52, %v5242_v16  ;;  %v5230_v41 = vmul.f32 %v8392_v47, %v10359_v48  ;;  %v6213_v48 = vld [vmem:[%s10654_s13 + $0x40] sm:$0xff] }
0x1b92   :  { %v10414_v2 = vadd.f32 %v6198_v52, %v5243_v20  ;;  %v5231_v8 = vmul.f32 %v8394_v44, %v10361_v40  ;;  %v6214_v40 = vld [vmem:[%s10654_s13 + $0x48] sm:$0xff] }
0x1b93   :  { %7264 = vmatprep.mubr.msk.f32.mxu0 %vm232_vm1, %v10411_v32  ;;  %v5244_v25 = vmul.f32 %v6197_v46, %v5230_v41  ;;  %v7714_v10 = vpack.c.bf16 %v6214_v40, %v6213_v48 }
0x1b94   :  { %7265 = vmatmul.mubr.msk.f32.gmra.mrb[96].mxu0 %vm232_vm1, %v10414_v2  ;;  %v5245_v22 = vmul.f32 %v6197_v46, %v5231_v8 }
0x1b95   :  { %v10421_v35 = vadd.f32 %v6198_v52, %v5244_v25  ;;  %7715 = vmatprep.subr.bf16.mxu1 %v7714_v10 }
0x1b96   :  { %v10423_v18 = vadd.f32 %v6198_v52, %v5245_v22  ;;  %7717 = vmatpush3.bf16.msra.mxu1 %v7714_v10 }
0x1b97   :  { %7267 = vmatprep.mubr.msk.f32.mxu0 %vm232_vm1, %v10421_v35  ;;  %7719 = vmatprep.subr.bf16.mxu1 %v7718_v30 }
0x1b98   :  { %7268 = vmatmul.mubr.msk.f32.gmra.mrb[98].mxu0 %vm232_vm1, %v10423_v18 }
0x1b9a   :  { %7721 = vmatpush3.bf16.msra.mxu1 %v7718_v30 }
0x1b9b   :  { %7723 = vmatprep.subr.bf16.mxu1 %v7722_v5 }
0x1b9e   :  { %7725 = vmatpush3.bf16.msra.mxu1 %v7722_v5 }
0x1b9f   :  { %7727 = vmatprep.subr.bf16.mxu1 %v7726_v58 }
0x1ba2   :  { %7729 = vmatpush3.bf16.msra.mxu1 %v7726_v58 }
0x1c5f   :  { %v7260_v45 = vpop.f32.mrb[92].mxu0 }
0x1c60   :  { %v10456_v42 = vadd.f32 %v7260_v45, %v6204_v60  ;;  %v5363_v4 = vpop.f32.mrb[93].mxu0 }
0x1c61   :  { %v10458_v31 = vadd.f32 %v6204_v60, %v5363_v4 }
0x1c62   :  { %v5403_v6 = vmul.f32 %v10456_v42, %v10456_v42 }
0x1c63   :  { %v5402_v21 = vmul.f32 %v10458_v31, %v10458_v31  ;;  %v7263_v54 = vpop.f32.mrb[94].mxu0 }
0x1c64   :  { %v5411_v51 = vmul.f32 %v5403_v6, %v10456_v42  ;;  %v10465_v53 = vadd.f32 %v7263_v54, %v6204_v60  ;;  %v5373_v55 = vpop.f32.mrb[95].mxu0 }
0x1c65   :  { %v5410_v24 = vmul.f32 %v5402_v21, %v10458_v31  ;;  %v10468_v43 = vadd.f32 %v6204_v60, %v5373_v55 }
0x1c66   :  { %v5419_v57 = vmul.f32 0.044715, %v5411_v51  ;;  %v5405_v1 = vmul.f32 %v10465_v53, %v10465_v53 }
0x1c67   :  { %v5418_v36 = vmul.f32 0.044715, %v5410_v24  ;;  %v5404_v23 = vmul.f32 %v10468_v43, %v10468_v43  ;;  %v7266_v46 = vpop.f32.mrb[96].mxu0 }
0x1c68   :  { %v5427_v62 = vadd.f32 %v5419_v57, %v10456_v42  ;;  %v5413_v38 = vmul.f32 %v5405_v1, %v10465_v53  ;;  %v10476_v50 = vadd.f32 %v7266_v46, %v6204_v60  ;;  %v5383_v26 = vpop.f32.mrb[97].mxu0 }
0x1c69   :  { %v5426_v34 = vadd.f32 %v5418_v36, %v10458_v31  ;;  %v5412_v52 = vmul.f32 %v5404_v23, %v10468_v43  ;;  %v10480_v59 = vadd.f32 %v6204_v60, %v5383_v26 }
0x1c6a   :  { %v5435_v56 = vmul.f32 0.7978846, %v5427_v62  ;;  %v5421_v14 = vmul.f32 0.044715, %v5413_v38  ;;  %v5407_v17 = vmul.f32 %v10476_v50, %v10476_v50 }
0x1c6b   :  { %v5434_v12 = vmul.f32 0.7978846, %v5426_v34  ;;  %v5420_v29 = vmul.f32 0.044715, %v5412_v52  ;;  %v5406_v15 = vmul.f32 %v10480_v59, %v10480_v59  ;;  %v7269_v11 = vpop.f32.mrb[98].mxu0 }
0x1c6c   :  { %8395 = vtanh.f32 %v5435_v56  ;;  %v5429_v33 = vadd.f32 %v5421_v14, %v10465_v53  ;;  %v5415_v27 = vmul.f32 %v5407_v17, %v10476_v50  ;;  %v10488_v13 = vadd.f32 %v7269_v11, %v6204_v60  ;;  %v5393_v49 = vpop.f32.mrb[99].mxu0 }
0x1c6d   :  { %8397 = vtanh.f32 %v5434_v12  ;;  %v5428_v16 = vadd.f32 %v5420_v29, %v10468_v43  ;;  %v5414_v47 = vmul.f32 %v5406_v15, %v10480_v59  ;;  %v5394_v20 = vadd.f32 %v6204_v60, %v5393_v49 }
0x1c6e   :  { %v5437_v44 = vmul.f32 0.7978846, %v5429_v33  ;;  %v5423_v41 = vmul.f32 0.044715, %v5415_v27  ;;  %v5409_v8 = vmul.f32 %v10488_v13, %v10488_v13 }
0x1c6f   :  { %v5436_v25 = vmul.f32 0.7978846, %v5428_v16  ;;  %v5422_v22 = vmul.f32 0.044715, %v5414_v47  ;;  %v5408_v48 = vmul.f32 %v5394_v20, %v5394_v20 }
0x1c70   :  { %8399 = vtanh.f32 %v5437_v44  ;;  %v5431_v40 = vadd.f32 %v5423_v41, %v10476_v50  ;;  %v5417_v10 = vmul.f32 %v5409_v8, %v10488_v13 }
0x1c71   :  { %8401 = vtanh.f32 %v5436_v25  ;;  %v5430_v3 = vadd.f32 %v5422_v22, %v10480_v59  ;;  %v5416_v7 = vmul.f32 %v5408_v48, %v5394_v20 }
0x1c72   :  { %v5439_v30 = vmul.f32 0.7978846, %v5431_v40  ;;  %v5425_v19 = vmul.f32 0.044715, %v5417_v10 }
0x1c73   :  { %v5438_v9 = vmul.f32 0.7978846, %v5430_v3  ;;  %v5424_v5 = vmul.f32 0.044715, %v5416_v7 }
0x1c74   :  { %8403 = vtanh.f32 %v5439_v30  ;;  %v5433_v0 = vadd.f32 %v5425_v19, %v10488_v13 }
0x1c75   :  { %8405 = vtanh.f32 %v5438_v9  ;;  %v5432_v39 = vadd.f32 %v5424_v5, %v5394_v20 }
0x1c76   :  { %v8396_v58 = vpop.eup %8395  ;;  %v5441_v60 = vmul.f32 0.7978846, %v5433_v0 }
0x1c77   :  { %v8398_v45 = vpop.eup %8397  ;;  %v5451_v4 = vadd.f32 1.0, %v8396_v58  ;;  %v5440_v6 = vmul.f32 0.7978846, %v5432_v39 }
0x1c78   :  { %8407 = vtanh.f32 %v5441_v60  ;;  %v5450_v21 = vadd.f32 1.0, %v8398_v45 }
0x1c79   :  { %v5459_v54 = vmul.f32 0.5, %v5451_v4  ;;  %8409 = vtanh.f32 %v5440_v6 }
0x1c7a   :  { %v8400_v51 = vpop.eup %8399  ;;  %v5458_v55 = vmul.f32 0.5, %v5450_v21 }
0x1c7b   :  { %v8402_v24 = vpop.eup %8401  ;;  %v5453_v57 = vadd.f32 1.0, %v8400_v51  ;;  %v5467_v23 = vmul.f32 %v5459_v54, %v10456_v42 }
0x1c7c   :  { %v5466_v1 = vmul.f32 %v5458_v55, %v10458_v31  ;;  %v5452_v36 = vadd.f32 1.0, %v8402_v24 }
0x1c7d   :  { %v5461_v46 = vmul.f32 0.5, %v5453_v57 }
0x1c7e   :  { %v8404_v62 = vpop.eup %8403  ;;  %7286 = vmatprep.mubr.msk.f32.mxu1 %vm672_vm4, %v5466_v1  ;;  %v5460_v38 = vmul.f32 0.5, %v5452_v36 }
0x1c7f   :  { %v8406_v26 = vpop.eup %8405  ;;  %7287 = vmatmul.mubr.msk.f32.vlgmr.msra.gmra.mrb[100].mxu1 %vm672_vm4, %v5467_v23  ;;  %v5455_v34 = vadd.f32 1.0, %v8404_v62  ;;  %v5469_v14 = vmul.f32 %v5461_v46, %v10465_v53 }
0x1c80   :  { %v5468_v52 = vmul.f32 %v5460_v38, %v10468_v43  ;;  %v5454_v56 = vadd.f32 1.0, %v8406_v26 }
0x1c81   :  { %v5463_v17 = vmul.f32 0.5, %v5455_v34 }
0x1c82   :  { %v8408_v12 = vpop.eup %8407  ;;  %7289 = vmatprep.mubr.msk.f32.mxu1 %vm672_vm4, %v5468_v52  ;;  %v5462_v31 = vmul.f32 0.5, %v5454_v56 }
0x1c83   :  { %v8410_v42 = vpop.eup %8409  ;;  %7290 = vmatmul.mubr.msk.f32.gmra.mrb[102].mxu1 %vm672_vm4, %v5469_v14  ;;  %v5457_v29 = vadd.f32 1.0, %v8408_v12  ;;  %v5471_v33 = vmul.f32 %v5463_v17, %v10476_v50 }
0x1c84   :  { %v5470_v15 = vmul.f32 %v5462_v31, %v10480_v59  ;;  %v5456_v11 = vadd.f32 1.0, %v8410_v42  ;;  %v6222_v59 = vld [vmem:[%s10655_s14 + $0x1] ss:$0 sm:$0xff] }
0x1c85   :  { %v5465_v27 = vmul.f32 0.5, %v5457_v29 }
0x1c86   :  { %7292 = vmatprep.mubr.msk.f32.mxu1 %vm672_vm4, %v5470_v15  ;;  %v5464_v43 = vmul.f32 0.5, %v5456_v11 }
0x1c87   :  { %7293 = vmatmul.mubr.msk.f32.gmra.mrb[104].mxu1 %vm672_vm4, %v5471_v33  ;;  %v5473_v49 = vmul.f32 %v5465_v27, %v10488_v13 }
0x1c88   :  { %v5472_v53 = vmul.f32 %v5464_v43, %v5394_v20 }
0x1c8a   :  { %7295 = vmatprep.mubr.msk.f32.mxu1 %vm672_vm4, %v5472_v53 }
0x1c8b   :  { %7296 = vmatmul.mubr.msk.f32.gmra.mrb[106].mxu1 %vm672_vm4, %v5473_v49 }
0x1d52   :  { %v7288_v16 = vpop.f32.mrb[100].mxu1 }
0x1d53   :  { %v5587_v47 = vadd.f32 %v7288_v16, %v6222_v59  ;;  %v5581_v50 = vpop.f32.mrb[101].mxu1 }
0x1d54   :  { %v5582_v44 = vadd.f32 %v6222_v59, %v5581_v50 }
0x1d55   :  { %v5621_v41 = vadd.f32 %v5587_v47, %v10394_v61 }
0x1d56   :  { %v5620_v8 = vadd.f32 %v5582_v44, %v10391_v28  ;;  %v7291_v25 = vpop.f32.mrb[102].mxu1 }
0x1d57   :  { %v5597_v20 = vadd.f32 %v7291_v25, %v6222_v59  ;;  %v5591_v22 = vpop.f32.mrb[103].mxu1  ;;  %v5635_v13 = vsel %vm232_vm1, %v5621_v41, 0.0 }
0x1d58   :  { %v5592_v48 = vadd.f32 %v6222_v59, %v5591_v22  ;;  %5636 = vadd.xlane.f32.xlu1 %v5635_v13  ;;  %v5632_v40 = vsel %vm232_vm1, %v5620_v8, 0.0  ;;  %v5764_v22 = vld [vmem:[%s10658_s17] sm:$0xff]  ;;  %v5765_v13 = vld [vmem:[%s10658_s17 + $0x8] sm:$0xff] }
0x1d59   :  { %v5623_v10 = vadd.f32 %v5597_v20, %v10404_v63  ;;  %5633 = vadd.xlane.f32.xlu0 %v5632_v40  ;;  %v5766_v40 = vld [vmem:[%s10658_s17 + $0x10] sm:$0xff] }
0x1d5a   :  { %v5622_v3 = vadd.f32 %v5592_v48, %v10401_v37  ;;  %v7294_v7 = vpop.f32.mrb[104].mxu1  ;;  %v7730_v48 = vpack.c.bf16 %v5765_v13, %v5764_v22 }
0x1d5b   :  { %v5607_v30 = vadd.f32 %v7294_v7, %v6222_v59  ;;  %v5601_v19 = vpop.f32.mrb[105].mxu1  ;;  %v5641_v61 = vsel %vm232_vm1, %v5623_v10, 0.0 }
0x1d5c   :  { %v5602_v28 = vadd.f32 %v6222_v59, %v5601_v19  ;;  %5642 = vadd.xlane.f32.xlu1 %v5641_v61  ;;  %v5638_v9 = vsel %vm232_vm1, %v5622_v3, 0.0  ;;  %7731 = vmatprep.subr.bf16.mxu0 %v7730_v48 }
0x1d5d   :  { %v5625_v5 = vadd.f32 %v5607_v30, %v10414_v2  ;;  %5639 = vadd.xlane.f32.xlu0 %v5638_v9  ;;  %7733 = vmatpush3.bf16.msra.mxu0 %v7730_v48 }
0x1d5e   :  { %v5624_v0 = vadd.f32 %v5602_v28, %v10411_v32  ;;  %v7297_v39 = vpop.f32.mrb[106].mxu1 }
0x1d5f   :  { %v5617_v58 = vadd.f32 %v7297_v39, %v6222_v59  ;;  %v5611_v63 = vpop.f32.mrb[107].mxu1  ;;  %v5647_v60 = vsel %vm232_vm1, %v5625_v5, 0.0 }
0x1d60   :  { %v5612_v37 = vadd.f32 %v6222_v59, %v5611_v63  ;;  %5648 = vadd.xlane.f32.xlu1 %v5647_v60  ;;  %v5644_v45 = vsel %vm232_vm1, %v5624_v0, 0.0 }
0x1d61   :  { %v5627_v4 = vadd.f32 %v5617_v58, %v10423_v18  ;;  %5645 = vadd.xlane.f32.xlu0 %v5644_v45 }
0x1d62   :  { %v5626_v6 = vadd.f32 %v5612_v37, %v10421_v35 }
0x1d63   :  { %v5653_v21 = vsel %vm232_vm1, %v5627_v4, 0.0 }
0x1d64   :  { %5654 = vadd.xlane.f32.xlu1 %v5653_v21  ;;  %v5650_v2 = vsel %vm232_vm1, %v5626_v6, 0.0 }
0x1d65   :  { %5651 = vadd.xlane.f32.xlu0 %v5650_v2 }
0x1de5   :  { %v5637_v32 = vpop.xlane.xlu1 %5636 }
0x1de6   :  { %v5657_v54 = vmul.f32 0.03125, %v5637_v32  ;;  %v5634_v51 = vpop.xlane.xlu0 %5633 }
0x1de7   :  { %v5656_v55 = vmul.f32 0.03125, %v5634_v51 }
0x1de8   :  { %v10532_v24 = vsub.f32 %v5621_v41, %v5657_v54 }
0x1de9   :  { %v10534_v57 = vsub.f32 %v5620_v8, %v5656_v55  ;;  %v5643_v1 = vpop.xlane.xlu1 %5642 }
0x1dea   :  { %v5659_v36 = vmul.f32 0.03125, %v5643_v1  ;;  %v5640_v18 = vpop.xlane.xlu0 %5639  ;;  %v5673_v35 = vmul.f32 %v10532_v24, %v10532_v24 }
0x1deb   :  { %v5658_v23 = vmul.f32 0.03125, %v5640_v18  ;;  %v5672_v46 = vmul.f32 %v10534_v57, %v10534_v57 }
0x1dec   :  { %v10540_v62 = vsub.f32 %v5623_v10, %v5659_v36  ;;  %v5683_v38 = vsel %vm232_vm1, %v5673_v35, 0.0  ;;  %v5767_v10 = vld [vmem:[%s10658_s17 + $0x18] sm:$0xff]  ;;  %v6233_v36 = vld [vmem:[%s10656_s15 + $0x1] ss:$0 sm:$0xff] }
0x1ded   :  { %v10543_v26 = vsub.f32 %v5622_v3, %v5658_v23  ;;  %5684 = vadd.xlane.f32.xlu1 %v5683_v38  ;;  %v5649_v34 = vpop.xlane.xlu1 %5648  ;;  %v5680_v52 = vsel %vm232_vm1, %v5672_v46, 0.0  ;;  %v7734_v3 = vpack.c.bf16 %v5767_v10, %v5766_v40 }
0x1dee   :  { %v5661_v56 = vmul.f32 0.03125, %v5649_v34  ;;  %v5646_v14 = vpop.xlane.xlu0 %5645  ;;  %5681 = vadd.xlane.f32.xlu0 %v5680_v52  ;;  %v5675_v17 = vmul.f32 %v10540_v62, %v10540_v62  ;;  %v6234_v34 = vld [vmem:[%s10657_s16 + $0x1] ss:$0 sm:$0xff] }
0x1def   :  { %v5660_v12 = vmul.f32 0.03125, %v5646_v14  ;;  %v5674_v31 = vmul.f32 %v10543_v26, %v10543_v26  ;;  %7735 = vmatprep.subr.bf16.mxu0 %v7734_v3 }
0x1df0   :  { %v10550_v42 = vsub.f32 %v5625_v5, %v5661_v56  ;;  %v5689_v29 = vsel %vm232_vm1, %v5675_v17, 0.0  ;;  %7737 = vmatpush3.bf16.msra.mxu0 %v7734_v3 }
0x1df1   :  { %v10553_v15 = vsub.f32 %v5624_v0, %v5660_v12  ;;  %5690 = vadd.xlane.f32.xlu1 %v5689_v29  ;;  %v5655_v11 = vpop.xlane.xlu1 %5654  ;;  %v5686_v33 = vsel %vm232_vm1, %v5674_v31, 0.0 }
0x1df2   :  { %v5663_v27 = vmul.f32 0.03125, %v5655_v11  ;;  %5687 = vadd.xlane.f32.xlu0 %v5686_v33  ;;  %v5652_v43 = vpop.xlane.xlu0 %5651  ;;  %v5677_v53 = vmul.f32 %v10550_v42, %v10550_v42 }
0x1df3   :  { %v5662_v49 = vmul.f32 0.03125, %v5652_v43  ;;  %v5676_v59 = vmul.f32 %v10553_v15, %v10553_v15 }
0x1df4   :  { %v10560_v16 = vsub.f32 %v5627_v4, %v5663_v27  ;;  %v5695_v47 = vsel %vm232_vm1, %v5677_v53, 0.0 }
0x1df5   :  { %v10563_v50 = vsub.f32 %v5626_v6, %v5662_v49  ;;  %5696 = vadd.xlane.f32.xlu1 %v5695_v47  ;;  %v5692_v44 = vsel %vm232_vm1, %v5676_v59, 0.0 }
0x1df6   :  { %5693 = vadd.xlane.f32.xlu0 %v5692_v44  ;;  %v5679_v41 = vmul.f32 %v10560_v16, %v10560_v16 }
0x1df7   :  { %v5678_v8 = vmul.f32 %v10563_v50, %v10563_v50 }
0x1df8   :  { %v5701_v25 = vsel %vm232_vm1, %v5679_v41, 0.0 }
0x1df9   :  { %5702 = vadd.xlane.f32.xlu1 %v5701_v25  ;;  %v5698_v20 = vsel %vm232_vm1, %v5678_v8, 0.0 }
0x1dfa   :  { %5699 = vadd.xlane.f32.xlu0 %v5698_v20 }
0x1e7a   :  { %v5685_v7 = vpop.xlane.xlu1 %5684 }
0x1e7b   :  { %v5705_v30 = vmul.f32 0.03125, %v5685_v7  ;;  %v5682_v19 = vpop.xlane.xlu0 %5681 }
0x1e7c   :  { %v5704_v61 = vmul.f32 0.03125, %v5682_v19 }
0x1e7d   :  { %v5713_v28 = vadd.f32 1e-12, %v5705_v30 }
0x1e7e   :  { %v5712_v9 = vadd.f32 1e-12, %v5704_v61  ;;  %v5691_v5 = vpop.xlane.xlu1 %5690 }
0x1e7f   :  { %8411 = vrsqrt.f32 %v5713_v28  ;;  %v5707_v0 = vmul.f32 0.03125, %v5691_v5  ;;  %v5688_v39 = vpop.xlane.xlu0 %5687 }
0x1e80   :  { %8413 = vrsqrt.f32 %v5712_v9  ;;  %v5706_v58 = vmul.f32 0.03125, %v5688_v39 }
0x1e81   :  { %v5715_v63 = vadd.f32 1e-12, %v5707_v0 }
0x1e82   :  { %v5714_v60 = vadd.f32 1e-12, %v5706_v58  ;;  %v5697_v37 = vpop.xlane.xlu1 %5696 }
0x1e83   :  { %8415 = vrsqrt.f32 %v5715_v63  ;;  %v5709_v45 = vmul.f32 0.03125, %v5697_v37  ;;  %v5694_v4 = vpop.xlane.xlu0 %5693 }
0x1e84   :  { %8417 = vrsqrt.f32 %v5714_v60  ;;  %v5708_v6 = vmul.f32 0.03125, %v5694_v4 }
0x1e85   :  { %v5717_v21 = vadd.f32 1e-12, %v5709_v45 }
0x1e86   :  { %v5716_v2 = vadd.f32 1e-12, %v5708_v6  ;;  %v5703_v32 = vpop.xlane.xlu1 %5702 }
0x1e87   :  { %8419 = vrsqrt.f32 %v5717_v21  ;;  %v5711_v54 = vmul.f32 0.03125, %v5703_v32  ;;  %v5700_v51 = vpop.xlane.xlu0 %5699 }
0x1e88   :  { %8421 = vrsqrt.f32 %v5716_v2  ;;  %v5710_v55 = vmul.f32 0.03125, %v5700_v51 }
0x1e89   :  { %v8412_v1 = vpop.eup %8411  ;;  %v5719_v18 = vadd.f32 1e-12, %v5711_v54 }
0x1e8a   :  { %v8414_v35 = vpop.eup %8413  ;;  %v5729_v23 = vmul.f32 %v8412_v1, %v10532_v24  ;;  %v5718_v46 = vadd.f32 1e-12, %v5710_v55 }
0x1e8b   :  { %8423 = vrsqrt.f32 %v5719_v18  ;;  %v5728_v38 = vmul.f32 %v8414_v35, %v10534_v57 }
0x1e8c   :  { %v5743_v52 = vmul.f32 %v6233_v36, %v5729_v23  ;;  %8425 = vrsqrt.f32 %v5718_v46 }
0x1e8d   :  { %v8416_v56 = vpop.eup %8415  ;;  %v5742_v14 = vmul.f32 %v6233_v36, %v5728_v38 }
0x1e8e   :  { %v8418_v17 = vpop.eup %8417  ;;  %v5731_v12 = vmul.f32 %v8416_v56, %v10540_v62  ;;  %v5757_v11 = vadd.f32 %v6234_v34, %v5743_v52 }
0x1e8f   :  { %v5756_v31 = vadd.f32 %v6234_v34, %v5742_v14  ;;  %v5730_v29 = vmul.f32 %v8418_v17, %v10543_v26 }
0x1e90   :  { %v5745_v24 = vmul.f32 %v6233_v36, %v5731_v12 }
0x1e91   :  { %v8420_v33 = vpop.eup %8419  ;;  %7306 = vmatprep.mubr.msk.f32.mxu0 %vm232_vm1, %v5756_v31  ;;  %v5744_v57 = vmul.f32 %v6233_v36, %v5730_v29 }
0x1e92   :  { %v8422_v27 = vpop.eup %8421  ;;  %7307 = vmatmul.mubr.msk.f32.vlgmr.msra.gmra.mrb[100].mxu0 %vm232_vm1, %v5757_v11  ;;  %v5733_v43 = vmul.f32 %v8420_v33, %v10550_v42  ;;  %v5759_v59 = vadd.f32 %v6234_v34, %v5745_v24 }
0x1e93   :  { %v5758_v53 = vadd.f32 %v6234_v34, %v5744_v57  ;;  %v5732_v49 = vmul.f32 %v8422_v27, %v10553_v15 }
0x1e94   :  { %v5747_v47 = vmul.f32 %v6233_v36, %v5733_v43 }
0x1e95   :  { %v8424_v62 = vpop.eup %8423  ;;  %7309 = vmatprep.mubr.msk.f32.mxu0 %vm232_vm1, %v5758_v53  ;;  %v5746_v26 = vmul.f32 %v6233_v36, %v5732_v49 }
0x1e96   :  { %v8426_v44 = vpop.eup %8425  ;;  %7310 = vmatmul.mubr.msk.f32.gmra.mrb[102].mxu0 %vm232_vm1, %v5759_v59  ;;  %v5735_v41 = vmul.f32 %v8424_v62, %v10560_v16  ;;  %v5761_v20 = vadd.f32 %v6234_v34, %v5747_v47  ;;  %v6235_v16 = vld [vmem:[%s10659_s18] ss:$0 sm:$0xff] }
0x1e97   :  { %v5760_v8 = vadd.f32 %v6234_v34, %v5746_v26  ;;  %v5734_v25 = vmul.f32 %v8426_v44, %v10563_v50 }
0x1e98   :  { %v5749_v22 = vmul.f32 %v6233_v36, %v5735_v41 }
0x1e99   :  { %7312 = vmatprep.mubr.msk.f32.mxu0 %vm232_vm1, %v5760_v8  ;;  %v5748_v42 = vmul.f32 %v6233_v36, %v5734_v25 }
0x1e9a   :  { %7313 = vmatmul.mubr.msk.f32.gmra.mrb[104].mxu0 %vm232_vm1, %v5761_v20  ;;  %v5763_v13 = vadd.f32 %v6234_v34, %v5749_v22 }
0x1e9b   :  { %v5762_v15 = vadd.f32 %v6234_v34, %v5748_v42 }
0x1e9d   :  { %7315 = vmatprep.mubr.msk.f32.mxu0 %vm232_vm1, %v5762_v15 }
0x1e9e   :  { %7316 = vmatmul.mubr.msk.f32.gmra.mrb[106].mxu0 %vm232_vm1, %v5763_v13 }
0x1f65   :  { %v7308_v48 = vpop.f32.mrb[100].mxu0 }
0x1f66   :  { %v5871_v40 = vadd.f32 %v7308_v48, %v6235_v16  ;;  %v5865_v50 = vpop.f32.mrb[101].mxu0 }
0x1f67   :  { %v5866_v10 = vadd.f32 %v6235_v16, %v5865_v50 }
0x1f68   :  { %5905 = vst.msk [vmem:[%s10660_s19 + $0x8] sm:$0xff] %vm534_vm2, %v5871_v40 }
0x1f69   :  { %5904 = vst.msk [vmem:[%s10660_s19] sm:$0xff] %vm534_vm2, %v5866_v10  ;;  %v7311_v3 = vpop.f32.mrb[102].mxu0 }
0x1f6a   :  { %v5881_v7 = vadd.f32 %v7311_v3, %v6235_v16  ;;  %v5875_v30 = vpop.f32.mrb[103].mxu0 }
0x1f6b   :  { %v5876_v19 = vadd.f32 %v6235_v16, %v5875_v30 }
0x1f6c   :  { %5907 = vst.msk [vmem:[%s10660_s19 + $0x18] sm:$0xff] %vm534_vm2, %v5881_v7 }
0x1f6d   :  { %5906 = vst.msk [vmem:[%s10660_s19 + $0x10] sm:$0xff] %vm534_vm2, %v5876_v19  ;;  %v7314_v61 = vpop.f32.mrb[104].mxu0 }
0x1f6e   :  { %v5891_v28 = vadd.f32 %v7314_v61, %v6235_v16  ;;  %v5885_v9 = vpop.f32.mrb[105].mxu0 }
0x1f6f   :  { %v5886_v5 = vadd.f32 %v6235_v16, %v5885_v9 }
0x1f70   :  { %5909 = vst.msk [vmem:[%s10660_s19 + $0x28] sm:$0xff] %vm534_vm2, %v5891_v28 }
0x1f71   :  { %5908 = vst.msk [vmem:[%s10660_s19 + $0x20] sm:$0xff] %vm534_vm2, %v5886_v5  ;;  %v7317_v0 = vpop.f32.mrb[106].mxu0 }
0x1f72   :  { %v5901_v39 = vadd.f32 %v7317_v0, %v6235_v16  ;;  %v5895_v58 = vpop.f32.mrb[107].mxu0 }
0x1f73   :  { %v5896_v63 = vadd.f32 %v6235_v16, %v5895_v58 }
0x1f74   :  { %5911 = vst.msk [vmem:[%s10660_s19 + $0x38] sm:$0xff] %vm534_vm2, %v5901_v39 }
0x1f75   :  { %5910 = vst.msk [vmem:[%s10660_s19 + $0x30] sm:$0xff] %vm534_vm2, %v5896_v63 }
0x1f76   :  { %5916 = vsyncpa [#allocation4], 1 }

</bundles_post_ra>
